<compile_context>
chip_gen: v7x
topology: tpu7x:2x2x1
jax: 0.10.0
libtpu: 0.0.40
codegen_flags: <defaults>
</compile_context>

<pallas_src>
import functools

import jax
import jax.numpy as jnp
from jax.experimental import pallas as pl
from jax.experimental.pallas import tpu as pltpu


# ------------------------------ fused kernel --------------------------------

def _dfdt_fused_kernel(x_ref, stem_w_ref, stem_b_ref,
                       w1_ref, b1_ref, w2_ref, b2_ref, w3_ref, b3_ref,
                       o_ref,
                       pad_ref, col_ref,
                       *, H, W, C, mid, nblocks, cof):
    """One grid program == one image.  Everything stays on-chip."""
    HW = H * W
    cofl = jnp.float32(cof)

    # Zero the padded scratch once; only its centre is ever rewritten below,
    # so the zero halo survives across every 3x3 conv in this program.
    pad_ref[...] = jnp.zeros_like(pad_ref)

    def conv3x3(a, cin, w9, b):
        # a: (HW, cin) f32; w9: (9*cin, cout) bf16; b: (1, cout) f32.
        # Build the (HW, 9*cin) im2col operand entirely in VMEM (bf16), then
        # one wide-K MXU dot (instead of nine K=cin dots).
        # NOTE: reshapes keep the minor (channel) dim; W is a multiple of 8 so
        # they are layout-preserving for f32.
        a_bf16 = a.astype(jnp.bfloat16)
        pad_ref[1:H + 1, 1:W + 1, :cin] = a.reshape(H, W, cin)
        for k in range(9):
            dh, dw = k // 3, k % 3
            if dh == 1 and dw == 1:
                # Centre tap: the activation itself — skip the halo round-trip.
                col_ref[:, k * cin:(k + 1) * cin] = a_bf16
            else:
                patch = pad_ref[dh:dh + H, dw:dw + W, :cin]      # (H, W, cin)
                col_ref[:, k * cin:(k + 1) * cin] = (
                    patch.reshape(HW, cin).astype(jnp.bfloat16))
        col = col_ref[:, :9 * cin]                               # (HW, 9*cin) bf16
        y = jnp.dot(col, w9, preferred_element_type=jnp.float32)
        return y + b

    def conv1x1(a, w, b):
        # a: (HW, cin) f32; w: (cin, cout) bf16; b: (1, cout) f32.
        y = jnp.dot(a.astype(jnp.bfloat16), w,
                    preferred_element_type=jnp.float32)
        return y + b

    # Input arrives NCHW flattened to (1, C, H*W): lane-dense load, then the
    # layout transpose is done in-kernel (XLU), not as an XLA op.
    a = jnp.transpose(x_ref[0].astype(jnp.float32))              # (HW, C)

    # ---- stem: 3x3 conv + ReLU ----
    a = jnp.maximum(conv3x3(a, C, stem_w_ref[...], stem_b_ref[...]), 0.0)

    # ---- bottleneck blocks (unrolled; stacked weights are VMEM-resident) ----
    for blk in range(nblocks):
        identity = a
        h = jnp.maximum(conv1x1(a, w1_ref[blk], b1_ref[blk]), 0.0)
        h = jnp.maximum(conv3x3(h, mid, w2_ref[blk], b2_ref[blk]), 0.0)
        # fused: 1x1 conv + bias + COF-scaled identity residual + ReLU
        a = jnp.maximum(conv1x1(h, w3_ref[blk], b3_ref[blk])
                        + cofl * identity, 0.0)

    # Lane-dense store: (HW, C) -> (C, HW) so the minor dim is H*W.
    o_ref[0] = jnp.transpose(a).astype(o_ref.dtype)


@functools.partial(jax.jit,
                   static_argnames=("H", "W", "C", "mid", "nblocks", "cof"))
def dfdt_forward(x2, stem_w, stem_b, w1, b1, w2, b2, w3, b3,
                 *, H, W, C, mid, nblocks, cof):
    """x2: (N, C, H*W) f32 -> (N, C, H*W) f32, one fused pallas_call."""
    N = x2.shape[0]
    HW = H * W
    kernel = functools.partial(_dfdt_fused_kernel, H=H, W=W, C=C, mid=mid,
                               nblocks=nblocks, cof=cof)

    def rep(shape):
        # Full-array block, constant index -> DMA'd to VMEM once and reused.
        nd = len(shape)
        return pl.BlockSpec(shape, lambda n, _nd=nd: (0,) * _nd)

    return pl.pallas_call(
        kernel,
        out_shape=jax.ShapeDtypeStruct((N, C, HW), jnp.float32),
        grid=(N,),
        in_specs=[
            pl.BlockSpec((1, C, HW), lambda n: (n, 0, 0)),
            rep(stem_w.shape), rep(stem_b.shape),
            rep(w1.shape), rep(b1.shape),
            rep(w2.shape), rep(b2.shape),
            rep(w3.shape), rep(b3.shape),
        ],
        out_specs=pl.BlockSpec((1, C, HW), lambda n: (n, 0, 0)),
        scratch_shapes=[
            pltpu.VMEM((H + 2, W + 2, C), jnp.float32),   # halo-padded tile
            pltpu.VMEM((HW, 9 * C), jnp.bfloat16),        # im2col operand (MXU dtype)
        ],
        compiler_params=pltpu.CompilerParams(
            dimension_semantics=("parallel",)),           # feeds both v7x TCs
    )(x2, stem_w, stem_b, w1, b1, w2, b2, w3, b3)


# --------------------------- parameter construction -------------------------

def _uniform(key, shape, fan_in):
    scale = 1.0 / float(fan_in) ** 0.5
    return jax.random.uniform(key, shape, jnp.float32, -scale, scale)


def init_params(key, channel_in, num_stages, layer_config, groups):
    C = channel_in
    mid = channel_in // groups
    nb = int(sum(layer_config[:num_stages]))
    assert nb >= 1
    ks = jax.random.split(key, 8)
    params = dict(
        # stem 3x3 weight stored directly in im2col layout (9*C, C); rows are
        # ordered tap-major ((dh, dw) with dw minor), channel-minor — this must
        # match the in-kernel gather order in conv3x3.
        stem_w=_uniform(ks[0], (9 * C, C), 9 * C).astype(jnp.bfloat16),
        stem_b=_uniform(ks[1], (1, C), 9 * C),
        # per-block weights stacked along the leading (block) axis
        w1=_uniform(ks[2], (nb, C, mid), C).astype(jnp.bfloat16),      # 1x1 reduce
        b1=_uniform(ks[3], (nb, 1, mid), C),
        w2=_uniform(ks[4], (nb, 9 * mid, mid), 9 * mid).astype(jnp.bfloat16),  # 3x3
        b2=_uniform(ks[5], (nb, 1, mid), 9 * mid),
        w3=_uniform(ks[6], (nb, mid, C), mid).astype(jnp.bfloat16),    # 1x1 expand
        b3=_uniform(ks[7], (nb, 1, C), mid),
    )
    return params, nb, mid


# ------------------------------- Mid_Xnet ------------------------------------

class MidXnetPallas:
    def __init__(self, channel_in, layer, groups=8, layer_config=(2, 8, 2, 8),
                 COF=31 / 64, key=None):
        assert channel_in % groups == 0
        if key is None:
            key = jax.random.PRNGKey(0)
        self.channel_in = channel_in
        self.cof = float(COF)
        self.params, self.nblocks, self.mid = init_params(
            key, channel_in, num_stages=layer, layer_config=layer_config,
            groups=groups)

    def __call__(self, xs):
        """xs: list of NCHW float32 arrays; returns list of NCHW arrays."""
        p = self.params
        reshaped, BT = [], None
        for x in xs:
            BT = x.shape[0]            # matches reference quirk: last BT is kept
            H, W = x.shape[2], x.shape[3]
            reshaped.append(x.reshape(-1, self.channel_in, H, W))
        outs = []
        for xr in reshaped:
            N, C, H, W = xr.shape
            x2 = xr.reshape(N, C, H * W)     # free row-major reshape (no copy)
            y2 = dfdt_forward(
                x2, p["stem_w"], p["stem_b"], p["w1"], p["b1"],
                p["w2"], p["b2"], p["w3"], p["b3"],
                H=H, W=W, C=C, mid=self.mid, nblocks=self.nblocks,
                cof=self.cof)
            y = y2.reshape(N, C, H, W)
            outs.append(y.reshape(BT, -1, H, W))
        return outs


# --------------------------------- demo --------------------------------------

if __name__ == "__main__":
    key = jax.random.PRNGKey(0)
    kx1, kx2, kp = jax.random.split(key, 3)

    channel_in, groups, layer = 16, 4, 2
    layer_config = (2, 2, 2, 8)      # only the first `layer` entries are used
    BT = 2

    x = [
        jax.random.normal(kx1, (BT, channel_in, 8, 8), jnp.float32),
        jax.random.normal(kx2, (BT, channel_in, 16, 16), jnp.float32),
    ]

    net = MidXnetPallas(channel_in, layer, groups=groups,
                        layer_config=layer_config, COF=31 / 64, key=kp)
    out = net(x)
    for o in out:
        jax.block_until_ready(o)

    assert out[0].shape == (BT, channel_in, 8, 8)
    assert out[1].shape == (BT, channel_in, 16, 16)
    assert all(bool(jnp.all(jnp.isfinite(o))) for o in out)
    print("KERNEL_OK")
</pallas_src>

<mosaic_0001>
module attributes {stable_mosaic.version = 11 : i64} {
  func.func @_dfdt_fused_kernel(%arg0: i32, %arg1: memref<1x16x64xf32, #tpu.memory_space<vmem>>, %arg2: memref<144x16xbf16, #tpu.memory_space<vmem>>, %arg3: memref<1x16xf32, #tpu.memory_space<vmem>>, %arg4: memref<4x16x4xbf16, #tpu.memory_space<vmem>>, %arg5: memref<4x1x4xf32, #tpu.memory_space<vmem>>, %arg6: memref<4x36x4xbf16, #tpu.memory_space<vmem>>, %arg7: memref<4x1x4xf32, #tpu.memory_space<vmem>>, %arg8: memref<4x4x16xbf16, #tpu.memory_space<vmem>>, %arg9: memref<4x1x16xf32, #tpu.memory_space<vmem>>, %arg10: memref<1x16x64xf32, #tpu.memory_space<vmem>>, %arg11: memref<10x10x16xf32, #tpu.memory_space<vmem>>, %arg12: memref<64x144xbf16, #tpu.memory_space<vmem>>) attributes {dimension_semantics = [#tpu.dimension_semantics<parallel>], iteration_bounds = array<i64: 2>, scalar_prefetch = 0 : i64, scratch_operands = 2 : i64, tpu.core_type = #tpu.core_type<tc>, window_params = [{transform_indices = @transform_0, window_bounds = array<i64: 1, 16, 64>}, {pipeline_mode = #tpu.pipeline_mode<synchronous>, transform_indices = @transform_1, window_bounds = array<i64: 144, 16>}, {pipeline_mode = #tpu.pipeline_mode<synchronous>, transform_indices = @transform_2, window_bounds = array<i64: 1, 16>}, {pipeline_mode = #tpu.pipeline_mode<synchronous>, transform_indices = @transform_3, window_bounds = array<i64: 4, 16, 4>}, {pipeline_mode = #tpu.pipeline_mode<synchronous>, transform_indices = @transform_4, window_bounds = array<i64: 4, 1, 4>}, {pipeline_mode = #tpu.pipeline_mode<synchronous>, transform_indices = @transform_5, window_bounds = array<i64: 4, 36, 4>}, {pipeline_mode = #tpu.pipeline_mode<synchronous>, transform_indices = @transform_6, window_bounds = array<i64: 4, 1, 4>}, {pipeline_mode = #tpu.pipeline_mode<synchronous>, transform_indices = @transform_7, window_bounds = array<i64: 4, 4, 16>}, {pipeline_mode = #tpu.pipeline_mode<synchronous>, transform_indices = @transform_8, window_bounds = array<i64: 4, 1, 16>}, {transform_indices = @transform_9, window_bounds = array<i64: 1, 16, 64>}]} {
    %cst = arith.constant 0.000000e+00 : f32
    %0 = vector.broadcast %cst : f32 to vector<10x10x16xf32>
    %c0 = arith.constant 0 : index
    %c0_0 = arith.constant 0 : index
    %c0_1 = arith.constant 0 : index
    %1 = vector.load %arg11[%c0, %c0_0, %c0_1] : memref<10x10x16xf32, #tpu.memory_space<vmem>>, vector<10x10x16xf32>
    tpu.vector_store %arg11[%c0, %c0_0, %c0_1], %0 {strides = array<i32>} : memref<10x10x16xf32, #tpu.memory_space<vmem>>, vector<10x10x16xf32>,
    %c0_2 = arith.constant 0 : index
    %c0_3 = arith.constant 0 : index
    %c0_4 = arith.constant 0 : index
    %2 = vector.load %arg1[%c0_2, %c0_3, %c0_4] : memref<1x16x64xf32, #tpu.memory_space<vmem>>, vector<1x16x64xf32>
    %3 = vector.shape_cast %2 : vector<1x16x64xf32> to vector<16x64xf32>
    %4 = tpu.transpose %3, [1, 0] : vector<16x64xf32> -> vector<64x16xf32>
    %c0_5 = arith.constant 0 : index
    %c0_6 = arith.constant 0 : index
    %5 = vector.load %arg2[%c0_5, %c0_6] : memref<144x16xbf16, #tpu.memory_space<vmem>>, vector<144x16xbf16>
    %c0_7 = arith.constant 0 : index
    %c0_8 = arith.constant 0 : index
    %6 = vector.load %arg3[%c0_7, %c0_8] : memref<1x16xf32, #tpu.memory_space<vmem>>, vector<1x16xf32>
    %7 = arith.truncf %4 : vector<64x16xf32> to vector<64x16xbf16>
    %8 = vector.shape_cast %4 : vector<64x16xf32> to vector<8x8x16xf32>
    %c1 = arith.constant 1 : index
    %c1_9 = arith.constant 1 : index
    %c0_10 = arith.constant 0 : index
    %9 = vector.load %arg11[%c1, %c1_9, %c0_10] : memref<10x10x16xf32, #tpu.memory_space<vmem>>, vector<8x8x16xf32>
    tpu.vector_store %arg11[%c1, %c1_9, %c0_10], %8 {strides = array<i32>} : memref<10x10x16xf32, #tpu.memory_space<vmem>>, vector<8x8x16xf32>,
    %c0_11 = arith.constant 0 : index
    %c0_12 = arith.constant 0 : index
    %c0_13 = arith.constant 0 : index
    %10 = vector.load %arg11[%c0_11, %c0_12, %c0_13] : memref<10x10x16xf32, #tpu.memory_space<vmem>>, vector<8x8x16xf32>
    %11 = vector.shape_cast %10 : vector<8x8x16xf32> to vector<64x16xf32>
    %12 = arith.truncf %11 : vector<64x16xf32> to vector<64x16xbf16>
    %c0_14 = arith.constant 0 : index
    %c0_15 = arith.constant 0 : index
    %13 = vector.load %arg12[%c0_14, %c0_15] : memref<64x144xbf16, #tpu.memory_space<vmem>>, vector<64x16xbf16>
    tpu.vector_store %arg12[%c0_14, %c0_15], %12 {strides = array<i32>} : memref<64x144xbf16, #tpu.memory_space<vmem>>, vector<64x16xbf16>,
    %c0_16 = arith.constant 0 : index
    %c1_17 = arith.constant 1 : index
    %c0_18 = arith.constant 0 : index
    %14 = vector.load %arg11[%c0_16, %c1_17, %c0_18] : memref<10x10x16xf32, #tpu.memory_space<vmem>>, vector<8x8x16xf32>
    %15 = vector.shape_cast %14 : vector<8x8x16xf32> to vector<64x16xf32>
    %16 = arith.truncf %15 : vector<64x16xf32> to vector<64x16xbf16>
    %c0_19 = arith.constant 0 : index
    %c16 = arith.constant 16 : index
    %17 = vector.load %arg12[%c0_19, %c16] : memref<64x144xbf16, #tpu.memory_space<vmem>>, vector<64x16xbf16>
    tpu.vector_store %arg12[%c0_19, %c16], %16 {strides = array<i32>} : memref<64x144xbf16, #tpu.memory_space<vmem>>, vector<64x16xbf16>,
    %c0_20 = arith.constant 0 : index
    %c2 = arith.constant 2 : index
    %c0_21 = arith.constant 0 : index
    %18 = vector.load %arg11[%c0_20, %c2, %c0_21] : memref<10x10x16xf32, #tpu.memory_space<vmem>>, vector<8x8x16xf32>
    %19 = vector.shape_cast %18 : vector<8x8x16xf32> to vector<64x16xf32>
    %20 = arith.truncf %19 : vector<64x16xf32> to vector<64x16xbf16>
    %c0_22 = arith.constant 0 : index
    %c32 = arith.constant 32 : index
    %21 = vector.load %arg12[%c0_22, %c32] : memref<64x144xbf16, #tpu.memory_space<vmem>>, vector<64x16xbf16>
    tpu.vector_store %arg12[%c0_22, %c32], %20 {strides = array<i32>} : memref<64x144xbf16, #tpu.memory_space<vmem>>, vector<64x16xbf16>,
    %c1_23 = arith.constant 1 : index
    %c0_24 = arith.constant 0 : index
    %c0_25 = arith.constant 0 : index
    %22 = vector.load %arg11[%c1_23, %c0_24, %c0_25] : memref<10x10x16xf32, #tpu.memory_space<vmem>>, vector<8x8x16xf32>
    %23 = vector.shape_cast %22 : vector<8x8x16xf32> to vector<64x16xf32>
    %24 = arith.truncf %23 : vector<64x16xf32> to vector<64x16xbf16>
    %c0_26 = arith.constant 0 : index
    %c48 = arith.constant 48 : index
    %25 = vector.load %arg12[%c0_26, %c48] : memref<64x144xbf16, #tpu.memory_space<vmem>>, vector<64x16xbf16>
    tpu.vector_store %arg12[%c0_26, %c48], %24 {strides = array<i32>} : memref<64x144xbf16, #tpu.memory_space<vmem>>, vector<64x16xbf16>,
    %c0_27 = arith.constant 0 : index
    %c64 = arith.constant 64 : index
    %26 = vector.load %arg12[%c0_27, %c64] : memref<64x144xbf16, #tpu.memory_space<vmem>>, vector<64x16xbf16>
    tpu.vector_store %arg12[%c0_27, %c64], %7 {strides = array<i32>} : memref<64x144xbf16, #tpu.memory_space<vmem>>, vector<64x16xbf16>,
    %c1_28 = arith.constant 1 : index
    %c2_29 = arith.constant 2 : index
    %c0_30 = arith.constant 0 : index
    %27 = vector.load %arg11[%c1_28, %c2_29, %c0_30] : memref<10x10x16xf32, #tpu.memory_space<vmem>>, vector<8x8x16xf32>
    %28 = vector.shape_cast %27 : vector<8x8x16xf32> to vector<64x16xf32>
    %29 = arith.truncf %28 : vector<64x16xf32> to vector<64x16xbf16>
    %c0_31 = arith.constant 0 : index
    %c80 = arith.constant 80 : index
    %30 = vector.load %arg12[%c0_31, %c80] : memref<64x144xbf16, #tpu.memory_space<vmem>>, vector<64x16xbf16>
    tpu.vector_store %arg12[%c0_31, %c80], %29 {strides = array<i32>} : memref<64x144xbf16, #tpu.memory_space<vmem>>, vector<64x16xbf16>,
    %c2_32 = arith.constant 2 : index
    %c0_33 = arith.constant 0 : index
    %c0_34 = arith.constant 0 : index
    %31 = vector.load %arg11[%c2_32, %c0_33, %c0_34] : memref<10x10x16xf32, #tpu.memory_space<vmem>>, vector<8x8x16xf32>
    %32 = vector.shape_cast %31 : vector<8x8x16xf32> to vector<64x16xf32>
    %33 = arith.truncf %32 : vector<64x16xf32> to vector<64x16xbf16>
    %c0_35 = arith.constant 0 : index
    %c96 = arith.constant 96 : index
    %34 = vector.load %arg12[%c0_35, %c96] : memref<64x144xbf16, #tpu.memory_space<vmem>>, vector<64x16xbf16>
    tpu.vector_store %arg12[%c0_35, %c96], %33 {strides = array<i32>} : memref<64x144xbf16, #tpu.memory_space<vmem>>, vector<64x16xbf16>,
    %c2_36 = arith.constant 2 : index
    %c1_37 = arith.constant 1 : index
    %c0_38 = arith.constant 0 : index
    %35 = vector.load %arg11[%c2_36, %c1_37, %c0_38] : memref<10x10x16xf32, #tpu.memory_space<vmem>>, vector<8x8x16xf32>
    %36 = vector.shape_cast %35 : vector<8x8x16xf32> to vector<64x16xf32>
    %37 = arith.truncf %36 : vector<64x16xf32> to vector<64x16xbf16>
    %c0_39 = arith.constant 0 : index
    %c112 = arith.constant 112 : index
    %38 = vector.load %arg12[%c0_39, %c112] : memref<64x144xbf16, #tpu.memory_space<vmem>>, vector<64x16xbf16>
    tpu.vector_store %arg12[%c0_39, %c112], %37 {strides = array<i32>} : memref<64x144xbf16, #tpu.memory_space<vmem>>, vector<64x16xbf16>,
    %c2_40 = arith.constant 2 : index
    %c2_41 = arith.constant 2 : index
    %c0_42 = arith.constant 0 : index
    %39 = vector.load %arg11[%c2_40, %c2_41, %c0_42] : memref<10x10x16xf32, #tpu.memory_space<vmem>>, vector<8x8x16xf32>
    %40 = vector.shape_cast %39 : vector<8x8x16xf32> to vector<64x16xf32>
    %41 = arith.truncf %40 : vector<64x16xf32> to vector<64x16xbf16>
    %c0_43 = arith.constant 0 : index
    %c128 = arith.constant 128 : index
    %42 = vector.load %arg12[%c0_43, %c128] : memref<64x144xbf16, #tpu.memory_space<vmem>>, vector<64x16xbf16>
    tpu.vector_store %arg12[%c0_43, %c128], %41 {strides = array<i32>} : memref<64x144xbf16, #tpu.memory_space<vmem>>, vector<64x16xbf16>,
    %c0_44 = arith.constant 0 : index
    %c0_45 = arith.constant 0 : index
    %43 = vector.load %arg12[%c0_44, %c0_45] : memref<64x144xbf16, #tpu.memory_space<vmem>>, vector<64x144xbf16>
    %cst_46 = arith.constant dense<0.000000e+00> : vector<64x16xf32>
    %44 = tpu.matmul %43, %5, %cst_46 {dimension_numbers = #tpu.dot_dimension_numbers<[1], [0], [0], [1], [0, 0, 1, 1], [], []>} : vector<64x144xbf16>, vector<144x16xbf16>, vector<64x16xf32> -> vector<64x16xf32>
    %45 = vector.broadcast %6 : vector<1x16xf32> to vector<64x16xf32>
    %46 = arith.addf %44, %45 : vector<64x16xf32>
    %cst_47 = arith.constant 0.000000e+00 : f32
    %47 = vector.broadcast %cst_47 : f32 to vector<64x16xf32>
    %48 = arith.maximumf %46, %47 : vector<64x16xf32>
    %c0_48 = arith.constant 0 : index
    %c0_49 = arith.constant 0 : index
    %c0_50 = arith.constant 0 : index
    %49 = vector.load %arg4[%c0_48, %c0_49, %c0_50] : memref<4x16x4xbf16, #tpu.memory_space<vmem>>, vector<1x16x4xbf16>
    %50 = vector.shape_cast %49 : vector<1x16x4xbf16> to vector<16x4xbf16>
    %c0_51 = arith.constant 0 : index
    %c0_52 = arith.constant 0 : index
    %c0_53 = arith.constant 0 : index
    %51 = vector.load %arg5[%c0_51, %c0_52, %c0_53] : memref<4x1x4xf32, #tpu.memory_space<vmem>>, vector<1x1x4xf32>
    %52 = vector.shape_cast %51 : vector<1x1x4xf32> to vector<1x4xf32>
    %53 = arith.truncf %48 : vector<64x16xf32> to vector<64x16xbf16>
    %cst_54 = arith.constant dense<0.000000e+00> : vector<64x4xf32>
    %54 = tpu.matmul %53, %50, %cst_54 {dimension_numbers = #tpu.dot_dimension_numbers<[1], [0], [0], [1], [0, 0, 1, 1], [], []>} : vector<64x16xbf16>, vector<16x4xbf16>, vector<64x4xf32> -> vector<64x4xf32>
    %55 = vector.broadcast %52 : vector<1x4xf32> to vector<64x4xf32>
    %56 = arith.addf %54, %55 : vector<64x4xf32>
    %cst_55 = arith.constant 0.000000e+00 : f32
    %57 = vector.broadcast %cst_55 : f32 to vector<64x4xf32>
    %58 = arith.maximumf %56, %57 : vector<64x4xf32>
    %c0_56 = arith.constant 0 : index
    %c0_57 = arith.constant 0 : index
    %c0_58 = arith.constant 0 : index
    %59 = vector.load %arg6[%c0_56, %c0_57, %c0_58] : memref<4x36x4xbf16, #tpu.memory_space<vmem>>, vector<1x36x4xbf16>
    %60 = vector.shape_cast %59 : vector<1x36x4xbf16> to vector<36x4xbf16>
    %c0_59 = arith.constant 0 : index
    %c0_60 = arith.constant 0 : index
    %c0_61 = arith.constant 0 : index
    %61 = vector.load %arg7[%c0_59, %c0_60, %c0_61] : memref<4x1x4xf32, #tpu.memory_space<vmem>>, vector<1x1x4xf32>
    %62 = vector.shape_cast %61 : vector<1x1x4xf32> to vector<1x4xf32>
    %63 = arith.truncf %58 : vector<64x4xf32> to vector<64x4xbf16>
    %64 = vector.shape_cast %58 : vector<64x4xf32> to vector<8x8x4xf32>
    %c1_62 = arith.constant 1 : index
    %c1_63 = arith.constant 1 : index
    %c0_64 = arith.constant 0 : index
    %65 = vector.load %arg11[%c1_62, %c1_63, %c0_64] : memref<10x10x16xf32, #tpu.memory_space<vmem>>, vector<8x8x4xf32>
    tpu.vector_store %arg11[%c1_62, %c1_63, %c0_64], %64 {strides = array<i32>} : memref<10x10x16xf32, #tpu.memory_space<vmem>>, vector<8x8x4xf32>,
    %c0_65 = arith.constant 0 : index
    %c0_66 = arith.constant 0 : index
    %c0_67 = arith.constant 0 : index
    %66 = vector.load %arg11[%c0_65, %c0_66, %c0_67] : memref<10x10x16xf32, #tpu.memory_space<vmem>>, vector<8x8x4xf32>
    %67 = vector.shape_cast %66 : vector<8x8x4xf32> to vector<64x4xf32>
    %68 = arith.truncf %67 : vector<64x4xf32> to vector<64x4xbf16>
    %c0_68 = arith.constant 0 : index
    %c0_69 = arith.constant 0 : index
    %69 = vector.load %arg12[%c0_68, %c0_69] : memref<64x144xbf16, #tpu.memory_space<vmem>>, vector<64x4xbf16>
    tpu.vector_store %arg12[%c0_68, %c0_69], %68 {strides = array<i32>} : memref<64x144xbf16, #tpu.memory_space<vmem>>, vector<64x4xbf16>,
    %c0_70 = arith.constant 0 : index
    %c1_71 = arith.constant 1 : index
    %c0_72 = arith.constant 0 : index
    %70 = vector.load %arg11[%c0_70, %c1_71, %c0_72] : memref<10x10x16xf32, #tpu.memory_space<vmem>>, vector<8x8x4xf32>
    %71 = vector.shape_cast %70 : vector<8x8x4xf32> to vector<64x4xf32>
    %72 = arith.truncf %71 : vector<64x4xf32> to vector<64x4xbf16>
    %c0_73 = arith.constant 0 : index
    %c4 = arith.constant 4 : index
    %73 = vector.load %arg12[%c0_73, %c4] : memref<64x144xbf16, #tpu.memory_space<vmem>>, vector<64x4xbf16>
    tpu.vector_store %arg12[%c0_73, %c4], %72 {strides = array<i32>} : memref<64x144xbf16, #tpu.memory_space<vmem>>, vector<64x4xbf16>,
    %c0_74 = arith.constant 0 : index
    %c2_75 = arith.constant 2 : index
    %c0_76 = arith.constant 0 : index
    %74 = vector.load %arg11[%c0_74, %c2_75, %c0_76] : memref<10x10x16xf32, #tpu.memory_space<vmem>>, vector<8x8x4xf32>
    %75 = vector.shape_cast %74 : vector<8x8x4xf32> to vector<64x4xf32>
    %76 = arith.truncf %75 : vector<64x4xf32> to vector<64x4xbf16>
    %c0_77 = arith.constant 0 : index
    %c8 = arith.constant 8 : index
    %77 = vector.load %arg12[%c0_77, %c8] : memref<64x144xbf16, #tpu.memory_space<vmem>>, vector<64x4xbf16>
    tpu.vector_store %arg12[%c0_77, %c8], %76 {strides = array<i32>} : memref<64x144xbf16, #tpu.memory_space<vmem>>, vector<64x4xbf16>,
    %c1_78 = arith.constant 1 : index
    %c0_79 = arith.constant 0 : index
    %c0_80 = arith.constant 0 : index
    %78 = vector.load %arg11[%c1_78, %c0_79, %c0_80] : memref<10x10x16xf32, #tpu.memory_space<vmem>>, vector<8x8x4xf32>
    %79 = vector.shape_cast %78 : vector<8x8x4xf32> to vector<64x4xf32>
    %80 = arith.truncf %79 : vector<64x4xf32> to vector<64x4xbf16>
    %c0_81 = arith.constant 0 : index
    %c12 = arith.constant 12 : index
    %81 = vector.load %arg12[%c0_81, %c12] : memref<64x144xbf16, #tpu.memory_space<vmem>>, vector<64x4xbf16>
    tpu.vector_store %arg12[%c0_81, %c12], %80 {strides = array<i32>} : memref<64x144xbf16, #tpu.memory_space<vmem>>, vector<64x4xbf16>,
    %c0_82 = arith.constant 0 : index
    %c16_83 = arith.constant 16 : index
    %82 = vector.load %arg12[%c0_82, %c16_83] : memref<64x144xbf16, #tpu.memory_space<vmem>>, vector<64x4xbf16>
    tpu.vector_store %arg12[%c0_82, %c16_83], %63 {strides = array<i32>} : memref<64x144xbf16, #tpu.memory_space<vmem>>, vector<64x4xbf16>,
    %c1_84 = arith.constant 1 : index
    %c2_85 = arith.constant 2 : index
    %c0_86 = arith.constant 0 : index
    %83 = vector.load %arg11[%c1_84, %c2_85, %c0_86] : memref<10x10x16xf32, #tpu.memory_space<vmem>>, vector<8x8x4xf32>
    %84 = vector.shape_cast %83 : vector<8x8x4xf32> to vector<64x4xf32>
    %85 = arith.truncf %84 : vector<64x4xf32> to vector<64x4xbf16>
    %c0_87 = arith.constant 0 : index
    %c20 = arith.constant 20 : index
    %86 = vector.load %arg12[%c0_87, %c20] : memref<64x144xbf16, #tpu.memory_space<vmem>>, vector<64x4xbf16>
    tpu.vector_store %arg12[%c0_87, %c20], %85 {strides = array<i32>} : memref<64x144xbf16, #tpu.memory_space<vmem>>, vector<64x4xbf16>,
    %c2_88 = arith.constant 2 : index
    %c0_89 = arith.constant 0 : index
    %c0_90 = arith.constant 0 : index
    %87 = vector.load %arg11[%c2_88, %c0_89, %c0_90] : memref<10x10x16xf32, #tpu.memory_space<vmem>>, vector<8x8x4xf32>
    %88 = vector.shape_cast %87 : vector<8x8x4xf32> to vector<64x4xf32>
    %89 = arith.truncf %88 : vector<64x4xf32> to vector<64x4xbf16>
    %c0_91 = arith.constant 0 : index
    %c24 = arith.constant 24 : index
    %90 = vector.load %arg12[%c0_91, %c24] : memref<64x144xbf16, #tpu.memory_space<vmem>>, vector<64x4xbf16>
    tpu.vector_store %arg12[%c0_91, %c24], %89 {strides = array<i32>} : memref<64x144xbf16, #tpu.memory_space<vmem>>, vector<64x4xbf16>,
    %c2_92 = arith.constant 2 : index
    %c1_93 = arith.constant 1 : index
    %c0_94 = arith.constant 0 : index
    %91 = vector.load %arg11[%c2_92, %c1_93, %c0_94] : memref<10x10x16xf32, #tpu.memory_space<vmem>>, vector<8x8x4xf32>
    %92 = vector.shape_cast %91 : vector<8x8x4xf32> to vector<64x4xf32>
    %93 = arith.truncf %92 : vector<64x4xf32> to vector<64x4xbf16>
    %c0_95 = arith.constant 0 : index
    %c28 = arith.constant 28 : index
    %94 = vector.load %arg12[%c0_95, %c28] : memref<64x144xbf16, #tpu.memory_space<vmem>>, vector<64x4xbf16>
    tpu.vector_store %arg12[%c0_95, %c28], %93 {strides = array<i32>} : memref<64x144xbf16, #tpu.memory_space<vmem>>, vector<64x4xbf16>,
    %c2_96 = arith.constant 2 : index
    %c2_97 = arith.constant 2 : index
    %c0_98 = arith.constant 0 : index
    %95 = vector.load %arg11[%c2_96, %c2_97, %c0_98] : memref<10x10x16xf32, #tpu.memory_space<vmem>>, vector<8x8x4xf32>
    %96 = vector.shape_cast %95 : vector<8x8x4xf32> to vector<64x4xf32>
    %97 = arith.truncf %96 : vector<64x4xf32> to vector<64x4xbf16>
    %c0_99 = arith.constant 0 : index
    %c32_100 = arith.constant 32 : index
    %98 = vector.load %arg12[%c0_99, %c32_100] : memref<64x144xbf16, #tpu.memory_space<vmem>>, vector<64x4xbf16>
    tpu.vector_store %arg12[%c0_99, %c32_100], %97 {strides = array<i32>} : memref<64x144xbf16, #tpu.memory_space<vmem>>, vector<64x4xbf16>,
    %c0_101 = arith.constant 0 : index
    %c0_102 = arith.constant 0 : index
    %99 = vector.load %arg12[%c0_101, %c0_102] : memref<64x144xbf16, #tpu.memory_space<vmem>>, vector<64x36xbf16>
    %cst_103 = arith.constant dense<0.000000e+00> : vector<64x4xf32>
    %100 = tpu.matmul %99, %60, %cst_103 {dimension_numbers = #tpu.dot_dimension_numbers<[1], [0], [0], [1], [0, 0, 1, 1], [], []>} : vector<64x36xbf16>, vector<36x4xbf16>, vector<64x4xf32> -> vector<64x4xf32>
    %101 = vector.broadcast %62 : vector<1x4xf32> to vector<64x4xf32>
    %102 = arith.addf %100, %101 : vector<64x4xf32>
    %cst_104 = arith.constant 0.000000e+00 : f32
    %103 = vector.broadcast %cst_104 : f32 to vector<64x4xf32>
    %104 = arith.maximumf %102, %103 : vector<64x4xf32>
    %c0_105 = arith.constant 0 : index
    %c0_106 = arith.constant 0 : index
    %c0_107 = arith.constant 0 : index
    %105 = vector.load %arg8[%c0_105, %c0_106, %c0_107] : memref<4x4x16xbf16, #tpu.memory_space<vmem>>, vector<1x4x16xbf16>
    %106 = vector.shape_cast %105 : vector<1x4x16xbf16> to vector<4x16xbf16>
    %c0_108 = arith.constant 0 : index
    %c0_109 = arith.constant 0 : index
    %c0_110 = arith.constant 0 : index
    %107 = vector.load %arg9[%c0_108, %c0_109, %c0_110] : memref<4x1x16xf32, #tpu.memory_space<vmem>>, vector<1x1x16xf32>
    %108 = vector.shape_cast %107 : vector<1x1x16xf32> to vector<1x16xf32>
    %109 = arith.truncf %104 : vector<64x4xf32> to vector<64x4xbf16>
    %cst_111 = arith.constant dense<0.000000e+00> : vector<64x16xf32>
    %110 = tpu.matmul %109, %106, %cst_111 {dimension_numbers = #tpu.dot_dimension_numbers<[1], [0], [0], [1], [0, 0, 1, 1], [], []>} : vector<64x4xbf16>, vector<4x16xbf16>, vector<64x16xf32> -> vector<64x16xf32>
    %111 = vector.broadcast %108 : vector<1x16xf32> to vector<64x16xf32>
    %112 = arith.addf %110, %111 : vector<64x16xf32>
    %cst_112 = arith.constant 4.843750e-01 : f32
    %113 = vector.broadcast %cst_112 : f32 to vector<64x16xf32>
    %114 = arith.mulf %113, %48 : vector<64x16xf32>
    %115 = arith.addf %112, %114 : vector<64x16xf32>
    %cst_113 = arith.constant 0.000000e+00 : f32
    %116 = vector.broadcast %cst_113 : f32 to vector<64x16xf32>
    %117 = arith.maximumf %115, %116 : vector<64x16xf32>
    %c1_114 = arith.constant 1 : index
    %c0_115 = arith.constant 0 : index
    %c0_116 = arith.constant 0 : index
    %118 = vector.load %arg4[%c1_114, %c0_115, %c0_116] : memref<4x16x4xbf16, #tpu.memory_space<vmem>>, vector<1x16x4xbf16>
    %119 = vector.shape_cast %118 : vector<1x16x4xbf16> to vector<16x4xbf16>
    %c1_117 = arith.constant 1 : index
    %c0_118 = arith.constant 0 : index
    %c0_119 = arith.constant 0 : index
    %120 = vector.load %arg5[%c1_117, %c0_118, %c0_119] : memref<4x1x4xf32, #tpu.memory_space<vmem>>, vector<1x1x4xf32>
    %121 = vector.shape_cast %120 : vector<1x1x4xf32> to vector<1x4xf32>
    %122 = arith.truncf %117 : vector<64x16xf32> to vector<64x16xbf16>
    %cst_120 = arith.constant dense<0.000000e+00> : vector<64x4xf32>
    %123 = tpu.matmul %122, %119, %cst_120 {dimension_numbers = #tpu.dot_dimension_numbers<[1], [0], [0], [1], [0, 0, 1, 1], [], []>} : vector<64x16xbf16>, vector<16x4xbf16>, vector<64x4xf32> -> vector<64x4xf32>
    %124 = vector.broadcast %121 : vector<1x4xf32> to vector<64x4xf32>
    %125 = arith.addf %123, %124 : vector<64x4xf32>
    %cst_121 = arith.constant 0.000000e+00 : f32
    %126 = vector.broadcast %cst_121 : f32 to vector<64x4xf32>
    %127 = arith.maximumf %125, %126 : vector<64x4xf32>
    %c1_122 = arith.constant 1 : index
    %c0_123 = arith.constant 0 : index
    %c0_124 = arith.constant 0 : index
    %128 = vector.load %arg6[%c1_122, %c0_123, %c0_124] : memref<4x36x4xbf16, #tpu.memory_space<vmem>>, vector<1x36x4xbf16>
    %129 = vector.shape_cast %128 : vector<1x36x4xbf16> to vector<36x4xbf16>
    %c1_125 = arith.constant 1 : index
    %c0_126 = arith.constant 0 : index
    %c0_127 = arith.constant 0 : index
    %130 = vector.load %arg7[%c1_125, %c0_126, %c0_127] : memref<4x1x4xf32, #tpu.memory_space<vmem>>, vector<1x1x4xf32>
    %131 = vector.shape_cast %130 : vector<1x1x4xf32> to vector<1x4xf32>
    %132 = arith.truncf %127 : vector<64x4xf32> to vector<64x4xbf16>
    %133 = vector.shape_cast %127 : vector<64x4xf32> to vector<8x8x4xf32>
    %c1_128 = arith.constant 1 : index
    %c1_129 = arith.constant 1 : index
    %c0_130 = arith.constant 0 : index
    %134 = vector.load %arg11[%c1_128, %c1_129, %c0_130] : memref<10x10x16xf32, #tpu.memory_space<vmem>>, vector<8x8x4xf32>
    tpu.vector_store %arg11[%c1_128, %c1_129, %c0_130], %133 {strides = array<i32>} : memref<10x10x16xf32, #tpu.memory_space<vmem>>, vector<8x8x4xf32>,
    %c0_131 = arith.constant 0 : index
    %c0_132 = arith.constant 0 : index
    %c0_133 = arith.constant 0 : index
    %135 = vector.load %arg11[%c0_131, %c0_132, %c0_133] : memref<10x10x16xf32, #tpu.memory_space<vmem>>, vector<8x8x4xf32>
    %136 = vector.shape_cast %135 : vector<8x8x4xf32> to vector<64x4xf32>
    %137 = arith.truncf %136 : vector<64x4xf32> to vector<64x4xbf16>
    %c0_134 = arith.constant 0 : index
    %c0_135 = arith.constant 0 : index
    %138 = vector.load %arg12[%c0_134, %c0_135] : memref<64x144xbf16, #tpu.memory_space<vmem>>, vector<64x4xbf16>
    tpu.vector_store %arg12[%c0_134, %c0_135], %137 {strides = array<i32>} : memref<64x144xbf16, #tpu.memory_space<vmem>>, vector<64x4xbf16>,
    %c0_136 = arith.constant 0 : index
    %c1_137 = arith.constant 1 : index
    %c0_138 = arith.constant 0 : index
    %139 = vector.load %arg11[%c0_136, %c1_137, %c0_138] : memref<10x10x16xf32, #tpu.memory_space<vmem>>, vector<8x8x4xf32>
    %140 = vector.shape_cast %139 : vector<8x8x4xf32> to vector<64x4xf32>
    %141 = arith.truncf %140 : vector<64x4xf32> to vector<64x4xbf16>
    %c0_139 = arith.constant 0 : index
    %c4_140 = arith.constant 4 : index
    %142 = vector.load %arg12[%c0_139, %c4_140] : memref<64x144xbf16, #tpu.memory_space<vmem>>, vector<64x4xbf16>
    tpu.vector_store %arg12[%c0_139, %c4_140], %141 {strides = array<i32>} : memref<64x144xbf16, #tpu.memory_space<vmem>>, vector<64x4xbf16>,
    %c0_141 = arith.constant 0 : index
    %c2_142 = arith.constant 2 : index
    %c0_143 = arith.constant 0 : index
    %143 = vector.load %arg11[%c0_141, %c2_142, %c0_143] : memref<10x10x16xf32, #tpu.memory_space<vmem>>, vector<8x8x4xf32>
    %144 = vector.shape_cast %143 : vector<8x8x4xf32> to vector<64x4xf32>
    %145 = arith.truncf %144 : vector<64x4xf32> to vector<64x4xbf16>
    %c0_144 = arith.constant 0 : index
    %c8_145 = arith.constant 8 : index
    %146 = vector.load %arg12[%c0_144, %c8_145] : memref<64x144xbf16, #tpu.memory_space<vmem>>, vector<64x4xbf16>
    tpu.vector_store %arg12[%c0_144, %c8_145], %145 {strides = array<i32>} : memref<64x144xbf16, #tpu.memory_space<vmem>>, vector<64x4xbf16>,
    %c1_146 = arith.constant 1 : index
    %c0_147 = arith.constant 0 : index
    %c0_148 = arith.constant 0 : index
    %147 = vector.load %arg11[%c1_146, %c0_147, %c0_148] : memref<10x10x16xf32, #tpu.memory_space<vmem>>, vector<8x8x4xf32>
    %148 = vector.shape_cast %147 : vector<8x8x4xf32> to vector<64x4xf32>
    %149 = arith.truncf %148 : vector<64x4xf32> to vector<64x4xbf16>
    %c0_149 = arith.constant 0 : index
    %c12_150 = arith.constant 12 : index
    %150 = vector.load %arg12[%c0_149, %c12_150] : memref<64x144xbf16, #tpu.memory_space<vmem>>, vector<64x4xbf16>
    tpu.vector_store %arg12[%c0_149, %c12_150], %149 {strides = array<i32>} : memref<64x144xbf16, #tpu.memory_space<vmem>>, vector<64x4xbf16>,
    %c0_151 = arith.constant 0 : index
    %c16_152 = arith.constant 16 : index
    %151 = vector.load %arg12[%c0_151, %c16_152] : memref<64x144xbf16, #tpu.memory_space<vmem>>, vector<64x4xbf16>
    tpu.vector_store %arg12[%c0_151, %c16_152], %132 {strides = array<i32>} : memref<64x144xbf16, #tpu.memory_space<vmem>>, vector<64x4xbf16>,
    %c1_153 = arith.constant 1 : index
    %c2_154 = arith.constant 2 : index
    %c0_155 = arith.constant 0 : index
    %152 = vector.load %arg11[%c1_153, %c2_154, %c0_155] : memref<10x10x16xf32, #tpu.memory_space<vmem>>, vector<8x8x4xf32>
    %153 = vector.shape_cast %152 : vector<8x8x4xf32> to vector<64x4xf32>
    %154 = arith.truncf %153 : vector<64x4xf32> to vector<64x4xbf16>
    %c0_156 = arith.constant 0 : index
    %c20_157 = arith.constant 20 : index
    %155 = vector.load %arg12[%c0_156, %c20_157] : memref<64x144xbf16, #tpu.memory_space<vmem>>, vector<64x4xbf16>
    tpu.vector_store %arg12[%c0_156, %c20_157], %154 {strides = array<i32>} : memref<64x144xbf16, #tpu.memory_space<vmem>>, vector<64x4xbf16>,
    %c2_158 = arith.constant 2 : index
    %c0_159 = arith.constant 0 : index
    %c0_160 = arith.constant 0 : index
    %156 = vector.load %arg11[%c2_158, %c0_159, %c0_160] : memref<10x10x16xf32, #tpu.memory_space<vmem>>, vector<8x8x4xf32>
    %157 = vector.shape_cast %156 : vector<8x8x4xf32> to vector<64x4xf32>
    %158 = arith.truncf %157 : vector<64x4xf32> to vector<64x4xbf16>
    %c0_161 = arith.constant 0 : index
    %c24_162 = arith.constant 24 : index
    %159 = vector.load %arg12[%c0_161, %c24_162] : memref<64x144xbf16, #tpu.memory_space<vmem>>, vector<64x4xbf16>
    tpu.vector_store %arg12[%c0_161, %c24_162], %158 {strides = array<i32>} : memref<64x144xbf16, #tpu.memory_space<vmem>>, vector<64x4xbf16>,
    %c2_163 = arith.constant 2 : index
    %c1_164 = arith.constant 1 : index
    %c0_165 = arith.constant 0 : index
    %160 = vector.load %arg11[%c2_163, %c1_164, %c0_165] : memref<10x10x16xf32, #tpu.memory_space<vmem>>, vector<8x8x4xf32>
    %161 = vector.shape_cast %160 : vector<8x8x4xf32> to vector<64x4xf32>
    %162 = arith.truncf %161 : vector<64x4xf32> to vector<64x4xbf16>
    %c0_166 = arith.constant 0 : index
    %c28_167 = arith.constant 28 : index
    %163 = vector.load %arg12[%c0_166, %c28_167] : memref<64x144xbf16, #tpu.memory_space<vmem>>, vector<64x4xbf16>
    tpu.vector_store %arg12[%c0_166, %c28_167], %162 {strides = array<i32>} : memref<64x144xbf16, #tpu.memory_space<vmem>>, vector<64x4xbf16>,
    %c2_168 = arith.constant 2 : index
    %c2_169 = arith.constant 2 : index
    %c0_170 = arith.constant 0 : index
    %164 = vector.load %arg11[%c2_168, %c2_169, %c0_170] : memref<10x10x16xf32, #tpu.memory_space<vmem>>, vector<8x8x4xf32>
    %165 = vector.shape_cast %164 : vector<8x8x4xf32> to vector<64x4xf32>
    %166 = arith.truncf %165 : vector<64x4xf32> to vector<64x4xbf16>
    %c0_171 = arith.constant 0 : index
    %c32_172 = arith.constant 32 : index
    %167 = vector.load %arg12[%c0_171, %c32_172] : memref<64x144xbf16, #tpu.memory_space<vmem>>, vector<64x4xbf16>
    tpu.vector_store %arg12[%c0_171, %c32_172], %166 {strides = array<i32>} : memref<64x144xbf16, #tpu.memory_space<vmem>>, vector<64x4xbf16>,
    %c0_173 = arith.constant 0 : index
    %c0_174 = arith.constant 0 : index
    %168 = vector.load %arg12[%c0_173, %c0_174] : memref<64x144xbf16, #tpu.memory_space<vmem>>, vector<64x36xbf16>
    %cst_175 = arith.constant dense<0.000000e+00> : vector<64x4xf32>
    %169 = tpu.matmul %168, %129, %cst_175 {dimension_numbers = #tpu.dot_dimension_numbers<[1], [0], [0], [1], [0, 0, 1, 1], [], []>} : vector<64x36xbf16>, vector<36x4xbf16>, vector<64x4xf32> -> vector<64x4xf32>
    %170 = vector.broadcast %131 : vector<1x4xf32> to vector<64x4xf32>
    %171 = arith.addf %169, %170 : vector<64x4xf32>
    %cst_176 = arith.constant 0.000000e+00 : f32
    %172 = vector.broadcast %cst_176 : f32 to vector<64x4xf32>
    %173 = arith.maximumf %171, %172 : vector<64x4xf32>
    %c1_177 = arith.constant 1 : index
    %c0_178 = arith.constant 0 : index
    %c0_179 = arith.constant 0 : index
    %174 = vector.load %arg8[%c1_177, %c0_178, %c0_179] : memref<4x4x16xbf16, #tpu.memory_space<vmem>>, vector<1x4x16xbf16>
    %175 = vector.shape_cast %174 : vector<1x4x16xbf16> to vector<4x16xbf16>
    %c1_180 = arith.constant 1 : index
    %c0_181 = arith.constant 0 : index
    %c0_182 = arith.constant 0 : index
    %176 = vector.load %arg9[%c1_180, %c0_181, %c0_182] : memref<4x1x16xf32, #tpu.memory_space<vmem>>, vector<1x1x16xf32>
    %177 = vector.shape_cast %176 : vector<1x1x16xf32> to vector<1x16xf32>
    %178 = arith.truncf %173 : vector<64x4xf32> to vector<64x4xbf16>
    %cst_183 = arith.constant dense<0.000000e+00> : vector<64x16xf32>
    %179 = tpu.matmul %178, %175, %cst_183 {dimension_numbers = #tpu.dot_dimension_numbers<[1], [0], [0], [1], [0, 0, 1, 1], [], []>} : vector<64x4xbf16>, vector<4x16xbf16>, vector<64x16xf32> -> vector<64x16xf32>
    %180 = vector.broadcast %177 : vector<1x16xf32> to vector<64x16xf32>
    %181 = arith.addf %179, %180 : vector<64x16xf32>
    %cst_184 = arith.constant 4.843750e-01 : f32
    %182 = vector.broadcast %cst_184 : f32 to vector<64x16xf32>
    %183 = arith.mulf %182, %117 : vector<64x16xf32>
    %184 = arith.addf %181, %183 : vector<64x16xf32>
    %cst_185 = arith.constant 0.000000e+00 : f32
    %185 = vector.broadcast %cst_185 : f32 to vector<64x16xf32>
    %186 = arith.maximumf %184, %185 : vector<64x16xf32>
    %c2_186 = arith.constant 2 : index
    %c0_187 = arith.constant 0 : index
    %c0_188 = arith.constant 0 : index
    %187 = vector.load %arg4[%c2_186, %c0_187, %c0_188] : memref<4x16x4xbf16, #tpu.memory_space<vmem>>, vector<1x16x4xbf16>
    %188 = vector.shape_cast %187 : vector<1x16x4xbf16> to vector<16x4xbf16>
    %c2_189 = arith.constant 2 : index
    %c0_190 = arith.constant 0 : index
    %c0_191 = arith.constant 0 : index
    %189 = vector.load %arg5[%c2_189, %c0_190, %c0_191] : memref<4x1x4xf32, #tpu.memory_space<vmem>>, vector<1x1x4xf32>
    %190 = vector.shape_cast %189 : vector<1x1x4xf32> to vector<1x4xf32>
    %191 = arith.truncf %186 : vector<64x16xf32> to vector<64x16xbf16>
    %cst_192 = arith.constant dense<0.000000e+00> : vector<64x4xf32>
    %192 = tpu.matmul %191, %188, %cst_192 {dimension_numbers = #tpu.dot_dimension_numbers<[1], [0], [0], [1], [0, 0, 1, 1], [], []>} : vector<64x16xbf16>, vector<16x4xbf16>, vector<64x4xf32> -> vector<64x4xf32>
    %193 = vector.broadcast %190 : vector<1x4xf32> to vector<64x4xf32>
    %194 = arith.addf %192, %193 : vector<64x4xf32>
    %cst_193 = arith.constant 0.000000e+00 : f32
    %195 = vector.broadcast %cst_193 : f32 to vector<64x4xf32>
    %196 = arith.maximumf %194, %195 : vector<64x4xf32>
    %c2_194 = arith.constant 2 : index
    %c0_195 = arith.constant 0 : index
    %c0_196 = arith.constant 0 : index
    %197 = vector.load %arg6[%c2_194, %c0_195, %c0_196] : memref<4x36x4xbf16, #tpu.memory_space<vmem>>, vector<1x36x4xbf16>
    %198 = vector.shape_cast %197 : vector<1x36x4xbf16> to vector<36x4xbf16>
    %c2_197 = arith.constant 2 : index
    %c0_198 = arith.constant 0 : index
    %c0_199 = arith.constant 0 : index
    %199 = vector.load %arg7[%c2_197, %c0_198, %c0_199] : memref<4x1x4xf32, #tpu.memory_space<vmem>>, vector<1x1x4xf32>
    %200 = vector.shape_cast %199 : vector<1x1x4xf32> to vector<1x4xf32>
    %201 = arith.truncf %196 : vector<64x4xf32> to vector<64x4xbf16>
    %202 = vector.shape_cast %196 : vector<64x4xf32> to vector<8x8x4xf32>
    %c1_200 = arith.constant 1 : index
    %c1_201 = arith.constant 1 : index
    %c0_202 = arith.constant 0 : index
    %203 = vector.load %arg11[%c1_200, %c1_201, %c0_202] : memref<10x10x16xf32, #tpu.memory_space<vmem>>, vector<8x8x4xf32>
    tpu.vector_store %arg11[%c1_200, %c1_201, %c0_202], %202 {strides = array<i32>} : memref<10x10x16xf32, #tpu.memory_space<vmem>>, vector<8x8x4xf32>,
    %c0_203 = arith.constant 0 : index
    %c0_204 = arith.constant 0 : index
    %c0_205 = arith.constant 0 : index
    %204 = vector.load %arg11[%c0_203, %c0_204, %c0_205] : memref<10x10x16xf32, #tpu.memory_space<vmem>>, vector<8x8x4xf32>
    %205 = vector.shape_cast %204 : vector<8x8x4xf32> to vector<64x4xf32>
    %206 = arith.truncf %205 : vector<64x4xf32> to vector<64x4xbf16>
    %c0_206 = arith.constant 0 : index
    %c0_207 = arith.constant 0 : index
    %207 = vector.load %arg12[%c0_206, %c0_207] : memref<64x144xbf16, #tpu.memory_space<vmem>>, vector<64x4xbf16>
    tpu.vector_store %arg12[%c0_206, %c0_207], %206 {strides = array<i32>} : memref<64x144xbf16, #tpu.memory_space<vmem>>, vector<64x4xbf16>,
    %c0_208 = arith.constant 0 : index
    %c1_209 = arith.constant 1 : index
    %c0_210 = arith.constant 0 : index
    %208 = vector.load %arg11[%c0_208, %c1_209, %c0_210] : memref<10x10x16xf32, #tpu.memory_space<vmem>>, vector<8x8x4xf32>
    %209 = vector.shape_cast %208 : vector<8x8x4xf32> to vector<64x4xf32>
    %210 = arith.truncf %209 : vector<64x4xf32> to vector<64x4xbf16>
    %c0_211 = arith.constant 0 : index
    %c4_212 = arith.constant 4 : index
    %211 = vector.load %arg12[%c0_211, %c4_212] : memref<64x144xbf16, #tpu.memory_space<vmem>>, vector<64x4xbf16>
    tpu.vector_store %arg12[%c0_211, %c4_212], %210 {strides = array<i32>} : memref<64x144xbf16, #tpu.memory_space<vmem>>, vector<64x4xbf16>,
    %c0_213 = arith.constant 0 : index
    %c2_214 = arith.constant 2 : index
    %c0_215 = arith.constant 0 : index
    %212 = vector.load %arg11[%c0_213, %c2_214, %c0_215] : memref<10x10x16xf32, #tpu.memory_space<vmem>>, vector<8x8x4xf32>
    %213 = vector.shape_cast %212 : vector<8x8x4xf32> to vector<64x4xf32>
    %214 = arith.truncf %213 : vector<64x4xf32> to vector<64x4xbf16>
    %c0_216 = arith.constant 0 : index
    %c8_217 = arith.constant 8 : index
    %215 = vector.load %arg12[%c0_216, %c8_217] : memref<64x144xbf16, #tpu.memory_space<vmem>>, vector<64x4xbf16>
    tpu.vector_store %arg12[%c0_216, %c8_217], %214 {strides = array<i32>} : memref<64x144xbf16, #tpu.memory_space<vmem>>, vector<64x4xbf16>,
    %c1_218 = arith.constant 1 : index
    %c0_219 = arith.constant 0 : index
    %c0_220 = arith.constant 0 : index
    %216 = vector.load %arg11[%c1_218, %c0_219, %c0_220] : memref<10x10x16xf32, #tpu.memory_space<vmem>>, vector<8x8x4xf32>
    %217 = vector.shape_cast %216 : vector<8x8x4xf32> to vector<64x4xf32>
    %218 = arith.truncf %217 : vector<64x4xf32> to vector<64x4xbf16>
    %c0_221 = arith.constant 0 : index
    %c12_222 = arith.constant 12 : index
    %219 = vector.load %arg12[%c0_221, %c12_222] : memref<64x144xbf16, #tpu.memory_space<vmem>>, vector<64x4xbf16>
    tpu.vector_store %arg12[%c0_221, %c12_222], %218 {strides = array<i32>} : memref<64x144xbf16, #tpu.memory_space<vmem>>, vector<64x4xbf16>,
    %c0_223 = arith.constant 0 : index
    %c16_224 = arith.constant 16 : index
    %220 = vector.load %arg12[%c0_223, %c16_224] : memref<64x144xbf16, #tpu.memory_space<vmem>>, vector<64x4xbf16>
    tpu.vector_store %arg12[%c0_223, %c16_224], %201 {strides = array<i32>} : memref<64x144xbf16, #tpu.memory_space<vmem>>, vector<64x4xbf16>,
    %c1_225 = arith.constant 1 : index
    %c2_226 = arith.constant 2 : index
    %c0_227 = arith.constant 0 : index
    %221 = vector.load %arg11[%c1_225, %c2_226, %c0_227] : memref<10x10x16xf32, #tpu.memory_space<vmem>>, vector<8x8x4xf32>
    %222 = vector.shape_cast %221 : vector<8x8x4xf32> to vector<64x4xf32>
    %223 = arith.truncf %222 : vector<64x4xf32> to vector<64x4xbf16>
    %c0_228 = arith.constant 0 : index
    %c20_229 = arith.constant 20 : index
    %224 = vector.load %arg12[%c0_228, %c20_229] : memref<64x144xbf16, #tpu.memory_space<vmem>>, vector<64x4xbf16>
    tpu.vector_store %arg12[%c0_228, %c20_229], %223 {strides = array<i32>} : memref<64x144xbf16, #tpu.memory_space<vmem>>, vector<64x4xbf16>,
    %c2_230 = arith.constant 2 : index
    %c0_231 = arith.constant 0 : index
    %c0_232 = arith.constant 0 : index
    %225 = vector.load %arg11[%c2_230, %c0_231, %c0_232] : memref<10x10x16xf32, #tpu.memory_space<vmem>>, vector<8x8x4xf32>
    %226 = vector.shape_cast %225 : vector<8x8x4xf32> to vector<64x4xf32>
    %227 = arith.truncf %226 : vector<64x4xf32> to vector<64x4xbf16>
    %c0_233 = arith.constant 0 : index
    %c24_234 = arith.constant 24 : index
    %228 = vector.load %arg12[%c0_233, %c24_234] : memref<64x144xbf16, #tpu.memory_space<vmem>>, vector<64x4xbf16>
    tpu.vector_store %arg12[%c0_233, %c24_234], %227 {strides = array<i32>} : memref<64x144xbf16, #tpu.memory_space<vmem>>, vector<64x4xbf16>,
    %c2_235 = arith.constant 2 : index
    %c1_236 = arith.constant 1 : index
    %c0_237 = arith.constant 0 : index
    %229 = vector.load %arg11[%c2_235, %c1_236, %c0_237] : memref<10x10x16xf32, #tpu.memory_space<vmem>>, vector<8x8x4xf32>
    %230 = vector.shape_cast %229 : vector<8x8x4xf32> to vector<64x4xf32>
    %231 = arith.truncf %230 : vector<64x4xf32> to vector<64x4xbf16>
    %c0_238 = arith.constant 0 : index
    %c28_239 = arith.constant 28 : index
    %232 = vector.load %arg12[%c0_238, %c28_239] : memref<64x144xbf16, #tpu.memory_space<vmem>>, vector<64x4xbf16>
    tpu.vector_store %arg12[%c0_238, %c28_239], %231 {strides = array<i32>} : memref<64x144xbf16, #tpu.memory_space<vmem>>, vector<64x4xbf16>,
    %c2_240 = arith.constant 2 : index
    %c2_241 = arith.constant 2 : index
    %c0_242 = arith.constant 0 : index
    %233 = vector.load %arg11[%c2_240, %c2_241, %c0_242] : memref<10x10x16xf32, #tpu.memory_space<vmem>>, vector<8x8x4xf32>
    %234 = vector.shape_cast %233 : vector<8x8x4xf32> to vector<64x4xf32>
    %235 = arith.truncf %234 : vector<64x4xf32> to vector<64x4xbf16>
    %c0_243 = arith.constant 0 : index
    %c32_244 = arith.constant 32 : index
    %236 = vector.load %arg12[%c0_243, %c32_244] : memref<64x144xbf16, #tpu.memory_space<vmem>>, vector<64x4xbf16>
    tpu.vector_store %arg12[%c0_243, %c32_244], %235 {strides = array<i32>} : memref<64x144xbf16, #tpu.memory_space<vmem>>, vector<64x4xbf16>,
    %c0_245 = arith.constant 0 : index
    %c0_246 = arith.constant 0 : index
    %237 = vector.load %arg12[%c0_245, %c0_246] : memref<64x144xbf16, #tpu.memory_space<vmem>>, vector<64x36xbf16>
    %cst_247 = arith.constant dense<0.000000e+00> : vector<64x4xf32>
    %238 = tpu.matmul %237, %198, %cst_247 {dimension_numbers = #tpu.dot_dimension_numbers<[1], [0], [0], [1], [0, 0, 1, 1], [], []>} : vector<64x36xbf16>, vector<36x4xbf16>, vector<64x4xf32> -> vector<64x4xf32>
    %239 = vector.broadcast %200 : vector<1x4xf32> to vector<64x4xf32>
    %240 = arith.addf %238, %239 : vector<64x4xf32>
    %cst_248 = arith.constant 0.000000e+00 : f32
    %241 = vector.broadcast %cst_248 : f32 to vector<64x4xf32>
    %242 = arith.maximumf %240, %241 : vector<64x4xf32>
    %c2_249 = arith.constant 2 : index
    %c0_250 = arith.constant 0 : index
    %c0_251 = arith.constant 0 : index
    %243 = vector.load %arg8[%c2_249, %c0_250, %c0_251] : memref<4x4x16xbf16, #tpu.memory_space<vmem>>, vector<1x4x16xbf16>
    %244 = vector.shape_cast %243 : vector<1x4x16xbf16> to vector<4x16xbf16>
    %c2_252 = arith.constant 2 : index
    %c0_253 = arith.constant 0 : index
    %c0_254 = arith.constant 0 : index
    %245 = vector.load %arg9[%c2_252, %c0_253, %c0_254] : memref<4x1x16xf32, #tpu.memory_space<vmem>>, vector<1x1x16xf32>
    %246 = vector.shape_cast %245 : vector<1x1x16xf32> to vector<1x16xf32>
    %247 = arith.truncf %242 : vector<64x4xf32> to vector<64x4xbf16>
    %cst_255 = arith.constant dense<0.000000e+00> : vector<64x16xf32>
    %248 = tpu.matmul %247, %244, %cst_255 {dimension_numbers = #tpu.dot_dimension_numbers<[1], [0], [0], [1], [0, 0, 1, 1], [], []>} : vector<64x4xbf16>, vector<4x16xbf16>, vector<64x16xf32> -> vector<64x16xf32>
    %249 = vector.broadcast %246 : vector<1x16xf32> to vector<64x16xf32>
    %250 = arith.addf %248, %249 : vector<64x16xf32>
    %cst_256 = arith.constant 4.843750e-01 : f32
    %251 = vector.broadcast %cst_256 : f32 to vector<64x16xf32>
    %252 = arith.mulf %251, %186 : vector<64x16xf32>
    %253 = arith.addf %250, %252 : vector<64x16xf32>
    %cst_257 = arith.constant 0.000000e+00 : f32
    %254 = vector.broadcast %cst_257 : f32 to vector<64x16xf32>
    %255 = arith.maximumf %253, %254 : vector<64x16xf32>
    %c3 = arith.constant 3 : index
    %c0_258 = arith.constant 0 : index
    %c0_259 = arith.constant 0 : index
    %256 = vector.load %arg4[%c3, %c0_258, %c0_259] : memref<4x16x4xbf16, #tpu.memory_space<vmem>>, vector<1x16x4xbf16>
    %257 = vector.shape_cast %256 : vector<1x16x4xbf16> to vector<16x4xbf16>
    %c3_260 = arith.constant 3 : index
    %c0_261 = arith.constant 0 : index
    %c0_262 = arith.constant 0 : index
    %258 = vector.load %arg5[%c3_260, %c0_261, %c0_262] : memref<4x1x4xf32, #tpu.memory_space<vmem>>, vector<1x1x4xf32>
    %259 = vector.shape_cast %258 : vector<1x1x4xf32> to vector<1x4xf32>
    %260 = arith.truncf %255 : vector<64x16xf32> to vector<64x16xbf16>
    %cst_263 = arith.constant dense<0.000000e+00> : vector<64x4xf32>
    %261 = tpu.matmul %260, %257, %cst_263 {dimension_numbers = #tpu.dot_dimension_numbers<[1], [0], [0], [1], [0, 0, 1, 1], [], []>} : vector<64x16xbf16>, vector<16x4xbf16>, vector<64x4xf32> -> vector<64x4xf32>
    %262 = vector.broadcast %259 : vector<1x4xf32> to vector<64x4xf32>
    %263 = arith.addf %261, %262 : vector<64x4xf32>
    %cst_264 = arith.constant 0.000000e+00 : f32
    %264 = vector.broadcast %cst_264 : f32 to vector<64x4xf32>
    %265 = arith.maximumf %263, %264 : vector<64x4xf32>
    %c3_265 = arith.constant 3 : index
    %c0_266 = arith.constant 0 : index
    %c0_267 = arith.constant 0 : index
    %266 = vector.load %arg6[%c3_265, %c0_266, %c0_267] : memref<4x36x4xbf16, #tpu.memory_space<vmem>>, vector<1x36x4xbf16>
    %267 = vector.shape_cast %266 : vector<1x36x4xbf16> to vector<36x4xbf16>
    %c3_268 = arith.constant 3 : index
    %c0_269 = arith.constant 0 : index
    %c0_270 = arith.constant 0 : index
    %268 = vector.load %arg7[%c3_268, %c0_269, %c0_270] : memref<4x1x4xf32, #tpu.memory_space<vmem>>, vector<1x1x4xf32>
    %269 = vector.shape_cast %268 : vector<1x1x4xf32> to vector<1x4xf32>
    %270 = arith.truncf %265 : vector<64x4xf32> to vector<64x4xbf16>
    %271 = vector.shape_cast %265 : vector<64x4xf32> to vector<8x8x4xf32>
    %c1_271 = arith.constant 1 : index
    %c1_272 = arith.constant 1 : index
    %c0_273 = arith.constant 0 : index
    %272 = vector.load %arg11[%c1_271, %c1_272, %c0_273] : memref<10x10x16xf32, #tpu.memory_space<vmem>>, vector<8x8x4xf32>
    tpu.vector_store %arg11[%c1_271, %c1_272, %c0_273], %271 {strides = array<i32>} : memref<10x10x16xf32, #tpu.memory_space<vmem>>, vector<8x8x4xf32>,
    %c0_274 = arith.constant 0 : index
    %c0_275 = arith.constant 0 : index
    %c0_276 = arith.constant 0 : index
    %273 = vector.load %arg11[%c0_274, %c0_275, %c0_276] : memref<10x10x16xf32, #tpu.memory_space<vmem>>, vector<8x8x4xf32>
    %274 = vector.shape_cast %273 : vector<8x8x4xf32> to vector<64x4xf32>
    %275 = arith.truncf %274 : vector<64x4xf32> to vector<64x4xbf16>
    %c0_277 = arith.constant 0 : index
    %c0_278 = arith.constant 0 : index
    %276 = vector.load %arg12[%c0_277, %c0_278] : memref<64x144xbf16, #tpu.memory_space<vmem>>, vector<64x4xbf16>
    tpu.vector_store %arg12[%c0_277, %c0_278], %275 {strides = array<i32>} : memref<64x144xbf16, #tpu.memory_space<vmem>>, vector<64x4xbf16>,
    %c0_279 = arith.constant 0 : index
    %c1_280 = arith.constant 1 : index
    %c0_281 = arith.constant 0 : index
    %277 = vector.load %arg11[%c0_279, %c1_280, %c0_281] : memref<10x10x16xf32, #tpu.memory_space<vmem>>, vector<8x8x4xf32>
    %278 = vector.shape_cast %277 : vector<8x8x4xf32> to vector<64x4xf32>
    %279 = arith.truncf %278 : vector<64x4xf32> to vector<64x4xbf16>
    %c0_282 = arith.constant 0 : index
    %c4_283 = arith.constant 4 : index
    %280 = vector.load %arg12[%c0_282, %c4_283] : memref<64x144xbf16, #tpu.memory_space<vmem>>, vector<64x4xbf16>
    tpu.vector_store %arg12[%c0_282, %c4_283], %279 {strides = array<i32>} : memref<64x144xbf16, #tpu.memory_space<vmem>>, vector<64x4xbf16>,
    %c0_284 = arith.constant 0 : index
    %c2_285 = arith.constant 2 : index
    %c0_286 = arith.constant 0 : index
    %281 = vector.load %arg11[%c0_284, %c2_285, %c0_286] : memref<10x10x16xf32, #tpu.memory_space<vmem>>, vector<8x8x4xf32>
    %282 = vector.shape_cast %281 : vector<8x8x4xf32> to vector<64x4xf32>
    %283 = arith.truncf %282 : vector<64x4xf32> to vector<64x4xbf16>
    %c0_287 = arith.constant 0 : index
    %c8_288 = arith.constant 8 : index
    %284 = vector.load %arg12[%c0_287, %c8_288] : memref<64x144xbf16, #tpu.memory_space<vmem>>, vector<64x4xbf16>
    tpu.vector_store %arg12[%c0_287, %c8_288], %283 {strides = array<i32>} : memref<64x144xbf16, #tpu.memory_space<vmem>>, vector<64x4xbf16>,
    %c1_289 = arith.constant 1 : index
    %c0_290 = arith.constant 0 : index
    %c0_291 = arith.constant 0 : index
    %285 = vector.load %arg11[%c1_289, %c0_290, %c0_291] : memref<10x10x16xf32, #tpu.memory_space<vmem>>, vector<8x8x4xf32>
    %286 = vector.shape_cast %285 : vector<8x8x4xf32> to vector<64x4xf32>
    %287 = arith.truncf %286 : vector<64x4xf32> to vector<64x4xbf16>
    %c0_292 = arith.constant 0 : index
    %c12_293 = arith.constant 12 : index
    %288 = vector.load %arg12[%c0_292, %c12_293] : memref<64x144xbf16, #tpu.memory_space<vmem>>, vector<64x4xbf16>
    tpu.vector_store %arg12[%c0_292, %c12_293], %287 {strides = array<i32>} : memref<64x144xbf16, #tpu.memory_space<vmem>>, vector<64x4xbf16>,
    %c0_294 = arith.constant 0 : index
    %c16_295 = arith.constant 16 : index
    %289 = vector.load %arg12[%c0_294, %c16_295] : memref<64x144xbf16, #tpu.memory_space<vmem>>, vector<64x4xbf16>
    tpu.vector_store %arg12[%c0_294, %c16_295], %270 {strides = array<i32>} : memref<64x144xbf16, #tpu.memory_space<vmem>>, vector<64x4xbf16>,
    %c1_296 = arith.constant 1 : index
    %c2_297 = arith.constant 2 : index
    %c0_298 = arith.constant 0 : index
    %290 = vector.load %arg11[%c1_296, %c2_297, %c0_298] : memref<10x10x16xf32, #tpu.memory_space<vmem>>, vector<8x8x4xf32>
    %291 = vector.shape_cast %290 : vector<8x8x4xf32> to vector<64x4xf32>
    %292 = arith.truncf %291 : vector<64x4xf32> to vector<64x4xbf16>
    %c0_299 = arith.constant 0 : index
    %c20_300 = arith.constant 20 : index
    %293 = vector.load %arg12[%c0_299, %c20_300] : memref<64x144xbf16, #tpu.memory_space<vmem>>, vector<64x4xbf16>
    tpu.vector_store %arg12[%c0_299, %c20_300], %292 {strides = array<i32>} : memref<64x144xbf16, #tpu.memory_space<vmem>>, vector<64x4xbf16>,
    %c2_301 = arith.constant 2 : index
    %c0_302 = arith.constant 0 : index
    %c0_303 = arith.constant 0 : index
    %294 = vector.load %arg11[%c2_301, %c0_302, %c0_303] : memref<10x10x16xf32, #tpu.memory_space<vmem>>, vector<8x8x4xf32>
    %295 = vector.shape_cast %294 : vector<8x8x4xf32> to vector<64x4xf32>
    %296 = arith.truncf %295 : vector<64x4xf32> to vector<64x4xbf16>
    %c0_304 = arith.constant 0 : index
    %c24_305 = arith.constant 24 : index
    %297 = vector.load %arg12[%c0_304, %c24_305] : memref<64x144xbf16, #tpu.memory_space<vmem>>, vector<64x4xbf16>
    tpu.vector_store %arg12[%c0_304, %c24_305], %296 {strides = array<i32>} : memref<64x144xbf16, #tpu.memory_space<vmem>>, vector<64x4xbf16>,
    %c2_306 = arith.constant 2 : index
    %c1_307 = arith.constant 1 : index
    %c0_308 = arith.constant 0 : index
    %298 = vector.load %arg11[%c2_306, %c1_307, %c0_308] : memref<10x10x16xf32, #tpu.memory_space<vmem>>, vector<8x8x4xf32>
    %299 = vector.shape_cast %298 : vector<8x8x4xf32> to vector<64x4xf32>
    %300 = arith.truncf %299 : vector<64x4xf32> to vector<64x4xbf16>
    %c0_309 = arith.constant 0 : index
    %c28_310 = arith.constant 28 : index
    %301 = vector.load %arg12[%c0_309, %c28_310] : memref<64x144xbf16, #tpu.memory_space<vmem>>, vector<64x4xbf16>
    tpu.vector_store %arg12[%c0_309, %c28_310], %300 {strides = array<i32>} : memref<64x144xbf16, #tpu.memory_space<vmem>>, vector<64x4xbf16>,
    %c2_311 = arith.constant 2 : index
    %c2_312 = arith.constant 2 : index
    %c0_313 = arith.constant 0 : index
    %302 = vector.load %arg11[%c2_311, %c2_312, %c0_313] : memref<10x10x16xf32, #tpu.memory_space<vmem>>, vector<8x8x4xf32>
    %303 = vector.shape_cast %302 : vector<8x8x4xf32> to vector<64x4xf32>
    %304 = arith.truncf %303 : vector<64x4xf32> to vector<64x4xbf16>
    %c0_314 = arith.constant 0 : index
    %c32_315 = arith.constant 32 : index
    %305 = vector.load %arg12[%c0_314, %c32_315] : memref<64x144xbf16, #tpu.memory_space<vmem>>, vector<64x4xbf16>
    tpu.vector_store %arg12[%c0_314, %c32_315], %304 {strides = array<i32>} : memref<64x144xbf16, #tpu.memory_space<vmem>>, vector<64x4xbf16>,
    %c0_316 = arith.constant 0 : index
    %c0_317 = arith.constant 0 : index
    %306 = vector.load %arg12[%c0_316, %c0_317] : memref<64x144xbf16, #tpu.memory_space<vmem>>, vector<64x36xbf16>
    %cst_318 = arith.constant dense<0.000000e+00> : vector<64x4xf32>
    %307 = tpu.matmul %306, %267, %cst_318 {dimension_numbers = #tpu.dot_dimension_numbers<[1], [0], [0], [1], [0, 0, 1, 1], [], []>} : vector<64x36xbf16>, vector<36x4xbf16>, vector<64x4xf32> -> vector<64x4xf32>
    %308 = vector.broadcast %269 : vector<1x4xf32> to vector<64x4xf32>
    %309 = arith.addf %307, %308 : vector<64x4xf32>
    %cst_319 = arith.constant 0.000000e+00 : f32
    %310 = vector.broadcast %cst_319 : f32 to vector<64x4xf32>
    %311 = arith.maximumf %309, %310 : vector<64x4xf32>
    %c3_320 = arith.constant 3 : index
    %c0_321 = arith.constant 0 : index
    %c0_322 = arith.constant 0 : index
    %312 = vector.load %arg8[%c3_320, %c0_321, %c0_322] : memref<4x4x16xbf16, #tpu.memory_space<vmem>>, vector<1x4x16xbf16>
    %313 = vector.shape_cast %312 : vector<1x4x16xbf16> to vector<4x16xbf16>
    %c3_323 = arith.constant 3 : index
    %c0_324 = arith.constant 0 : index
    %c0_325 = arith.constant 0 : index
    %314 = vector.load %arg9[%c3_323, %c0_324, %c0_325] : memref<4x1x16xf32, #tpu.memory_space<vmem>>, vector<1x1x16xf32>
    %315 = vector.shape_cast %314 : vector<1x1x16xf32> to vector<1x16xf32>
    %316 = arith.truncf %311 : vector<64x4xf32> to vector<64x4xbf16>
    %cst_326 = arith.constant dense<0.000000e+00> : vector<64x16xf32>
    %317 = tpu.matmul %316, %313, %cst_326 {dimension_numbers = #tpu.dot_dimension_numbers<[1], [0], [0], [1], [0, 0, 1, 1], [], []>} : vector<64x4xbf16>, vector<4x16xbf16>, vector<64x16xf32> -> vector<64x16xf32>
    %318 = vector.broadcast %315 : vector<1x16xf32> to vector<64x16xf32>
    %319 = arith.addf %317, %318 : vector<64x16xf32>
    %cst_327 = arith.constant 4.843750e-01 : f32
    %320 = vector.broadcast %cst_327 : f32 to vector<64x16xf32>
    %321 = arith.mulf %320, %255 : vector<64x16xf32>
    %322 = arith.addf %319, %321 : vector<64x16xf32>
    %cst_328 = arith.constant 0.000000e+00 : f32
    %323 = vector.broadcast %cst_328 : f32 to vector<64x16xf32>
    %324 = arith.maximumf %322, %323 : vector<64x16xf32>
    %325 = tpu.transpose %324, [1, 0] : vector<64x16xf32> -> vector<16x64xf32>
    %c0_329 = arith.constant 0 : index
    %c0_330 = arith.constant 0 : index
    %c0_331 = arith.constant 0 : index
    %326 = vector.load %arg10[%c0_329, %c0_330, %c0_331] : memref<1x16x64xf32, #tpu.memory_space<vmem>>, vector<1x16x64xf32>
    %327 = vector.shape_cast %326 : vector<1x16x64xf32> to vector<16x64xf32>
    %328 = vector.shape_cast %325 : vector<16x64xf32> to vector<1x16x64xf32>
    tpu.vector_store %arg10[%c0_329, %c0_330, %c0_331], %328 {strides = array<i32>} : memref<1x16x64xf32, #tpu.memory_space<vmem>>, vector<1x16x64xf32>,
    return
  }
  func.func @transform_0(%arg0: i32) -> (i32, i32, i32) {
    %c0_i32 = arith.constant 0 : i32
    %c0_i32_0 = arith.constant 0 : i32
    %c0_i32_1 = arith.constant 0 : i32
    return %arg0, %c0_i32, %c0_i32_0 : i32, i32, i32
  }
  func.func @transform_1(%arg0: i32) -> (i32, i32) {
    %c0_i32 = arith.constant 0 : i32
    %c0_i32_0 = arith.constant 0 : i32
    %c0_i32_1 = arith.constant 0 : i32
    return %c0_i32, %c0_i32_0 : i32, i32
  }
  func.func @transform_2(%arg0: i32) -> (i32, i32) {
    %c0_i32 = arith.constant 0 : i32
    %c0_i32_0 = arith.constant 0 : i32
    %c0_i32_1 = arith.constant 0 : i32
    return %c0_i32, %c0_i32_0 : i32, i32
  }
  func.func @transform_3(%arg0: i32) -> (i32, i32, i32) {
    %c0_i32 = arith.constant 0 : i32
    %c0_i32_0 = arith.constant 0 : i32
    %c0_i32_1 = arith.constant 0 : i32
    %c0_i32_2 = arith.constant 0 : i32
    return %c0_i32, %c0_i32_0, %c0_i32_1 : i32, i32, i32
  }
  func.func @transform_4(%arg0: i32) -> (i32, i32, i32) {
    %c0_i32 = arith.constant 0 : i32
    %c0_i32_0 = arith.constant 0 : i32
    %c0_i32_1 = arith.constant 0 : i32
    %c0_i32_2 = arith.constant 0 : i32
    return %c0_i32, %c0_i32_0, %c0_i32_1 : i32, i32, i32
  }
  func.func @transform_5(%arg0: i32) -> (i32, i32, i32) {
    %c0_i32 = arith.constant 0 : i32
    %c0_i32_0 = arith.constant 0 : i32
    %c0_i32_1 = arith.constant 0 : i32
    %c0_i32_2 = arith.constant 0 : i32
    return %c0_i32, %c0_i32_0, %c0_i32_1 : i32, i32, i32
  }
  func.func @transform_6(%arg0: i32) -> (i32, i32, i32) {
    %c0_i32 = arith.constant 0 : i32
    %c0_i32_0 = arith.constant 0 : i32
    %c0_i32_1 = arith.constant 0 : i32
    %c0_i32_2 = arith.constant 0 : i32
    return %c0_i32, %c0_i32_0, %c0_i32_1 : i32, i32, i32
  }
  func.func @transform_7(%arg0: i32) -> (i32, i32, i32) {
    %c0_i32 = arith.constant 0 : i32
    %c0_i32_0 = arith.constant 0 : i32
    %c0_i32_1 = arith.constant 0 : i32
    %c0_i32_2 = arith.constant 0 : i32
    return %c0_i32, %c0_i32_0, %c0_i32_1 : i32, i32, i32
  }
  func.func @transform_8(%arg0: i32) -> (i32, i32, i32) {
    %c0_i32 = arith.constant 0 : i32
    %c0_i32_0 = arith.constant 0 : i32
    %c0_i32_1 = arith.constant 0 : i32
    %c0_i32_2 = arith.constant 0 : i32
    return %c0_i32, %c0_i32_0, %c0_i32_1 : i32, i32, i32
  }
  func.func @transform_9(%arg0: i32) -> (i32, i32, i32) {
    %c0_i32 = arith.constant 0 : i32
    %c0_i32_0 = arith.constant 0 : i32
    %c0_i32_1 = arith.constant 0 : i32
    return %arg0, %c0_i32, %c0_i32_0 : i32, i32, i32
  }
}

</mosaic_0001>

<bundles_post_ra>
// kernel: dfdt_forward.1
= control target key start
LH: loop header
LB: loop body
LE: loop exit
PB: predicated region body
PF: predicated region fallthrough
CT: control target
= control target key end

     0   :  { %14 = vsyncpa [#allocation5], 0  ;;  %s4994_s0 = inlined_call_operand.vmem [shape: f32[2,16,64], index: 0, kind: input, shape index: {}]   ;;  %s4995_s1 = inlined_call_operand.vmem [shape: bf16[144,16], index: 1, kind: input, shape index: {}]   ;;  %s4996_s2 = inlined_call_operand.vmem [shape: f32[1,16], index: 2, kind: input, shape index: {}]   ;;  %s4997_s3 = inlined_call_operand.vmem [shape: bf16[4,16,4], index: 3, kind: input, shape index: {}]   ;;  %s4998_s4 = inlined_call_operand.vmem [shape: f32[4,1,4], index: 4, kind: input, shape index: {}]   ;;  %s4999_s5 = inlined_call_operand.vmem [shape: bf16[4,36,4], index: 5, kind: input, shape index: {}]   ;;  %s5000_s6 = inlined_call_operand.vmem [shape: f32[4,1,4], index: 6, kind: input, shape index: {}]   ;;  %s5001_s7 = inlined_call_operand.vmem [shape: bf16[4,4,16], index: 7, kind: input, shape index: {}]   ;;  %s5002_s8 = inlined_call_operand.vmem [shape: f32[4,1,16], index: 8, kind: input, shape index: {}]   ;;  %s5003_s9 = inlined_call_operand.hbm [shape: f32[2,16,64], index: 9, kind: output, shape index: {}]  }
   0x1   :  { %16 = vsyncpa [#allocation5 + $0x1], 0  ;;  %s3969_s30 = smov 0   ;;  %s3971_s10 = smov 0  }
   0x2   :  { %s3973_s11 = smov 0   ;;  %s3975_s12 = smov 0  }
   0x3 LB: > { %s3990_s13 = sadd.s32 4294967295, %s3900_s12   ;;  %s3409_s14 = sadd.s32 4294967294, %s3900_s12   ;;  %s3900_s12 = sphi %s3975_s12, %s5009_s12   ;;  %s3896_s11 = sphi %s3973_s11, %s5008_s11   ;;  %s3892_s10 = sphi %s3971_s10, %s5007_s10   ;;  %s3888_s30 = sphi %s3969_s30, %s5006_s30  }
   0x4   : > { %s3994_s15 = sadd.s32 1, %s3900_s12   ;;  %s223_s16 = sadd.s32 1, %s3896_s11 }
   0x5   : > { %s220_s17 = ssub.s32 %s3900_s12, %s3994_s15  ;;  %p233_p0 = scmp.ne.s32.totalorder %s3896_s11, %s3892_s10 }
   0x6   : > { %p221_p1 = scmp.eq.s32.totalorder %s220_s17, 0  ;;  %p234_p2 = scmp.eq.s32.totalorder %s3990_s13, 1 }
   0x7   : > { %p239_p3 = scmp.ne.s32.totalorder %s3892_s10, %s3888_s30  ;;  %p240_p4 = scmp.eq.s32.totalorder %s3409_s14, 1 }
   0x8   : > { %s4005_s18 = scalar_select %p221_p1, %s3896_s11, %s223_s16  }
   0x9   : > { %p4007_p5 = por %p234_p2, %p233_p0  ;;  %p4011_p6 = por %p240_p4, %p239_p3 }
   0xa   : > { %p3412_p7 = scmp.ge.s32.totalorder %s3900_s12, 1  ;;  %p290_p8 = scmp.lt.s32.totalorder %s3900_s12, 3 }
   0xc   : > { %p291_p9 = pnand %p3412_p7, %p290_p8 }
   0xd   : > { %p326_p10 = scmp.lt.s32.totalorder (!%p291_p9), %s3990_s13, 1  ;;  %vm332_vm0 = vcmask (!%p291_p9), 130048   ;;  %vm334_vm1 = vcmask (!%p291_p9), 123904   ;;  %v3902_v0 = vmov (!%p291_p9), 0.0   ;;  %v3813_v3 = vld [vmem:[%s4995_s1] sm:$0xff] (!%p291_p9)   ;;  %v3903_v4 = vmov (!%p291_p9), 0  }
   0xe   : > { %294 = sbr.rel (%p291_p9) target bundleno = 4066 (0xfe2), region = 56  ;;  %336 = vst.msk [vmem:[#allocation2 + $0x10] sm:$0xff] (!%p291_p9), %vm332_vm0, %v3902_v0  ;;  %333 = vst.msk [vmem:[#allocation2] sm:$0xff] (!%p291_p9), %vm332_vm0, %v3902_v0  ;;  %752 = vmatprep.subr.bf16.mxu0 (!%p291_p9), %v3903_v4  ;;  %v3814_v5 = vld [vmem:[%s4995_s1 + $0x8] sm:$0xff] (!%p291_p9)   ;;  %v3815_v7 = vld [vmem:[%s4995_s1 + $0x10] sm:$0xff] (!%p291_p9)   ;;  %s3904_s24 = smov (!%p291_p9), 16  }
   0xf   : > { %337 = vst.msk [vmem:[#allocation2 + $0x18] sm:$0x3] (!%p291_p9), %vm334_vm1, %v3902_v0  ;;  %335 = vst.msk [vmem:[#allocation2 + $0x8] sm:$0x3] (!%p291_p9), %vm334_vm1, %v3902_v0  ;;  %753 = vmatpush1.bf16.msra.mxu0 (!%p291_p9), %v3813_v3  ;;  %v3816_v9 = vld [vmem:[%s4995_s1 + $0x18] sm:$0xff] (!%p291_p9)   ;;  %v3817_v17 = vld [vmem:[%s4995_s1 + $0x20] sm:$0xff] (!%p291_p9)  }
  0x10   : > { %338 = vst.msk [vmem:[#allocation2 + $0x20] sm:$0xff] (!%p291_p9), %vm332_vm0, %v3902_v0  ;;  %340 = vst.msk [vmem:[#allocation2 + $0x30] sm:$0xff] (!%p291_p9), %vm332_vm0, %v3902_v0  ;;  %754 = vmatprep.subr.bf16.mxu0 (!%p291_p9), %v3903_v4  ;;  %v3818_v24 = vld [vmem:[%s4995_s1 + $0x28] sm:$0xff] (!%p291_p9)   ;;  %s3905_s27 = smov (!%p291_p9), 32   ;;  %s3906_s28 = smov (!%p291_p9), 48   ;;  %v3819_v32 = vld [vmem:[%s4995_s1 + $0x30] sm:$0xff] (!%p291_p9)  }
  0x11   : > { %339 = vst.msk [vmem:[#allocation2 + $0x28] sm:$0x3] (!%p291_p9), %vm334_vm1, %v3902_v0  ;;  %341 = vst.msk [vmem:[#allocation2 + $0x38] sm:$0x3] (!%p291_p9), %vm334_vm1, %v3902_v0  ;;  %s3907_s16 = smov (!%p291_p9), 64   ;;  %v3820_v35 = vld [vmem:[%s4995_s1 + $0x38] sm:$0xff] (!%p291_p9)  }
  0x12   : > { %342 = vst.msk [vmem:[#allocation2 + $0x40] sm:$0xff] (!%p291_p9), %vm332_vm0, %v3902_v0  ;;  %344 = vst.msk [vmem:[#allocation2 + $0x50] sm:$0xff] (!%p291_p9), %vm332_vm0, %v3902_v0  ;;  %v3821_v44 = vld [vmem:[%s4995_s1 + $0x40] sm:$0xff] (!%p291_p9)   ;;  %s3909_s26 = smov (!%p291_p9), 96   ;;  %s3910_s29 = smov (!%p291_p9), 112   ;;  %vm464_vm2 = vcmask (!%p291_p9), 261248  }
  0x13   : > { %343 = vst.msk [vmem:[#allocation2 + $0x48] sm:$0x3] (!%p291_p9), %vm334_vm1, %v3902_v0  ;;  %345 = vst.msk [vmem:[#allocation2 + $0x58] sm:$0x3] (!%p291_p9), %vm334_vm1, %v3902_v0  ;;  %755 = vmatpush1.bf16.msra.mxu0 (!%p291_p9), %v3814_v5  ;;  %vm497_vm3 = vcmask (!%p291_p9), 392448   ;;  %vm530_vm4 = vcmask (!%p291_p9), 523648  }
  0x14   : > { %346 = vst.msk [vmem:[#allocation2 + $0x60] sm:$0xff] (!%p291_p9), %vm332_vm0, %v3902_v0  ;;  %348 = vst.msk [vmem:[#allocation2 + $0x70] sm:$0xff] (!%p291_p9), %vm332_vm0, %v3902_v0  ;;  %756 = vmatprep.subr.bf16.mxu0 (!%p291_p9), %v3903_v4  ;;  %vm551_vm5 = vcmask (!%p291_p9), 654848   ;;  %vm584_vm6 = vcmask (!%p291_p9), 786048   ;;  %vm618_vm7 = vcmask (!%p291_p9), 917248   ;;  %vm651_vm8 = vcmask (!%p291_p9), 1048448  }
  0x15   : > { %347 = vst.msk [vmem:[#allocation2 + $0x68] sm:$0x3] %vm334_vm1, %v3902_v0  ;;  %349 = vst.msk [vmem:[#allocation2 + $0x78] sm:$0x3] %vm334_vm1, %v3902_v0  ;;  %s327_s21 = scalar_select %p326_p10, %s3990_s13, 1  ;;  %v4064_v11 = vld [vmem:[#allocation2] sm:$0xff] }
  0x16   : > { %350 = vst.msk [vmem:[#allocation2 + $0x80] sm:$0xff] %vm332_vm0, %v3902_v0  ;;  %352 = vst.msk [vmem:[#allocation2 + $0x90] sm:$0xff] %vm332_vm0, %v3902_v0  ;;  %v4062_v10 = vld [vmem:[#allocation2 + $0x1] sm:$0xff]  ;;  %vm939_vm9 = vcmask 31744   ;;  %s3911_s23 = smov 4   ;;  %s3916_s14 = smov 28  }
  0x17   : > { %351 = vst.msk [vmem:[#allocation2 + $0x88] sm:$0x3] %vm334_vm1, %v3902_v0  ;;  %353 = vst.msk [vmem:[#allocation2 + $0x98] sm:$0x3] %vm334_vm1, %v3902_v0  ;;  %s3544_s22 = sshll.u32 %s327_s21, 4  ;;  %757 = vmatpush1.bf16.msra.mxu0 %v3815_v7  ;;  %v4073_v18 = vld [vmem:[#allocation2 + $0x2] sm:$0xff] }
  0x18   : > { %s330_s25 = scalar_lea.vmem %s4994_s0, %s3544_s22  ;;  %758 = vmatprep.subr.bf16.mxu0 %v3903_v4  ;;  %s3908_s22 = smov 80   ;;  %vm1254_vm10 = vcmask 1041408   ;;  %vm992_vm11 = vcmask 64544   ;;  %vm1025_vm12 = vcmask 97344   ;;  %vm1058_vm13 = vcmask 130144  }
  0x19   : > { %v354_v1 = vld [vmem:[%s330_s25] sm:$0xff]  ;;  %v355_v2 = vld [vmem:[%s330_s25 + $0x8] sm:$0xff]  ;;  %s3912_s25 = smov 12   ;;  %vm1079_vm14 = vcmask 162944   ;;  %vm1112_vm15 = vcmask 195744   ;;  %vm1145_vm1 = vcmask 228544  }
  0x1a   : > { %356 = vxpose.xlu0.b32.start [1/2] (short) (narrow) %v354_v1, 64  ;;  %s3545_s17 = sshll.u32 %s3990_s13, 8  ;;  %s3917_s13 = smov [#allocation4]  }
  0x1b   : > { %759 = vmatpush1.bf16.msra.mxu0 %v3816_v9 }
  0x1c   : > { %760 = vmatprep.subr.bf16.mxu0 %v3903_v4 }
  0x1d   : > { %v4135_v61 = vld [vmem:[#allocation2 + $0x90] sm:$0xff] }
  0x1e   : > { %357 = vxpose.xlu0.b32.end [2/2] (short) (narrow) %v355_v2, 64  ;;  %v4133_v60 = vld [vmem:[#allocation2 + $0x92] sm:$0xff] }
  0x1f   : > { %761 = vmatpush1.bf16.msra.mxu0 %v3817_v17 }
  0x20   : > { %762 = vmatprep.subr.bf16.mxu0 %v3903_v4 }
  0x23   : > { %763 = vmatpush1.bf16.msra.mxu0 %v3818_v24 }
  0x24   : > { %764 = vmatprep.subr.bf16.mxu0 %v3903_v4 }
  0x27   : > { %765 = vmatpush1.bf16.msra.mxu0 %v3819_v32 }
  0x28   : > { %766 = vmatprep.subr.bf16.mxu0 %v3903_v4 }
  0x2b   : > { %767 = vmatpush1.bf16.msra.mxu0 %v3820_v35 }
  0x2c   : > { %768 = vmatprep.subr.bf16.mxu0 %v3903_v4 }
  0x2f   : > { %769 = vmatpush1.bf16.msra.mxu0 %v3821_v44 }
  0x9a   : > { %v372_v6 = vpop.trf.xlu0 }
  0x9b   : > { %412 = vst.msk [vmem:[#allocation2 + $0x11] sm:$0xff] %vm332_vm0, %v372_v6 }
  0x9e   : > { %v373_v8 = vpop.trf.xlu0 }
  0x9f   : > { %413 = vst.msk [vmem:[#allocation2 + $0x21] sm:$0xff] %vm332_vm0, %v373_v8  ;;  %v407_v29 = vpack.c.bf16 %v373_v8, %v372_v6 }
  0xa2   : > { %v437_v12 = vld [vmem:[#allocation2 + $0x11] sm:$0xff]  ;;  %v374_v13 = vpop.trf.xlu0 }
  0xa3   : > { %v502_v14 = vld [vmem:[#allocation2 + $0x10] sm:$0xff]  ;;  %v444_v15 = vpack.c.bf16 %v437_v12, %v4062_v10  ;;  %414 = vst.msk [vmem:[#allocation2 + $0x31] sm:$0xff] %vm332_vm0, %v374_v13 }
  0xa4   : > { %v428_v16 = vpack.c.bf16 %v502_v14, %v4064_v11  ;;  %v470_v19 = vld [vmem:[#allocation2 + $0x12] sm:$0xff] }
  0xa5   : > { %452 = vrot.lane.b32.xlu1 %v444_v15, %s3904_s24  ;;  %v477_v22 = vpack.c.bf16 %v470_v19, %v4073_v18  ;;  %v4162_v15 = vld [vmem:[#allocation2 + $0x91] sm:$0xff] }
  0xa6   : > { %432 = vst.msk [vmem:[#allocation3] sm:$0xff] %vm332_vm0, %v428_v16  ;;  %v503_v20 = vld [vmem:[#allocation2 + $0x20] sm:$0xff]  ;;  %v375_v21 = vpop.trf.xlu0 }
  0xa7   : > { %v510_v23 = vpack.c.bf16 %v503_v20, %v502_v14  ;;  %415 = vst.msk [vmem:[#allocation2 + $0x41] sm:$0xff] %vm332_vm0, %v375_v21  ;;  %v656_v25 = vld [vmem:[#allocation2 + $0x22] sm:$0xff]  ;;  %v408_v41 = vpack.c.bf16 %v375_v21, %v374_v13 }
  0xa8   : > { %v564_v34 = vpack.c.bf16 %v656_v25, %v470_v19  ;;  %v623_v48 = vld [vmem:[#allocation2 + $0x21] sm:$0xff] }
  0xa9   : > { %485 = vrot.lane.b32.xlu1 %v477_v22, %s3905_s27  ;;  %518 = vrot.lane.b32.xlu0 %v510_v23, %s3906_s28 }
  0xaa   : > { %v4085_v26 = vld [vmem:[#allocation2 + $0x32] sm:$0xff]  ;;  %v4087_v27 = vpop.trf.xlu0 }
  0xab   : > { %v4089_v28 = vld [vmem:[#allocation2 + $0x30] sm:$0xff]  ;;  %416 = vst.msk [vmem:[#allocation2 + $0x51] sm:$0xff] %vm332_vm0, %v4087_v27  ;;  %v4094_v30 = vpack.c.bf16 %v4085_v26, %v656_v25 }
  0xac   : > { %v598_v31 = vpack.c.bf16 %v4089_v28, %v503_v20  ;;  %v624_v49 = vld [vmem:[#allocation2 + $0x31] sm:$0xff] }
  0xad   : > { %539 = vrot.lane.b32.xlu1 %v407_v29, %s3907_s16  ;;  %668 = vst.msk [vmem:[#allocation3 + $0x8] sm:$0xff] %vm332_vm0, %v4094_v30  ;;  %v631_v56 = vpack.c.bf16 %v624_v49, %v623_v48 }
  0xae   : > { %433 = vst.msk [vmem:[#allocation3 + $0x10] sm:$0xff] %vm332_vm0, %v598_v31  ;;  %v4105_v33 = vpop.trf.xlu0  ;;  %v658_v36 = vld [vmem:[#allocation2 + $0x42] sm:$0xff] }
  0xaf   : > { %417 = vst.msk [vmem:[#allocation2 + $0x61] sm:$0xff] %vm332_vm0, %v4105_v33  ;;  %v505_v38 = vld [vmem:[#allocation2 + $0x40] sm:$0xff]  ;;  %v565_v3 = vpack.c.bf16 %v658_v36, %v4085_v26  ;;  %v409_v4 = vpack.c.bf16 %v4105_v33, %v4087_v27 }
  0xb0   : > { %v511_v2 = vpack.c.bf16 %v505_v38, %v4089_v28  ;;  %v625_v5 = vld [vmem:[#allocation2 + $0x41] sm:$0xff] }
  0xb1   : > { %572 = vrot.lane.b32.xlu1 %v564_v34, %s3908_s22 }
  0xb2   : > { %v4114_v37 = vld [vmem:[#allocation2 + $0x52] sm:$0xff]  ;;  %v378_v39 = vpop.trf.xlu0 }
  0xb3   : > { %v593_v40 = vld [vmem:[#allocation2 + $0x50] sm:$0xff]  ;;  %418 = vst.msk [vmem:[#allocation2 + $0x71] sm:$0xff] %vm332_vm0, %v378_v39  ;;  %v479_v43 = vpack.c.bf16 %v4114_v37, %v658_v36 }
  0xb4   : > { %v599_v42 = vpack.c.bf16 %v593_v40, %v505_v38  ;;  %v673_v45 = vld [vmem:[#allocation3 + $0x8] sm:$0xff]  ;;  %v626_v6 = vld [vmem:[#allocation2 + $0x51] sm:$0xff] }
  0xb5   : > { %541 = vrot.lane.b32.xlu1 %v408_v41, %s3907_s16  ;;  %3426 = vmatprep.mubr.msk.bf16.mxu0 %vm332_vm0, %v673_v45  ;;  %669 = vst.msk [vmem:[#allocation3 + $0x18] sm:$0xff] %vm332_vm0, %v479_v43  ;;  %v632_v7 = vpack.c.bf16 %v626_v6, %v625_v5 }
  0xb6   : > { %434 = vst.msk [vmem:[#allocation3 + $0x20] sm:$0xff] %vm332_vm0, %v599_v42  ;;  %v379_v46 = vpop.trf.xlu0  ;;  %v627_v50 = vld [vmem:[#allocation2 + $0x61] sm:$0xff] }
  0xb7   : > { %v410_v47 = vpack.c.bf16 %v379_v46, %v378_v39  ;;  %419 = vst.msk [vmem:[#allocation2 + $0x81] sm:$0xff] %vm332_vm0, %v379_v46  ;;  %v660_v51 = vld [vmem:[#allocation2 + $0x62] sm:$0xff] }
  0xb8   : > { %v507_v52 = vld [vmem:[#allocation2 + $0x60] sm:$0xff]  ;;  %v566_v9 = vpack.c.bf16 %v660_v51, %v4114_v37 }
  0xb9   : > { %606 = vrot.lane.b32.xlu1 %v598_v31, %s3909_s26  ;;  %545 = vrot.lane.b32.xlu0 %v410_v47, %s3907_s16  ;;  %v512_v8 = vpack.c.bf16 %v507_v52, %v593_v40 }
  0xba   : > { %v661_v53 = vld [vmem:[#allocation2 + $0x72] sm:$0xff] }
  0xbb   : > { %v628_v54 = vld [vmem:[#allocation2 + $0x71] sm:$0xff]  ;;  %v480_v58 = vpack.c.bf16 %v661_v53, %v660_v51 }
  0xbc   : > { %v595_v55 = vld [vmem:[#allocation2 + $0x70] sm:$0xff]  ;;  %v633_v57 = vpack.c.bf16 %v628_v54, %v627_v50  ;;  %v675_v29 = vld [vmem:[#allocation3 + $0x18] sm:$0xff]  ;;  %v3416_v54 = vld [vmem:[%s4996_s2] ss:$0 sm:$0xff] }
  0xbd   : > { %v600_v59 = vpack.c.bf16 %v595_v55, %v507_v52  ;;  %639 = vrot.lane.b32.xlu1 %v631_v56, %s3910_s29  ;;  %670 = vst.msk [vmem:[#allocation3 + $0x28] sm:$0xff] %vm332_vm0, %v480_v58 }
  0xbe   : > { %643 = vrot.lane.b32.xlu0 %v633_v57, %s3910_s29  ;;  %v662_v62 = vld [vmem:[#allocation2 + $0x82] sm:$0xff] }
  0xbf   : > { %435 = vst.msk [vmem:[#allocation3 + $0x30] sm:$0xff] %vm332_vm0, %v600_v59  ;;  %v509_v63 = vld [vmem:[#allocation2 + $0x80] sm:$0xff]  ;;  %v667_v0 = vpack.c.bf16 %v4133_v60, %v662_v62  ;;  %v567_v13 = vpack.c.bf16 %v662_v62, %v661_v53 }
  0xc0   : > { %v601_v1 = vpack.c.bf16 %v4135_v61, %v509_v63  ;;  %v513_v12 = vpack.c.bf16 %v509_v63, %v595_v55  ;;  %v629_v14 = vld [vmem:[#allocation2 + $0x81] sm:$0xff] }
  0xc1   : > { %454 = vrot.lane.b32.xlu1 %v631_v56, %s3904_s24  ;;  %671 = vst.msk [vmem:[#allocation3 + $0x38] sm:$0xff] %vm332_vm0, %v667_v0  ;;  %v634_v16 = vpack.c.bf16 %v4162_v15, %v629_v14  ;;  %v3822_v53 = vld [vmem:[%s4997_s3] sm:$0xff]  }
  0xc2   : > { %491 = vrot.lane.b32.xlu0 %v480_v58, %s3905_s27  ;;  %3614 = vmatprep.subr.bf16.mxu1 %v3822_v53 }
  0xc3   : > { %3615 = vmatpush3.bf16.msra.mxu1 %v3822_v53 }
  0xc4   : > { %v677_v38 = vld [vmem:[#allocation3 + $0x28] sm:$0xff] }
  0xc5   : > { %487 = vrot.lane.b32.xlu1 %v4094_v30, %s3905_s27 }
  0xc6   : > { %612 = vrot.lane.b32.xlu0 %v601_v1, %s3909_s26 }
  0xc8   : > { %v679_v48 = vld [vmem:[#allocation3 + $0x38] sm:$0xff] }
  0xc9   : > { %520 = vrot.lane.b32.xlu1 %v511_v2, %s3906_s28 }
  0xcd   : > { %574 = vrot.lane.b32.xlu1 %v565_v3, %s3908_s22 }
  0xd1   : > { %543 = vrot.lane.b32.xlu1 %v409_v4, %s3907_s16 }
  0xd5   : > { %608 = vrot.lane.b32.xlu1 %v599_v42, %s3909_s26 }
  0xd9   : > { %641 = vrot.lane.b32.xlu1 %v632_v7, %s3910_s29 }
  0xdd   : > { %456 = vrot.lane.b32.xlu1 %v632_v7, %s3904_s24 }
  0xe1   : > { %489 = vrot.lane.b32.xlu1 %v479_v43, %s3905_s27 }
  0xe5   : > { %522 = vrot.lane.b32.xlu1 %v512_v8, %s3906_s28 }
  0xe9   : > { %576 = vrot.lane.b32.xlu1 %v566_v9, %s3908_s22 }
  0xed   : > { %610 = vrot.lane.b32.xlu1 %v600_v59, %s3909_s26  ;;  %s3913_s26 = smov 8  }
  0xf1   : > { %458 = vrot.lane.b32.xlu1 %v633_v57, %s3904_s24 }
  0xf5   : > { %524 = vrot.lane.b32.xlu1 %v513_v12, %s3906_s28  ;;  %s3915_s28 = smov 24  }
  0xf9   : > { %578 = vrot.lane.b32.xlu1 %v567_v13, %s3908_s22 }
  0xfd   : > { %645 = vrot.lane.b32.xlu1 %v634_v16, %s3910_s29  ;;  %s3914_s29 = smov 20  }
 0x117   : > { %v453_v17 = vpop.permute.xlu1 %452 }
 0x118   : > { %465 = vst.msk [vmem:[#allocation3] sm:$0xff] %vm464_vm2, %v453_v17 }
 0x11b   : > { %v486_v19 = vpop.permute.xlu1 %485  ;;  %v519_v20 = vpop.permute.xlu0 %518 }
 0x11c   : > { %498 = vst.msk [vmem:[#allocation3] sm:$0xff] %vm497_vm3, %v486_v19 }
 0x11d   : > { %531 = vst.msk [vmem:[#allocation3] sm:$0xff] %vm530_vm4, %v519_v20 }
 0x11f   : > { %v540_v21 = vpop.permute.xlu1 %539 }
 0x120   : > { %552 = vst.msk [vmem:[#allocation3] sm:$0xff] %vm551_vm5, %v540_v21 }
 0x123   : > { %v573_v22 = vpop.permute.xlu1 %572 }
 0x124   : > { %585 = vst.msk [vmem:[#allocation3] sm:$0xff] %vm584_vm6, %v573_v22 }
 0x127   : > { %v542_v23 = vpop.permute.xlu1 %541 }
 0x12b   : > { %v607_v24 = vpop.permute.xlu1 %606  ;;  %v546_v40 = vpop.permute.xlu0 %545 }
 0x12c   : > { %619 = vst.msk [vmem:[#allocation3] sm:$0xff] %vm618_vm7, %v607_v24 }
 0x12f   : > { %v640_v25 = vpop.permute.xlu1 %639 }
 0x130   : > { %652 = vst.msk [vmem:[#allocation3] sm:$0xff] %vm651_vm8, %v640_v25  ;;  %v644_v42 = vpop.permute.xlu0 %643 }
 0x133   : > { %v455_v26 = vpop.permute.xlu1 %454 }
 0x134   : > { %466 = vst.msk [vmem:[#allocation3 + $0x10] sm:$0xff] %vm464_vm2, %v455_v26  ;;  %v492_v45 = vpop.permute.xlu0 %491 }
 0x137   : > { %v488_v27 = vpop.permute.xlu1 %487  ;;  %v672_v28 = vld [vmem:[#allocation3] sm:$0xff] }
 0x138   : > { %499 = vst.msk [vmem:[#allocation3 + $0x10] sm:$0xff] %vm497_vm3, %v488_v27  ;;  %785 = vmatmul.mubr.bf16.vlgmr.msra.gmra.mrb[0].mxu0 %v672_v28  ;;  %v613_v50 = vpop.permute.xlu0 %612 }
 0x139   : > { %3427 = vmatprep.mubr.msk.bf16.mxu0 %vm332_vm0, %v675_v29 }
 0x13b   : > { %v521_v30 = vpop.permute.xlu1 %520 }
 0x13c   : > { %532 = vst.msk [vmem:[#allocation3 + $0x10] sm:$0xff] %vm530_vm4, %v521_v30 }
 0x13d   : > { %553 = vst.msk [vmem:[#allocation3 + $0x10] sm:$0xff] %vm551_vm5, %v542_v23 }
 0x13f   : > { %v575_v31 = vpop.permute.xlu1 %574 }
 0x140   : > { %586 = vst.msk [vmem:[#allocation3 + $0x10] sm:$0xff] %vm584_vm6, %v575_v31 }
 0x143   : > { %v544_v32 = vpop.permute.xlu1 %543 }
 0x147   : > { %v609_v33 = vpop.permute.xlu1 %608 }
 0x148   : > { %620 = vst.msk [vmem:[#allocation3 + $0x10] sm:$0xff] %vm618_vm7, %v609_v33  ;;  %v4251_v33 = vld [vmem:[%s4998_s4] ss:$0 sm:$0xff] }
 0x14b   : > { %v642_v34 = vpop.permute.xlu1 %641 }
 0x14c   : > { %653 = vst.msk [vmem:[#allocation3 + $0x10] sm:$0xff] %vm651_vm8, %v642_v34 }
 0x14f   : > { %v457_v35 = vpop.permute.xlu1 %456 }
 0x150   : > { %467 = vst.msk [vmem:[#allocation3 + $0x20] sm:$0xff] %vm464_vm2, %v457_v35 }
 0x153   : > { %v490_v36 = vpop.permute.xlu1 %489  ;;  %v674_v37 = vld [vmem:[#allocation3 + $0x10] sm:$0xff] }
 0x154   : > { %500 = vst.msk [vmem:[#allocation3 + $0x20] sm:$0xff] %vm497_vm3, %v490_v36  ;;  %793 = vmatmul.mubr.bf16.gmra.mrb[4].mxu0 %v674_v37 }
 0x155   : > { %3428 = vmatprep.mubr.msk.bf16.mxu0 %vm332_vm0, %v677_v38 }
 0x157   : > { %v523_v39 = vpop.permute.xlu1 %522 }
 0x158   : > { %533 = vst.msk [vmem:[#allocation3 + $0x20] sm:$0xff] %vm530_vm4, %v523_v39 }
 0x159   : > { %554 = vst.msk [vmem:[#allocation3 + $0x20] sm:$0xff] %vm551_vm5, %v544_v32 }
 0x15b   : > { %v577_v41 = vpop.permute.xlu1 %576 }
 0x15c   : > { %587 = vst.msk [vmem:[#allocation3 + $0x20] sm:$0xff] %vm584_vm6, %v577_v41 }
 0x15f   : > { %v611_v43 = vpop.permute.xlu1 %610 }
 0x160   : > { %621 = vst.msk [vmem:[#allocation3 + $0x20] sm:$0xff] %vm618_vm7, %v611_v43 }
 0x161   : > { %654 = vst.msk [vmem:[#allocation3 + $0x20] sm:$0xff] %vm651_vm8, %v644_v42 }
 0x163   : > { %v459_v44 = vpop.permute.xlu1 %458 }
 0x164   : > { %468 = vst.msk [vmem:[#allocation3 + $0x30] sm:$0xff] %vm464_vm2, %v459_v44  ;;  %vm1178_vm2 = vcmask 261344  }
 0x165   : > { %501 = vst.msk [vmem:[#allocation3 + $0x30] sm:$0xff] %vm497_vm3, %v492_v45  ;;  %vm1211_vm3 = vcmask 294144  }
 0x167   : > { %v525_v46 = vpop.permute.xlu1 %524 }
 0x168   : > { %534 = vst.msk [vmem:[#allocation3 + $0x30] sm:$0xff] %vm530_vm4, %v525_v46  ;;  %v676_v47 = vld [vmem:[#allocation3 + $0x20] sm:$0xff]  ;;  %vm1241_vm4 = vcmask 293888  }
 0x169   : > { %555 = vst.msk [vmem:[#allocation3 + $0x30] sm:$0xff] %vm551_vm5, %v546_v40  ;;  %801 = vmatmul.mubr.bf16.gmra.mrb[8].mxu0 %v676_v47 }
 0x16a   : > { %3429 = vmatprep.mubr.msk.bf16.mxu0 %vm332_vm0, %v679_v48 }
 0x16b   : > { %v579_v49 = vpop.permute.xlu1 %578 }
 0x16c   : > { %588 = vst.msk [vmem:[#allocation3 + $0x30] sm:$0xff] %vm584_vm6, %v579_v49 }
 0x16d   : > { %622 = vst.msk [vmem:[#allocation3 + $0x30] sm:$0xff] %vm618_vm7, %v613_v50 }
 0x16f   : > { %v646_v51 = vpop.permute.xlu1 %645 }
 0x170   : > { %655 = vst.msk [vmem:[#allocation3 + $0x30] sm:$0xff] %vm651_vm8, %v646_v51 }
 0x177   : > { %v678_v52 = vld [vmem:[#allocation3 + $0x30] sm:$0xff] }
 0x178   : > { %809 = vmatmul.mubr.bf16.gmra.mrb[12].mxu0 %v678_v52 }
 0x20b   : > { %v786_v55 = vpop.f32.mrb[0].mxu0 }
 0x20c   : > { %v4204_v56 = vadd.f32 %v3416_v54, %v786_v55  ;;  %v788_v57 = vpop.f32.mrb[1].mxu0 }
 0x20d   : > { %v789_v58 = vpop.f32.mrb[2].mxu0 }
 0x20e   : > { %v4206_v59 = vadd.f32 %v3416_v54, %v789_v58  ;;  %v791_v62 = vpop.f32.mrb[3].mxu0  ;;  %v817_v63 = vmax.f32 %v4204_v56, 0.0 }
 0x210   : > { %v818_v0 = vmax.f32 %v4206_v59, 0.0 }
 0x212   : > { %v828_v1 = vpack.c.bf16 %v818_v0, %v817_v63 }
 0x214   : > { %3616 = vmatprep.mubr.msk.bf16.mxu1 %vm332_vm0, %v828_v1 }
 0x227   : > { %v794_v2 = vpop.f32.mrb[4].mxu0 }
 0x228   : > { %v4215_v3 = vadd.f32 %v3416_v54, %v794_v2  ;;  %v796_v4 = vpop.f32.mrb[5].mxu0 }
 0x229   : > { %v797_v5 = vpop.f32.mrb[6].mxu0 }
 0x22a   : > { %v4217_v6 = vadd.f32 %v3416_v54, %v797_v5  ;;  %v799_v7 = vpop.f32.mrb[7].mxu0  ;;  %v819_v8 = vmax.f32 %v4215_v3, 0.0 }
 0x22c   : > { %v820_v9 = vmax.f32 %v4217_v6, 0.0 }
 0x22e   : > { %v829_v12 = vpack.c.bf16 %v820_v9, %v819_v8 }
 0x230   : > { %3617 = vmatmul.mubr.msk.bf16.vlgmr.msra.gmra.mrb[0].mxu1 %vm332_vm0, %v829_v12 }
 0x23c   : > { %v802_v13 = vpop.f32.mrb[8].mxu0 }
 0x23d   : > { %v4226_v14 = vadd.f32 %v3416_v54, %v802_v13  ;;  %v804_v16 = vpop.f32.mrb[9].mxu0 }
 0x23e   : > { %v805_v17 = vpop.f32.mrb[10].mxu0 }
 0x23f   : > { %v4228_v19 = vadd.f32 %v3416_v54, %v805_v17  ;;  %v807_v20 = vpop.f32.mrb[11].mxu0  ;;  %v821_v21 = vmax.f32 %v4226_v14, 0.0 }
 0x241   : > { %v822_v22 = vmax.f32 %v4228_v19, 0.0 }
 0x243   : > { %v830_v23 = vpack.c.bf16 %v822_v22, %v821_v21 }
 0x245   : > { %3620 = vmatprep.mubr.msk.bf16.mxu1 %vm332_vm0, %v830_v23 }
 0x24b   : > { %v810_v24 = vpop.f32.mrb[12].mxu0 }
 0x24c   : > { %v4237_v25 = vadd.f32 %v3416_v54, %v810_v24  ;;  %v812_v26 = vpop.f32.mrb[13].mxu0 }
 0x24d   : > { %v813_v27 = vpop.f32.mrb[14].mxu0 }
 0x24e   : > { %v4239_v28 = vadd.f32 %v3416_v54, %v813_v27  ;;  %v815_v29 = vpop.f32.mrb[15].mxu0  ;;  %v823_v30 = vmax.f32 %v4237_v25, 0.0 }
 0x250   : > { %v824_v31 = vmax.f32 %v4239_v28, 0.0 }
 0x252   : > { %v831_v32 = vpack.c.bf16 %v824_v31, %v823_v30 }
 0x254   : > { %3621 = vmatmul.mubr.msk.bf16.gmra.mrb[4].mxu1 %vm332_vm0, %v831_v32  ;;  %v3823_v32 = vld [vmem:[%s4999_s5] sm:$0xff]  }
 0x255   : > { %3624 = vmatprep.subr.bf16.mxu1 %v3823_v32 }
 0x256   : > { %3625 = vmatpush3.bf16.msra.mxu1 %v3823_v32 }
 0x303   : > { %v3618_v34 = vpop.f32.mrb[0].mxu1 }
 0x304   : > { %v899_v35 = vadd.f32 %v3618_v34, %v4251_v33  ;;  %v890_v36 = vpop.f32.mrb[1].mxu1 }
 0x305   : > { %v891_v37 = vadd.f32 %v4251_v33, %v890_v36  ;;  %v3619_v38 = vpop.f32.mrb[2].mxu1 }
 0x306   : > { %v923_v39 = vmax.f32 %v899_v35, 0.0  ;;  %v902_v40 = vadd.f32 %v3619_v38, %v4251_v33  ;;  %v893_v41 = vpop.f32.mrb[3].mxu1 }
 0x307   : > { %v921_v42 = vmax.f32 %v891_v37, 0.0  ;;  %v894_v43 = vadd.f32 %v4251_v33, %v893_v41 }
 0x308   : > { %942 = vst.msk [vmem:[#allocation2 + $0x31] sm:$0xff] %vm939_vm9, %v923_v39  ;;  %v924_v44 = vmax.f32 %v902_v40, 0.0 }
 0x309   : > { %940 = vst.msk [vmem:[#allocation2 + $0x11] sm:$0xff] %vm939_vm9, %v921_v42  ;;  %v922_v45 = vmax.f32 %v894_v43, 0.0 }
 0x30a   : > { %v936_v46 = vpack.c.bf16 %v924_v44, %v923_v39  ;;  %943 = vst.msk [vmem:[#allocation2 + $0x41] sm:$0xff] %vm939_vm9, %v924_v44 }
 0x30b   : > { %v935_v47 = vpack.c.bf16 %v922_v45, %v921_v42  ;;  %941 = vst.msk [vmem:[#allocation2 + $0x21] sm:$0xff] %vm939_vm9, %v922_v45 }
 0x30c   : > { %1069 = vrot.lane.b32.xlu1 %v936_v46, %s3904_s24 }
 0x30d   : > { %1067 = vrot.lane.b32.xlu0 %v935_v47, %s3904_s24 }
 0x30f   : > { %v1032_v51 = vld [vmem:[#allocation2 + $0x30] sm:$0xff] }
 0x310   : > { %v965_v48 = vld [vmem:[#allocation2 + $0x11] sm:$0xff] }
 0x311   : > { %v1030_v49 = vld [vmem:[#allocation2 + $0x10] sm:$0xff]  ;;  %v972_v50 = vpack.c.bf16 %v965_v48, %v4062_v10  ;;  %v4264_v52 = vld [vmem:[#allocation2 + $0x40] sm:$0xff] }
 0x312   : > { %v956_v53 = vpack.c.bf16 %v1030_v49, %v4064_v11  ;;  %v1039_v54 = vpack.c.bf16 %v4264_v52, %v1032_v51  ;;  %v998_v55 = vld [vmem:[#allocation2 + $0x12] sm:$0xff]  ;;  %v1031_v57 = vld [vmem:[#allocation2 + $0x20] sm:$0xff]  ;;  %v3825_v48 = vld [vmem:[%s4999_s5 + $0x10] ss:$0 sps:$4 sm:$0x33]  }
 0x313   : > { %980 = vrot.lane.b32.xlu0 %v972_v50, %s3911_s23  ;;  %v1087_v58 = vld [vmem:[#allocation2 + $0x42] sm:$0xff]  ;;  %v1125_v62 = vpack.c.bf16 %v1032_v51, %v1031_v57  ;;  %v1005_v10 = vpack.c.bf16 %v998_v55, %v4073_v18  ;;  %v1086_v1 = vld [vmem:[#allocation2 + $0x32] sm:$0xff]  ;;  %v1038_v4 = vpack.c.bf16 %v1031_v57, %v1030_v49  ;;  %v1256_v51 = vsel %vm1254_vm10, %v3825_v48, 0 }
 0x314   : > { %960 = vst.msk [vmem:[#allocation3] sm:$0xff] %vm939_vm9, %v956_v53  ;;  %1048 = vrot.lane.b32.xlu1 %v1039_v54, %s3912_s25  ;;  %v1093_v2 = vpack.c.bf16 %v1087_v58, %v1086_v1  ;;  %v966_v11 = vld [vmem:[#allocation2 + $0x21] sm:$0xff]  ;;  %v967_v5 = vld [vmem:[#allocation2 + $0x31] sm:$0xff] }
 0x315   : > { %961 = vst.msk [vmem:[#allocation3 + $0x10] sm:$0xff] %vm939_vm9, %v1125_v62  ;;  %v973_v7 = vpack.c.bf16 %v967_v5, %v966_v11  ;;  %v1085_v12 = vld [vmem:[#allocation2 + $0x22] sm:$0xff] }
 0x316   : > { %v1092_v18 = vpack.c.bf16 %v1085_v12, %v998_v55  ;;  %v1006_v13 = vpack.c.bf16 %v1086_v1, %v1085_v12  ;;  %v1152_v49 = vld [vmem:[#allocation2 + $0x41] sm:$0xff] }
 0x317   : > { %1013 = vrot.lane.b32.xlu0 %v1005_v10, %s3913_s26 }
 0x318   : > { %1102 = vrot.lane.b32.xlu1 %v1093_v2, %s3914_s29 }
 0x31b   : > { %1046 = vrot.lane.b32.xlu0 %v1038_v4, %s3912_s25 }
 0x31c   : > { %982 = vrot.lane.b32.xlu1 %v973_v7, %s3911_s23 }
 0x31f   : > { %1100 = vrot.lane.b32.xlu0 %v1092_v18, %s3914_s29 }
 0x320   : > { %1015 = vrot.lane.b32.xlu1 %v1006_v13, %s3913_s26 }
 0x323   : > { %1133 = vrot.lane.b32.xlu0 %v1125_v62, %s3915_s28 }
 0x327   : > { %1166 = vrot.lane.b32.xlu0 %v973_v7, %s3916_s14  ;;  %v3622_v16 = vpop.f32.mrb[4].mxu1 }
 0x328   : > { %v915_v17 = vadd.f32 %v3622_v16, %v4251_v33  ;;  %v906_v20 = vpop.f32.mrb[5].mxu1 }
 0x329   : > { %v907_v23 = vadd.f32 %v4251_v33, %v906_v20  ;;  %v3623_v24 = vpop.f32.mrb[6].mxu1 }
 0x32a   : > { %v927_v26 = vmax.f32 %v915_v17, 0.0  ;;  %v918_v27 = vadd.f32 %v3623_v24, %v4251_v33  ;;  %v909_v29 = vpop.f32.mrb[7].mxu1 }
 0x32b   : > { %v925_v34 = vmax.f32 %v907_v23, 0.0  ;;  %v910_v35 = vadd.f32 %v4251_v33, %v909_v29  ;;  %1199 = vrot.lane.b32.xlu0 %v1006_v13, %s3905_s27  ;;  %v3824_v33 = vld [vmem:[%s4999_s5 + $0x8] sm:$0xff]  }
 0x32c   : > { %946 = vst.msk [vmem:[#allocation2 + $0x71] sm:$0xff] %vm939_vm9, %v927_v26  ;;  %v928_v36 = vmax.f32 %v918_v27, 0.0  ;;  %3626 = vmatprep.subr.bf16.mxu1 %v3824_v33 }
 0x32d   : > { %944 = vst.msk [vmem:[#allocation2 + $0x51] sm:$0xff] %vm939_vm9, %v925_v34  ;;  %v926_v37 = vmax.f32 %v910_v35, 0.0  ;;  %3627 = vmatpush3.bf16.msra.mxu1 %v3824_v33 }
 0x32e   : > { %v938_v38 = vpack.c.bf16 %v928_v36, %v927_v26  ;;  %947 = vst.msk [vmem:[#allocation2 + $0x81] sm:$0xff] %vm939_vm9, %v928_v36  ;;  %3750 = vmatprep.subr.msk.bf16.mxu1 %vm1254_vm10, %v3825_v48 }
 0x32f   : > { %v937_v39 = vpack.c.bf16 %v926_v37, %v925_v34  ;;  %945 = vst.msk [vmem:[#allocation2 + $0x61] sm:$0xff] %vm939_vm9, %v926_v37 }
 0x330   : > { %1073 = vrot.lane.b32.xlu1 %v938_v38, %s3904_s24 }
 0x331   : > { %1071 = vrot.lane.b32.xlu0 %v937_v39, %s3904_s24  ;;  %3629 = vmatpush3.bf16.msra.mxu1 %v1256_v51 }
 0x333   : > { %v1036_v46 = vld [vmem:[#allocation2 + $0x70] sm:$0xff] }
 0x334   : > { %v1120_v40 = vld [vmem:[#allocation2 + $0x50] sm:$0xff] }
 0x335   : > { %v1186_v41 = vld [vmem:[#allocation2 + $0x52] sm:$0xff]  ;;  %v1126_v42 = vpack.c.bf16 %v1120_v40, %v4264_v52  ;;  %v1037_v53 = vld [vmem:[#allocation2 + $0x80] sm:$0xff] }
 0x336   : > { %v1192_v43 = vpack.c.bf16 %v1186_v41, %v1087_v58  ;;  %v1153_v44 = vld [vmem:[#allocation2 + $0x51] sm:$0xff]  ;;  %v1035_v45 = vld [vmem:[#allocation2 + $0x60] sm:$0xff]  ;;  %v1041_v55 = vpack.c.bf16 %v1037_v53, %v1036_v46  ;;  %v1128_v11 = vpack.c.bf16 %v4135_v61, %v1037_v53 }
 0x337   : > { %1135 = vrot.lane.b32.xlu1 %v1126_v42, %s3915_s28  ;;  %v1127_v47 = vpack.c.bf16 %v1036_v46, %v1035_v45  ;;  %962 = vst.msk [vmem:[#allocation3 + $0x20] sm:$0xff] %vm939_vm9, %v1126_v42  ;;  %v1159_v50 = vpack.c.bf16 %v1153_v44, %v1152_v49  ;;  %v1040_v52 = vpack.c.bf16 %v1035_v45, %v1120_v40  ;;  %v1089_v54 = vld [vmem:[#allocation2 + $0x62] sm:$0xff]  ;;  %v1090_v62 = vld [vmem:[#allocation2 + $0x72] sm:$0xff] }
 0x338   : > { %1201 = vrot.lane.b32.xlu0 %v1192_v43, %s3905_s27  ;;  %v1094_v57 = vpack.c.bf16 %v1089_v54, %v1186_v41  ;;  %v1091_v58 = vld [vmem:[#allocation2 + $0x82] sm:$0xff]  ;;  %v1155_v2 = vld [vmem:[#allocation2 + $0x71] sm:$0xff]  ;;  %v1193_v5 = vpack.c.bf16 %v1090_v62, %v1089_v54 }
 0x339   : > { %963 = vst.msk [vmem:[#allocation3 + $0x30] sm:$0xff] %vm939_vm9, %v1127_v47  ;;  %v1095_v10 = vpack.c.bf16 %v1091_v58, %v1090_v62  ;;  %v1154_v1 = vld [vmem:[#allocation2 + $0x61] sm:$0xff]  ;;  %v1194_v18 = vpack.c.bf16 %v4133_v60, %v1091_v58  ;;  %v3436_v62 = vld [vmem:[%s5000_s6] ss:$0 sm:$0xff] }
 0x33a   : > { %v1160_v4 = vpack.c.bf16 %v1155_v2, %v1154_v1  ;;  %v1156_v7 = vld [vmem:[#allocation2 + $0x81] sm:$0xff] }
 0x33b   : > { %1168 = vrot.lane.b32.xlu1 %v1159_v50, %s3916_s14  ;;  %v1161_v12 = vpack.c.bf16 %v4162_v15, %v1156_v7 }
 0x33c   : > { %1017 = vrot.lane.b32.xlu0 %v1192_v43, %s3913_s26 }
 0x33f   : > { %984 = vrot.lane.b32.xlu1 %v1159_v50, %s3911_s23 }
 0x340   : > { %1050 = vrot.lane.b32.xlu0 %v1040_v52, %s3912_s25 }
 0x343   : > { %1052 = vrot.lane.b32.xlu1 %v1041_v55, %s3912_s25 }
 0x344   : > { %1104 = vrot.lane.b32.xlu0 %v1094_v57, %s3914_s29  ;;  %v1331_v57 = vld [vmem:[%s5001_s7] sm:$0x3] }
 0x345   : > { %3751 = vmatprep.subr.msk.bf16.mxu1 %vm1254_vm10, %v1331_v57  ;;  %v1356_v58 = vsel %vm1254_vm10, %v1331_v57, 0  ;;  %v1429_v57 = vmul.f32 0.484375, %v823_v30 }
 0x347   : > { %1106 = vrot.lane.b32.xlu1 %v1095_v10, %s3914_s29 }
 0x348   : > { %1137 = vrot.lane.b32.xlu0 %v1127_v47, %s3915_s28 }
 0x34b   : > { %1139 = vrot.lane.b32.xlu1 %v1128_v11, %s3915_s28 }
 0x34c   : > { %1170 = vrot.lane.b32.xlu0 %v1160_v4, %s3916_s14 }
 0x34f   : > { %986 = vrot.lane.b32.xlu1 %v1160_v4, %s3911_s23 }
 0x350   : > { %1203 = vrot.lane.b32.xlu0 %v1193_v5, %s3905_s27 }
 0x353   : > { %1019 = vrot.lane.b32.xlu1 %v1193_v5, %s3913_s26 }
 0x357   : > { %1172 = vrot.lane.b32.xlu1 %v1161_v12, %s3916_s14 }
 0x35b   : > { %1205 = vrot.lane.b32.xlu1 %v1194_v18, %s3905_s27 }
 0x37e   : > { %v1070_v13 = vpop.permute.xlu1 %1069 }
 0x37f   : > { %v1068_v61 = vpop.permute.xlu0 %1067 }
 0x385   : > { %v981_v16 = vpop.permute.xlu0 %980 }
 0x386   : > { %993 = vst.msk [vmem:[#allocation3] sm:$0xff] %vm992_vm11, %v981_v16  ;;  %v1049_v17 = vpop.permute.xlu1 %1048 }
 0x389   : > { %v1014_v20 = vpop.permute.xlu0 %1013 }
 0x38a   : > { %1026 = vst.msk [vmem:[#allocation3] sm:$0xff] %vm1025_vm12, %v1014_v20  ;;  %v1103_v23 = vpop.permute.xlu1 %1102 }
 0x38d   : > { %v1047_v15 = vpop.permute.xlu0 %1046 }
 0x38e   : > { %1059 = vst.msk [vmem:[#allocation3] sm:$0xff] %vm1058_vm13, %v1047_v15  ;;  %v983_v60 = vpop.permute.xlu1 %982 }
 0x38f   : > { %994 = vst.msk [vmem:[#allocation3 + $0x10] sm:$0xff] %vm992_vm11, %v983_v60 }
 0x390   : > { %1080 = vst.msk [vmem:[#allocation3] sm:$0xff] %vm1079_vm14, %v1068_v61 }
 0x391   : > { %v1101_v24 = vpop.permute.xlu0 %1100 }
 0x392   : > { %1113 = vst.msk [vmem:[#allocation3] sm:$0xff] %vm1112_vm15, %v1101_v24  ;;  %v1016_v26 = vpop.permute.xlu1 %1015 }
 0x393   : > { %1027 = vst.msk [vmem:[#allocation3 + $0x10] sm:$0xff] %vm1025_vm12, %v1016_v26 }
 0x394   : > { %1060 = vst.msk [vmem:[#allocation3 + $0x10] sm:$0xff] %vm1058_vm13, %v1049_v17 }
 0x395   : > { %1081 = vst.msk [vmem:[#allocation3 + $0x10] sm:$0xff] %vm1079_vm14, %v1070_v13  ;;  %v1134_v27 = vpop.permute.xlu0 %1133 }
 0x396   : > { %1146 = vst.msk [vmem:[#allocation3] sm:$0xff] %vm1145_vm1, %v1134_v27 }
 0x397   : > { %1114 = vst.msk [vmem:[#allocation3 + $0x10] sm:$0xff] %vm1112_vm15, %v1103_v23 }
 0x399   : > { %v1167_v29 = vpop.permute.xlu0 %1166 }
 0x39a   : > { %1179 = vst.msk [vmem:[#allocation3] sm:$0xff] %vm1178_vm2, %v1167_v29 }
 0x39d   : > { %v1200_v32 = vpop.permute.xlu0 %1199 }
 0x39e   : > { %1212 = vst.msk [vmem:[#allocation3] sm:$0xff] %vm1211_vm3, %v1200_v32 }
 0x3a2   : > { %v1074_v34 = vpop.permute.xlu1 %1073 }
 0x3a3   : > { %v1072_v35 = vpop.permute.xlu0 %1071 }
 0x3a5   : > { %v1216_v36 = vld [vmem:[#allocation3] sm:$0xff] }
 0x3a6   : > { %3630 = vmatprep.mubr.msk.bf16.mxu1 %vm1241_vm4, %v1216_v36 }
 0x3a9   : > { %v1136_v37 = vpop.permute.xlu1 %1135 }
 0x3aa   : > { %v1202_v38 = vpop.permute.xlu0 %1201  ;;  %1147 = vst.msk [vmem:[#allocation3 + $0x10] sm:$0xff] %vm1145_vm1, %v1136_v37 }
 0x3ad   : > { %v1169_v39 = vpop.permute.xlu1 %1168 }
 0x3ae   : > { %v1018_v33 = vpop.permute.xlu0 %1017  ;;  %1180 = vst.msk [vmem:[#allocation3 + $0x10] sm:$0xff] %vm1178_vm2, %v1169_v39 }
 0x3af   : > { %1213 = vst.msk [vmem:[#allocation3 + $0x10] sm:$0xff] %vm1211_vm3, %v1202_v38 }
 0x3b1   : > { %v985_v40 = vpop.permute.xlu1 %984 }
 0x3b2   : > { %v1051_v41 = vpop.permute.xlu0 %1050  ;;  %995 = vst.msk [vmem:[#allocation3 + $0x20] sm:$0xff] %vm992_vm11, %v985_v40  ;;  %v3444_v40 = vld [vmem:[%s5002_s8] ss:$0 sm:$0xff] }
 0x3b3   : > { %1028 = vst.msk [vmem:[#allocation3 + $0x20] sm:$0xff] %vm1025_vm12, %v1018_v33  ;;  %v3826_v33 = vld [vmem:[%s4997_s3 + $0x8] sm:$0xff]  }
 0x3b4   : > { %1061 = vst.msk [vmem:[#allocation3 + $0x20] sm:$0xff] %vm1058_vm13, %v1051_v41 }
 0x3b5   : > { %1082 = vst.msk [vmem:[#allocation3 + $0x20] sm:$0xff] %vm1079_vm14, %v1072_v35  ;;  %v1053_v42 = vpop.permute.xlu1 %1052 }
 0x3b6   : > { %v1105_v43 = vpop.permute.xlu0 %1104  ;;  %v1217_v44 = vld [vmem:[#allocation3 + $0x10] sm:$0xff] }
 0x3b7   : > { %1115 = vst.msk [vmem:[#allocation3 + $0x20] sm:$0xff] %vm1112_vm15, %v1105_v43  ;;  %3631 = vmatmul.mubr.msk.bf16.vlgmr.msra.gmra.mrb[8].mxu1 %vm1241_vm4, %v1217_v44 }
 0x3b8   : > { %3639 = vmatpush3.bf16.msra.mxu1 %v1356_v58 }
 0x3b9   : > { %v1107_v45 = vpop.permute.xlu1 %1106  ;;  %3648 = vmatprep.subr.bf16.mxu1 %v3826_v33 }
 0x3ba   : > { %v1138_v46 = vpop.permute.xlu0 %1137 }
 0x3bb   : > { %1148 = vst.msk [vmem:[#allocation3 + $0x20] sm:$0xff] %vm1145_vm1, %v1138_v46 }
 0x3bd   : > { %v1140_v47 = vpop.permute.xlu1 %1139 }
 0x3be   : > { %v1171_v48 = vpop.permute.xlu0 %1170 }
 0x3bf   : > { %1181 = vst.msk [vmem:[#allocation3 + $0x20] sm:$0xff] %vm1178_vm2, %v1171_v48  ;;  %v1426_v48 = vmul.f32 0.484375, %v820_v9 }
 0x3c1   : > { %v987_v49 = vpop.permute.xlu1 %986 }
 0x3c2   : > { %v1204_v50 = vpop.permute.xlu0 %1203  ;;  %996 = vst.msk [vmem:[#allocation3 + $0x30] sm:$0xff] %vm992_vm11, %v987_v49 }
 0x3c3   : > { %1214 = vst.msk [vmem:[#allocation3 + $0x20] sm:$0xff] %vm1211_vm3, %v1204_v50 }
 0x3c5   : > { %v1020_v51 = vpop.permute.xlu1 %1019 }
 0x3c6   : > { %1029 = vst.msk [vmem:[#allocation3 + $0x30] sm:$0xff] %vm1025_vm12, %v1020_v51 }
 0x3c7   : > { %1062 = vst.msk [vmem:[#allocation3 + $0x30] sm:$0xff] %vm1058_vm13, %v1053_v42  ;;  %v1425_v42 = vmul.f32 0.484375, %v819_v8 }
 0x3c8   : > { %1083 = vst.msk [vmem:[#allocation3 + $0x30] sm:$0xff] %vm1079_vm14, %v1074_v34 }
 0x3c9   : > { %1116 = vst.msk [vmem:[#allocation3 + $0x30] sm:$0xff] %vm1112_vm15, %v1107_v45  ;;  %v1173_v52 = vpop.permute.xlu1 %1172  ;;  %v1423_v45 = vmul.f32 0.484375, %v817_v63 }
 0x3ca   : > { %v1218_v53 = vld [vmem:[#allocation3 + $0x20] sm:$0xff]  ;;  %1149 = vst.msk [vmem:[#allocation3 + $0x30] sm:$0xff] %vm1145_vm1, %v1140_v47 }
 0x3cb   : > { %3634 = vmatprep.mubr.msk.bf16.mxu1 %vm1241_vm4, %v1218_v53  ;;  %1182 = vst.msk [vmem:[#allocation3 + $0x30] sm:$0xff] %vm1178_vm2, %v1173_v52  ;;  %v1424_v52 = vmul.f32 0.484375, %v818_v0 }
 0x3cd   : > { %v1206_v54 = vpop.permute.xlu1 %1205 }
 0x3ce   : > { %1215 = vst.msk [vmem:[#allocation3 + $0x30] sm:$0xff] %vm1211_vm3, %v1206_v54 }
 0x3d5   : > { %v1219_v55 = vld [vmem:[#allocation3 + $0x30] sm:$0xff] }
 0x3d6   : > { %3635 = vmatmul.mubr.msk.bf16.gmra.mrb[12].mxu1 %vm1241_vm4, %v1219_v55 }
 0x48a   : > { %v3632_v10 = vpop.f32.mrb[8].mxu1 }
 0x48b   : > { %v1301_v1 = vadd.f32 %v3632_v10, %v3436_v62  ;;  %v1292_v2 = vpop.f32.mrb[9].mxu1  ;;  %v1427_v10 = vmul.f32 0.484375, %v821_v21 }
 0x48c   : > { %v1293_v11 = vadd.f32 %v3436_v62, %v1292_v2  ;;  %v3633_v4 = vpop.f32.mrb[10].mxu1 }
 0x48d   : > { %v1304_v5 = vadd.f32 %v3633_v4, %v3436_v62  ;;  %v1295_v7 = vpop.f32.mrb[11].mxu1  ;;  %v1325_v18 = vmax.f32 %v1301_v1, 0.0 }
 0x48e   : > { %v1296_v12 = vadd.f32 %v3436_v62, %v1295_v7  ;;  %v1323_v13 = vmax.f32 %v1293_v11, 0.0  ;;  %v1430_v11 = vmul.f32 0.484375, %v824_v31 }
 0x48f   : > { %v1326_v61 = vmax.f32 %v1304_v5, 0.0 }
 0x490   : > { %v1324_v16 = vmax.f32 %v1296_v12, 0.0  ;;  %v1428_v12 = vmul.f32 0.484375, %v822_v22 }
 0x491   : > { %v1334_v17 = vpack.c.bf16 %v1326_v61, %v1325_v18 }
 0x492   : > { %v1333_v20 = vpack.c.bf16 %v1324_v16, %v1323_v13  ;;  %v4443_v13 = vld [vmem:[%s4998_s4 + $0x1] ss:$0 sm:$0xff] }
 0x494   : > { %3640 = vmatprep.mubr.msk.bf16.mxu1 %vm939_vm9, %v1333_v20 }
 0x495   : > { %3641 = vmatmul.mubr.msk.bf16.vlgmr.msra.gmra.mrb[16].mxu1 %vm939_vm9, %v1334_v17 }
 0x496   : > { %3649 = vmatpush3.bf16.msra.mxu1 %v3826_v33 }
 0x4a9   : > { %v3636_v23 = vpop.f32.mrb[12].mxu1 }
 0x4aa   : > { %v1317_v15 = vadd.f32 %v3636_v23, %v3436_v62  ;;  %v1308_v60 = vpop.f32.mrb[13].mxu1 }
 0x4ab   : > { %v1309_v24 = vadd.f32 %v3436_v62, %v1308_v60  ;;  %v3637_v26 = vpop.f32.mrb[14].mxu1 }
 0x4ac   : > { %v1320_v27 = vadd.f32 %v3637_v26, %v3436_v62  ;;  %v1311_v29 = vpop.f32.mrb[15].mxu1  ;;  %v1329_v34 = vmax.f32 %v1317_v15, 0.0 }
 0x4ad   : > { %v1312_v32 = vadd.f32 %v3436_v62, %v1311_v29  ;;  %v1327_v36 = vmax.f32 %v1309_v24, 0.0 }
 0x4ae   : > { %v1330_v35 = vmax.f32 %v1320_v27, 0.0 }
 0x4af   : > { %v1328_v37 = vmax.f32 %v1312_v32, 0.0 }
 0x4b0   : > { %v1336_v38 = vpack.c.bf16 %v1330_v35, %v1329_v34 }
 0x4b1   : > { %v1335_v39 = vpack.c.bf16 %v1328_v37, %v1327_v36  ;;  %v4455_v37 = vld [vmem:[#allocation2 + $0x1] sm:$0xff] }
 0x4b3   : > { %3644 = vmatprep.mubr.msk.bf16.mxu1 %vm939_vm9, %v1335_v39 }
 0x4b4   : > { %3645 = vmatmul.mubr.msk.bf16.gmra.mrb[20].mxu1 %vm939_vm9, %v1336_v38  ;;  %v4457_v38 = vld [vmem:[#allocation2] sm:$0xff] }
 0x568   : > { %v3642_v41 = vpop.f32.mrb[16].mxu1 }
 0x569   : > { %v1401_v43 = vadd.f32 %v3642_v41, %v3444_v40  ;;  %v1392_v44 = vpop.f32.mrb[17].mxu1 }
 0x56a   : > { %v1393_v46 = vadd.f32 %v3444_v40, %v1392_v44  ;;  %v3643_v47 = vpop.f32.mrb[18].mxu1 }
 0x56b   : > { %v4386_v49 = vadd.f32 %v1425_v42, %v1401_v43  ;;  %v1404_v50 = vadd.f32 %v3643_v47, %v3444_v40  ;;  %v1395_v51 = vpop.f32.mrb[19].mxu1 }
 0x56c   : > { %v4390_v53 = vadd.f32 %v1423_v45, %v1393_v46  ;;  %v1396_v3 = vadd.f32 %v3444_v40, %v1395_v51  ;;  %v4461_v45 = vld [vmem:[#allocation2 + $0x2] sm:$0xff] }
 0x56d   : > { %v4392_v8 = vadd.f32 %v1426_v48, %v1404_v50  ;;  %v1441_v56 = vmax.f32 %v4386_v49, 0.0 }
 0x56e   : > { %v4394_v54 = vadd.f32 %v1424_v52, %v1396_v3  ;;  %v1439_v6 = vmax.f32 %v4390_v53, 0.0 }
 0x56f   : > { %v1442_v63 = vmax.f32 %v4392_v8, 0.0 }
 0x570   : > { %v1440_v9 = vmax.f32 %v4394_v54, 0.0 }
 0x571   : > { %v1453_v59 = vpack.c.bf16 %v1442_v63, %v1441_v56 }
 0x572   : > { %v1452_v0 = vpack.c.bf16 %v1440_v9, %v1439_v6  ;;  %v2041_v49 = vmul.f32 0.484375, %v1440_v9 }
 0x574   : > { %3650 = vmatprep.mubr.msk.bf16.mxu1 %vm332_vm0, %v1452_v0 }
 0x575   : > { %3651 = vmatmul.mubr.msk.bf16.vlgmr.msra.gmra.mrb[24].mxu1 %vm332_vm0, %v1453_v59 }
 0x587   : > { %v3646_v55 = vpop.f32.mrb[20].mxu1 }
 0x588   : > { %v1417_v58 = vadd.f32 %v3646_v55, %v3444_v40  ;;  %v1408_v62 = vpop.f32.mrb[21].mxu1 }
 0x589   : > { %v1409_v1 = vadd.f32 %v3444_v40, %v1408_v62  ;;  %v3647_v2 = vpop.f32.mrb[22].mxu1  ;;  %v3827_v62 = vld [vmem:[%s4999_s5 + $0x14] sm:$0xff]  }
 0x58a   : > { %v4416_v4 = vadd.f32 %v1429_v57, %v1417_v58  ;;  %v1420_v5 = vadd.f32 %v3647_v2, %v3444_v40  ;;  %v1411_v7 = vpop.f32.mrb[23].mxu1  ;;  %3658 = vmatprep.subr.bf16.mxu0 %v3827_v62 }
 0x58b   : > { %v4420_v18 = vadd.f32 %v1427_v10, %v1409_v1  ;;  %v1412_v25 = vadd.f32 %v3444_v40, %v1411_v7  ;;  %3659 = vmatpush3.bf16.msra.mxu0 %v3827_v62  ;;  %v4517_v62 = vld [vmem:[#allocation2 + $0x91] sm:$0xff] }
 0x58c   : > { %v4422_v30 = vadd.f32 %v1430_v11, %v1420_v5  ;;  %v1445_v14 = vmax.f32 %v4416_v4, 0.0 }
 0x58d   : > { %v4424_v61 = vadd.f32 %v1428_v12, %v1412_v25  ;;  %v1443_v28 = vmax.f32 %v4420_v18, 0.0 }
 0x58e   : > { %v1446_v21 = vmax.f32 %v4422_v30, 0.0 }
 0x58f   : > { %v1444_v31 = vmax.f32 %v4424_v61, 0.0 }
 0x590   : > { %v1455_v19 = vpack.c.bf16 %v1446_v21, %v1445_v14 }
 0x591   : > { %v1454_v22 = vpack.c.bf16 %v1444_v31, %v1443_v28  ;;  %v2045_v4 = vmul.f32 0.484375, %v1444_v31  ;;  %v3482_v31 = vld [vmem:[%s4998_s4 + $0x2] ss:$0 sm:$0xff] }
 0x593   : > { %3654 = vmatprep.mubr.msk.bf16.mxu1 %vm332_vm0, %v1454_v22 }
 0x594   : > { %3655 = vmatmul.mubr.msk.bf16.gmra.mrb[28].mxu1 %vm332_vm0, %v1455_v19 }
 0x648   : > { %v3652_v16 = vpop.f32.mrb[24].mxu1 }
 0x649   : > { %v1523_v17 = vadd.f32 %v3652_v16, %v4443_v13  ;;  %v1514_v20 = vpop.f32.mrb[25].mxu1 }
 0x64a   : > { %v1515_v23 = vadd.f32 %v4443_v13, %v1514_v20  ;;  %v3653_v15 = vpop.f32.mrb[26].mxu1 }
 0x64b   : > { %v1547_v60 = vmax.f32 %v1523_v17, 0.0  ;;  %v1526_v24 = vadd.f32 %v3653_v15, %v4443_v13  ;;  %v1517_v26 = vpop.f32.mrb[27].mxu1 }
 0x64c   : > { %v1545_v27 = vmax.f32 %v1515_v23, 0.0  ;;  %v1518_v29 = vadd.f32 %v4443_v13, %v1517_v26 }
 0x64d   : > { %1567 = vst.msk [vmem:[#allocation2 + $0x31] sm:$0xff] %vm939_vm9, %v1547_v60  ;;  %v1548_v32 = vmax.f32 %v1526_v24, 0.0 }
 0x64e   : > { %1565 = vst.msk [vmem:[#allocation2 + $0x11] sm:$0xff] %vm939_vm9, %v1545_v27  ;;  %v1546_v34 = vmax.f32 %v1518_v29, 0.0 }
 0x64f   : > { %v1562_v35 = vpack.c.bf16 %v1548_v32, %v1547_v60  ;;  %1568 = vst.msk [vmem:[#allocation2 + $0x41] sm:$0xff] %vm939_vm9, %v1548_v32 }
 0x650   : > { %v1561_v36 = vpack.c.bf16 %v1546_v34, %v1545_v27  ;;  %1566 = vst.msk [vmem:[#allocation2 + $0x21] sm:$0xff] %vm939_vm9, %v1546_v34 }
 0x651   : > { %1691 = vrot.lane.b32.xlu1 %v1562_v35, %s3904_s24  ;;  %v3828_v35 = vld [vmem:[%s4999_s5 + $0x1c] sm:$0xff]  }
 0x652   : > { %1689 = vrot.lane.b32.xlu0 %v1561_v36, %s3904_s24  ;;  %v3829_v36 = vld [vmem:[%s4999_s5 + $0x24] ss:$0 sps:$4 sm:$0x33]   ;;  %3660 = vmatprep.subr.bf16.mxu0 %v3828_v35 }
 0x653   : > { %3661 = vmatpush3.bf16.msra.mxu0 %v3828_v35 }
 0x654   : > { %v1655_v41 = vld [vmem:[#allocation2 + $0x30] sm:$0xff]  ;;  %3752 = vmatprep.subr.msk.bf16.mxu0 %vm1254_vm10, %v3829_v36 }
 0x655   : > { %v1590_v39 = vld [vmem:[#allocation2 + $0x11] sm:$0xff] }
 0x656   : > { %v1653_v33 = vld [vmem:[#allocation2 + $0x10] sm:$0xff]  ;;  %v1597_v40 = vpack.c.bf16 %v1590_v39, %v4455_v37  ;;  %v1656_v42 = vld [vmem:[#allocation2 + $0x40] sm:$0xff] }
 0x657   : > { %v1581_v43 = vpack.c.bf16 %v1653_v33, %v4457_v38  ;;  %v1662_v44 = vpack.c.bf16 %v1656_v42, %v1655_v41  ;;  %v1622_v46 = vld [vmem:[#allocation2 + $0x12] sm:$0xff]  ;;  %v1654_v47 = vld [vmem:[#allocation2 + $0x20] sm:$0xff] }
 0x658   : > { %1605 = vrot.lane.b32.xlu0 %v1597_v40, %s3911_s23  ;;  %v1708_v48 = vld [vmem:[#allocation2 + $0x42] sm:$0xff]  ;;  %v1745_v50 = vpack.c.bf16 %v1655_v41, %v1654_v47  ;;  %v1629_v51 = vpack.c.bf16 %v1622_v46, %v4461_v45  ;;  %v1707_v52 = vld [vmem:[#allocation2 + $0x32] sm:$0xff]  ;;  %v1661_v59 = vpack.c.bf16 %v1654_v47, %v1653_v33  ;;  %v1871_v33 = vsel %vm1254_vm10, %v3829_v36, 0 }
 0x659   : > { %1585 = vst.msk [vmem:[#allocation3] sm:$0xff] %vm939_vm9, %v1581_v43  ;;  %1671 = vrot.lane.b32.xlu1 %v1662_v44, %s3912_s25  ;;  %v1714_v3 = vpack.c.bf16 %v1708_v48, %v1707_v52  ;;  %v1706_v0 = vld [vmem:[#allocation2 + $0x22] sm:$0xff]  ;;  %v1770_v5 = vld [vmem:[#allocation2 + $0x31] sm:$0xff]  ;;  %3663 = vmatpush3.bf16.msra.mxu0 %v1871_v33 }
 0x65a   : > { %1586 = vst.msk [vmem:[#allocation3 + $0x10] sm:$0xff] %vm939_vm9, %v1745_v50  ;;  %v1713_v55 = vpack.c.bf16 %v1706_v0, %v1622_v46  ;;  %v1769_v58 = vld [vmem:[#allocation2 + $0x21] sm:$0xff]  ;;  %v1809_v15 = vpack.c.bf16 %v1707_v52, %v1706_v0  ;;  %v4509_v0 = vld [vmem:[#allocation2 + $0x90] sm:$0xff] }
 0x65b   : > { %v1777_v19 = vpack.c.bf16 %v1770_v5, %v1769_v58  ;;  %v1771_v40 = vld [vmem:[#allocation2 + $0x41] sm:$0xff] }
 0x65c   : > { %1637 = vrot.lane.b32.xlu0 %v1629_v51, %s3913_s26 }
 0x65d   : > { %1723 = vrot.lane.b32.xlu1 %v1714_v3, %s3914_s29 }
 0x660   : > { %1669 = vrot.lane.b32.xlu0 %v1661_v59, %s3912_s25 }
 0x664   : > { %1721 = vrot.lane.b32.xlu0 %v1713_v55, %s3914_s29 }
 0x667   : > { %v3656_v57 = vpop.f32.mrb[28].mxu1 }
 0x668   : > { %v1539_v10 = vadd.f32 %v3656_v57, %v4443_v13  ;;  %1753 = vrot.lane.b32.xlu0 %v1745_v50, %s3915_s28  ;;  %v1530_v1 = vpop.f32.mrb[29].mxu1 }
 0x669   : > { %v1531_v2 = vadd.f32 %v4443_v13, %v1530_v1  ;;  %v3657_v11 = vpop.f32.mrb[30].mxu1  ;;  %v4521_v1 = vld [vmem:[#allocation2 + $0x92] sm:$0xff] }
 0x66a   : > { %v1551_v7 = vmax.f32 %v1539_v10, 0.0  ;;  %v1542_v12 = vadd.f32 %v3657_v11, %v4443_v13  ;;  %v1533_v25 = vpop.f32.mrb[31].mxu1 }
 0x66b   : > { %v1549_v22 = vmax.f32 %v1531_v2, 0.0  ;;  %v1534_v16 = vadd.f32 %v4443_v13, %v1533_v25 }
 0x66c   : > { %1571 = vst.msk [vmem:[#allocation2 + $0x71] sm:$0xff] %vm939_vm9, %v1551_v7  ;;  %v1552_v17 = vmax.f32 %v1542_v12, 0.0  ;;  %1785 = vrot.lane.b32.xlu0 %v1777_v19, %s3916_s14 }
 0x66d   : > { %1569 = vst.msk [vmem:[#allocation2 + $0x51] sm:$0xff] %vm939_vm9, %v1549_v22  ;;  %v1550_v20 = vmax.f32 %v1534_v16, 0.0 }
 0x66e   : > { %v1564_v23 = vpack.c.bf16 %v1552_v17, %v1551_v7  ;;  %1572 = vst.msk [vmem:[#allocation2 + $0x81] sm:$0xff] %vm939_vm9, %v1552_v17 }
 0x66f   : > { %v1563_v60 = vpack.c.bf16 %v1550_v20, %v1549_v22  ;;  %1570 = vst.msk [vmem:[#allocation2 + $0x61] sm:$0xff] %vm939_vm9, %v1550_v20 }
 0x670   : > { %1817 = vrot.lane.b32.xlu0 %v1809_v15, %s3905_s27  ;;  %1695 = vrot.lane.b32.xlu1 %v1564_v23, %s3904_s24 }
 0x673   : > { %v1659_v32 = vld [vmem:[#allocation2 + $0x70] sm:$0xff] }
 0x674   : > { %1607 = vrot.lane.b32.xlu1 %v1777_v19, %s3911_s23  ;;  %1693 = vrot.lane.b32.xlu0 %v1563_v60, %s3904_s24  ;;  %v1804_v13 = vld [vmem:[#allocation2 + $0x52] sm:$0xff] }
 0x675   : > { %v1740_v24 = vld [vmem:[#allocation2 + $0x50] sm:$0xff]  ;;  %v1810_v26 = vpack.c.bf16 %v1804_v13, %v1708_v48  ;;  %v1660_v46 = vld [vmem:[#allocation2 + $0x80] sm:$0xff] }
 0x676   : > { %v1746_v27 = vpack.c.bf16 %v1740_v24, %v1656_v42  ;;  %v1658_v29 = vld [vmem:[#allocation2 + $0x60] sm:$0xff]  ;;  %v1772_v39 = vld [vmem:[#allocation2 + $0x51] sm:$0xff]  ;;  %v1664_v47 = vpack.c.bf16 %v1660_v46, %v1659_v32  ;;  %v1748_v55 = vpack.c.bf16 %v4509_v0, %v1660_v46 }
 0x677   : > { %v1747_v34 = vpack.c.bf16 %v1659_v32, %v1658_v29  ;;  %v1778_v41 = vpack.c.bf16 %v1772_v39, %v1771_v40  ;;  %v1663_v42 = vpack.c.bf16 %v1658_v29, %v1740_v24  ;;  %v1710_v43 = vld [vmem:[#allocation2 + $0x62] sm:$0xff]  ;;  %v1711_v51 = vld [vmem:[#allocation2 + $0x72] sm:$0xff] }
 0x678   : > { %1587 = vst.msk [vmem:[#allocation3 + $0x20] sm:$0xff] %vm939_vm9, %v1746_v27  ;;  %1639 = vrot.lane.b32.xlu1 %v1809_v15, %s3913_s26  ;;  %1819 = vrot.lane.b32.xlu0 %v1810_v26, %s3905_s27  ;;  %v1715_v44 = vpack.c.bf16 %v1710_v43, %v1804_v13  ;;  %v1712_v48 = vld [vmem:[#allocation2 + $0x82] sm:$0xff]  ;;  %v1774_v52 = vld [vmem:[#allocation2 + $0x71] sm:$0xff]  ;;  %v1811_v57 = vpack.c.bf16 %v1711_v51, %v1710_v43 }
 0x679   : > { %1588 = vst.msk [vmem:[#allocation3 + $0x30] sm:$0xff] %vm939_vm9, %v1747_v34  ;;  %v1773_v50 = vld [vmem:[#allocation2 + $0x61] sm:$0xff]  ;;  %v1716_v3 = vpack.c.bf16 %v1712_v48, %v1711_v51  ;;  %v1812_v2 = vpack.c.bf16 %v4521_v1, %v1712_v48 }
 0x67a   : > { %v1779_v59 = vpack.c.bf16 %v1774_v52, %v1773_v50  ;;  %v1775_v58 = vld [vmem:[#allocation2 + $0x81] sm:$0xff] }
 0x67b   : > { %v1780_v10 = vpack.c.bf16 %v4517_v62, %v1775_v58 }
 0x67c   : > { %1755 = vrot.lane.b32.xlu1 %v1746_v27, %s3915_s28  ;;  %1641 = vrot.lane.b32.xlu0 %v1810_v26, %s3913_s26 }
 0x680   : > { %1787 = vrot.lane.b32.xlu1 %v1778_v41, %s3916_s14  ;;  %1673 = vrot.lane.b32.xlu0 %v1663_v42, %s3912_s25 }
 0x684   : > { %1609 = vrot.lane.b32.xlu1 %v1778_v41, %s3911_s23  ;;  %1725 = vrot.lane.b32.xlu0 %v1715_v44, %s3914_s29 }
 0x688   : > { %1675 = vrot.lane.b32.xlu1 %v1664_v47, %s3912_s25  ;;  %1757 = vrot.lane.b32.xlu0 %v1747_v34, %s3915_s28 }
 0x68c   : > { %1727 = vrot.lane.b32.xlu1 %v1716_v3, %s3914_s29  ;;  %1789 = vrot.lane.b32.xlu0 %v1779_v59, %s3916_s14 }
 0x690   : > { %1759 = vrot.lane.b32.xlu1 %v1748_v55, %s3915_s28  ;;  %1821 = vrot.lane.b32.xlu0 %v1811_v57, %s3905_s27 }
 0x694   : > { %1611 = vrot.lane.b32.xlu1 %v1779_v59, %s3911_s23  ;;  %v3472_v59 = vld [vmem:[%s5001_s7 + $0x2] sm:$0x3] }
 0x695   : > { %3753 = vmatprep.subr.msk.bf16.mxu1 %vm1254_vm10, %v3472_v59  ;;  %v1973_v55 = vsel %vm1254_vm10, %v3472_v59, 0  ;;  %v2043_v59 = vmul.f32 0.484375, %v1442_v63 }
 0x696   : > { %3673 = vmatpush3.bf16.msra.mxu1 %v1973_v55 }
 0x698   : > { %1643 = vrot.lane.b32.xlu1 %v1811_v57, %s3913_s26  ;;  %v3464_v57 = vld [vmem:[%s5000_s6 + $0x1] ss:$0 sm:$0xff] }
 0x69c   : > { %1791 = vrot.lane.b32.xlu1 %v1780_v10, %s3916_s14 }
 0x6a0   : > { %1823 = vrot.lane.b32.xlu1 %v1812_v2, %s3905_s27 }
 0x6c3   : > { %v1692_v25 = vpop.permute.xlu1 %1691 }
 0x6c4   : > { %v1690_v11 = vpop.permute.xlu0 %1689 }
 0x6ca   : > { %v1606_v5 = vpop.permute.xlu0 %1605 }
 0x6cb   : > { %1617 = vst.msk [vmem:[#allocation3] sm:$0xff] %vm992_vm11, %v1606_v5  ;;  %v1672_v22 = vpop.permute.xlu1 %1671 }
 0x6ce   : > { %v1638_v7 = vpop.permute.xlu0 %1637 }
 0x6cf   : > { %1649 = vst.msk [vmem:[#allocation3] sm:$0xff] %vm1025_vm12, %v1638_v7  ;;  %v1724_v17 = vpop.permute.xlu1 %1723 }
 0x6d2   : > { %v1670_v12 = vpop.permute.xlu0 %1669 }
 0x6d3   : > { %1681 = vst.msk [vmem:[#allocation3] sm:$0xff] %vm1058_vm13, %v1670_v12 }
 0x6d4   : > { %1701 = vst.msk [vmem:[#allocation3] sm:$0xff] %vm1079_vm14, %v1690_v11 }
 0x6d6   : > { %v1722_v19 = vpop.permute.xlu0 %1721 }
 0x6d7   : > { %1733 = vst.msk [vmem:[#allocation3] sm:$0xff] %vm1112_vm15, %v1722_v19 }
 0x6da   : > { %v1754_v16 = vpop.permute.xlu0 %1753 }
 0x6db   : > { %1765 = vst.msk [vmem:[#allocation3] sm:$0xff] %vm1145_vm1, %v1754_v16 }
 0x6de   : > { %v1786_v20 = vpop.permute.xlu0 %1785 }
 0x6df   : > { %1797 = vst.msk [vmem:[#allocation3] sm:$0xff] %vm1178_vm2, %v1786_v20 }
 0x6e2   : > { %v1818_v23 = vpop.permute.xlu0 %1817  ;;  %v1696_v15 = vpop.permute.xlu1 %1695 }
 0x6e3   : > { %1829 = vst.msk [vmem:[#allocation3] sm:$0xff] %vm1211_vm3, %v1818_v23 }
 0x6e6   : > { %v1608_v60 = vpop.permute.xlu1 %1607  ;;  %v1694_v13 = vpop.permute.xlu0 %1693 }
 0x6e7   : > { %1618 = vst.msk [vmem:[#allocation3 + $0x10] sm:$0xff] %vm992_vm11, %v1608_v60 }
 0x6ea   : > { %v1640_v24 = vpop.permute.xlu1 %1639  ;;  %v1820_v26 = vpop.permute.xlu0 %1819  ;;  %v1833_v27 = vld [vmem:[#allocation3] sm:$0xff] }
 0x6eb   : > { %1650 = vst.msk [vmem:[#allocation3 + $0x10] sm:$0xff] %vm1025_vm12, %v1640_v24  ;;  %3664 = vmatprep.mubr.msk.bf16.mxu0 %vm1241_vm4, %v1833_v27 }
 0x6ec   : > { %1682 = vst.msk [vmem:[#allocation3 + $0x10] sm:$0xff] %vm1058_vm13, %v1672_v22 }
 0x6ed   : > { %1702 = vst.msk [vmem:[#allocation3 + $0x10] sm:$0xff] %vm1079_vm14, %v1692_v25 }
 0x6ee   : > { %1734 = vst.msk [vmem:[#allocation3 + $0x10] sm:$0xff] %vm1112_vm15, %v1724_v17  ;;  %v1756_v29 = vpop.permute.xlu1 %1755  ;;  %v1642_v32 = vpop.permute.xlu0 %1641 }
 0x6ef   : > { %1766 = vst.msk [vmem:[#allocation3 + $0x10] sm:$0xff] %vm1145_vm1, %v1756_v29 }
 0x6f2   : > { %v1788_v34 = vpop.permute.xlu1 %1787  ;;  %v1674_v35 = vpop.permute.xlu0 %1673 }
 0x6f3   : > { %1798 = vst.msk [vmem:[#allocation3 + $0x10] sm:$0xff] %vm1178_vm2, %v1788_v34 }
 0x6f4   : > { %1830 = vst.msk [vmem:[#allocation3 + $0x10] sm:$0xff] %vm1211_vm3, %v1820_v26 }
 0x6f6   : > { %v1610_v36 = vpop.permute.xlu1 %1609  ;;  %v1726_v39 = vpop.permute.xlu0 %1725 }
 0x6f7   : > { %1619 = vst.msk [vmem:[#allocation3 + $0x20] sm:$0xff] %vm992_vm11, %v1610_v36 }
 0x6f8   : > { %1651 = vst.msk [vmem:[#allocation3 + $0x20] sm:$0xff] %vm1025_vm12, %v1642_v32 }
 0x6f9   : > { %1683 = vst.msk [vmem:[#allocation3 + $0x20] sm:$0xff] %vm1058_vm13, %v1674_v35 }
 0x6fa   : > { %1703 = vst.msk [vmem:[#allocation3 + $0x20] sm:$0xff] %vm1079_vm14, %v1694_v13  ;;  %v1676_v33 = vpop.permute.xlu1 %1675  ;;  %v1758_v40 = vpop.permute.xlu0 %1757 }
 0x6fb   : > { %1735 = vst.msk [vmem:[#allocation3 + $0x20] sm:$0xff] %vm1112_vm15, %v1726_v39  ;;  %v1834_v41 = vld [vmem:[#allocation3 + $0x10] sm:$0xff] }
 0x6fc   : > { %1767 = vst.msk [vmem:[#allocation3 + $0x20] sm:$0xff] %vm1145_vm1, %v1758_v40  ;;  %3665 = vmatmul.mubr.msk.bf16.vlgmr.msra.gmra.mrb[16].mxu0 %vm1241_vm4, %v1834_v41  ;;  %v3830_v41 = vld [vmem:[%s4997_s3 + $0x10] sm:$0xff]  }
 0x6fd   : > { %3682 = vmatprep.subr.bf16.mxu0 %v3830_v41 }
 0x6fe   : > { %v1728_v42 = vpop.permute.xlu1 %1727  ;;  %v1790_v43 = vpop.permute.xlu0 %1789  ;;  %3683 = vmatpush3.bf16.msra.mxu0 %v3830_v41 }
 0x6ff   : > { %1799 = vst.msk [vmem:[#allocation3 + $0x20] sm:$0xff] %vm1178_vm2, %v1790_v43 }
 0x702   : > { %v1760_v44 = vpop.permute.xlu1 %1759  ;;  %v1822_v46 = vpop.permute.xlu0 %1821 }
 0x703   : > { %1831 = vst.msk [vmem:[#allocation3 + $0x20] sm:$0xff] %vm1211_vm3, %v1822_v46  ;;  %v2042_v46 = vmul.f32 0.484375, %v1441_v56 }
 0x706   : > { %v1612_v47 = vpop.permute.xlu1 %1611 }
 0x707   : > { %1620 = vst.msk [vmem:[#allocation3 + $0x30] sm:$0xff] %vm992_vm11, %v1612_v47 }
 0x70a   : > { %v1644_v48 = vpop.permute.xlu1 %1643  ;;  %v1835_v50 = vld [vmem:[#allocation3 + $0x20] sm:$0xff] }
 0x70b   : > { %1652 = vst.msk [vmem:[#allocation3 + $0x30] sm:$0xff] %vm1025_vm12, %v1644_v48  ;;  %3668 = vmatprep.mubr.msk.bf16.mxu0 %vm1241_vm4, %v1835_v50  ;;  %v2040_v50 = vmul.f32 0.484375, %v1439_v6 }
 0x70c   : > { %1684 = vst.msk [vmem:[#allocation3 + $0x30] sm:$0xff] %vm1058_vm13, %v1676_v33 }
 0x70d   : > { %1704 = vst.msk [vmem:[#allocation3 + $0x30] sm:$0xff] %vm1079_vm14, %v1696_v15 }
 0x70e   : > { %1736 = vst.msk [vmem:[#allocation3 + $0x30] sm:$0xff] %vm1112_vm15, %v1728_v42  ;;  %v1792_v51 = vpop.permute.xlu1 %1791  ;;  %v3474_v42 = vld [vmem:[%s5002_s8 + $0x1] ss:$0 sm:$0xff] }
 0x70f   : > { %1768 = vst.msk [vmem:[#allocation3 + $0x30] sm:$0xff] %vm1145_vm1, %v1760_v44 }
 0x710   : > { %1800 = vst.msk [vmem:[#allocation3 + $0x30] sm:$0xff] %vm1178_vm2, %v1792_v51 }
 0x712   : > { %v1824_v52 = vpop.permute.xlu1 %1823 }
 0x713   : > { %1832 = vst.msk [vmem:[#allocation3 + $0x30] sm:$0xff] %vm1211_vm3, %v1824_v52 }
 0x71a   : > { %v1836_v3 = vld [vmem:[#allocation3 + $0x30] sm:$0xff] }
 0x71b   : > { %3669 = vmatmul.mubr.msk.bf16.gmra.mrb[20].mxu0 %vm1241_vm4, %v1836_v3 }
 0x7cf   : > { %v3666_v58 = vpop.f32.mrb[16].mxu0 }
 0x7d0   : > { %v1916_v10 = vadd.f32 %v3666_v58, %v3464_v57  ;;  %v1907_v2 = vpop.f32.mrb[17].mxu0 }
 0x7d1   : > { %v1908_v11 = vadd.f32 %v3464_v57, %v1907_v2  ;;  %v3667_v5 = vpop.f32.mrb[18].mxu0 }
 0x7d2   : > { %v1919_v7 = vadd.f32 %v3667_v5, %v3464_v57  ;;  %v1910_v12 = vpop.f32.mrb[19].mxu0  ;;  %v1940_v19 = vmax.f32 %v1916_v10, 0.0  ;;  %v2046_v5 = vmul.f32 0.484375, %v1445_v14 }
 0x7d3   : > { %v1911_v25 = vadd.f32 %v3464_v57, %v1910_v12  ;;  %v1938_v16 = vmax.f32 %v1908_v11, 0.0 }
 0x7d4   : > { %v1941_v22 = vmax.f32 %v1919_v7, 0.0 }
 0x7d5   : > { %v1939_v17 = vmax.f32 %v1911_v25, 0.0  ;;  %v2044_v25 = vmul.f32 0.484375, %v1443_v28 }
 0x7d6   : > { %v1951_v20 = vpack.c.bf16 %v1941_v22, %v1940_v19 }
 0x7d7   : > { %v1950_v23 = vpack.c.bf16 %v1939_v17, %v1938_v16  ;;  %v2047_v17 = vmul.f32 0.484375, %v1446_v21 }
 0x7d9   : > { %3674 = vmatprep.mubr.msk.bf16.mxu1 %vm939_vm9, %v1950_v23 }
 0x7da   : > { %3675 = vmatmul.mubr.msk.bf16.vlgmr.msra.gmra.mrb[32].mxu1 %vm939_vm9, %v1951_v20 }
 0x7ee   : > { %v3670_v15 = vpop.f32.mrb[20].mxu0 }
 0x7ef   : > { %v1932_v60 = vadd.f32 %v3670_v15, %v3464_v57  ;;  %v1923_v13 = vpop.f32.mrb[21].mxu0 }
 0x7f0   : > { %v1924_v24 = vadd.f32 %v3464_v57, %v1923_v13  ;;  %v3671_v26 = vpop.f32.mrb[22].mxu0 }
 0x7f1   : > { %v1935_v27 = vadd.f32 %v3671_v26, %v3464_v57  ;;  %v1926_v29 = vpop.f32.mrb[23].mxu0  ;;  %v1944_v34 = vmax.f32 %v1932_v60, 0.0 }
 0x7f2   : > { %v1927_v32 = vadd.f32 %v3464_v57, %v1926_v29  ;;  %v1942_v36 = vmax.f32 %v1924_v24, 0.0 }
 0x7f3   : > { %v1945_v35 = vmax.f32 %v1935_v27, 0.0 }
 0x7f4   : > { %v1943_v39 = vmax.f32 %v1927_v32, 0.0 }
 0x7f5   : > { %v1953_v33 = vpack.c.bf16 %v1945_v35, %v1944_v34 }
 0x7f6   : > { %v1952_v40 = vpack.c.bf16 %v1943_v39, %v1942_v36 }
 0x7f8   : > { %3678 = vmatprep.mubr.msk.bf16.mxu1 %vm939_vm9, %v1952_v40 }
 0x7f9   : > { %3679 = vmatmul.mubr.msk.bf16.gmra.mrb[36].mxu1 %vm939_vm9, %v1953_v33 }
 0x8ad   : > { %v3676_v43 = vpop.f32.mrb[32].mxu1 }
 0x8ae   : > { %v2018_v44 = vadd.f32 %v3676_v43, %v3474_v42  ;;  %v2009_v47 = vpop.f32.mrb[33].mxu1 }
 0x8af   : > { %v2010_v48 = vadd.f32 %v3474_v42, %v2009_v47  ;;  %v3677_v51 = vpop.f32.mrb[34].mxu1 }
 0x8b0   : > { %v4584_v52 = vadd.f32 %v2042_v46, %v2018_v44  ;;  %v2021_v3 = vadd.f32 %v3677_v51, %v3474_v42  ;;  %v2012_v55 = vpop.f32.mrb[35].mxu1 }
 0x8b1   : > { %v4588_v57 = vadd.f32 %v2040_v50, %v2010_v48  ;;  %v2013_v58 = vadd.f32 %v3474_v42, %v2012_v55 }
 0x8b2   : > { %v4592_v56 = vadd.f32 %v2043_v59, %v2021_v3  ;;  %v2058_v53 = vmax.f32 %v4584_v52, 0.0 }
 0x8b3   : > { %v4594_v10 = vadd.f32 %v2041_v49, %v2013_v58  ;;  %v2056_v2 = vmax.f32 %v4588_v57, 0.0 }
 0x8b4   : > { %v2059_v6 = vmax.f32 %v4592_v56, 0.0 }
 0x8b5   : > { %v2057_v8 = vmax.f32 %v4594_v10, 0.0 }
 0x8b6   : > { %v2070_v63 = vpack.c.bf16 %v2059_v6, %v2058_v53 }
 0x8b7   : > { %v2069_v54 = vpack.c.bf16 %v2057_v8, %v2056_v2  ;;  %v2658_v52 = vmul.f32 0.484375, %v2057_v8 }
 0x8b9   : > { %3684 = vmatprep.mubr.msk.bf16.mxu0 %vm332_vm0, %v2069_v54 }
 0x8ba   : > { %3685 = vmatmul.mubr.msk.bf16.vlgmr.msra.gmra.mrb[24].mxu0 %vm332_vm0, %v2070_v63 }
 0x8cc   : > { %v3680_v9 = vpop.f32.mrb[36].mxu1 }
 0x8cd   : > { %v2034_v11 = vadd.f32 %v3680_v9, %v3474_v42  ;;  %v2025_v7 = vpop.f32.mrb[37].mxu1 }
 0x8ce   : > { %v2026_v12 = vadd.f32 %v3474_v42, %v2025_v7  ;;  %v3681_v19 = vpop.f32.mrb[38].mxu1 }
 0x8cf   : > { %v4614_v22 = vadd.f32 %v2046_v5, %v2034_v11  ;;  %v2037_v16 = vadd.f32 %v3681_v19, %v3474_v42  ;;  %v2028_v20 = vpop.f32.mrb[39].mxu1 }
 0x8d0   : > { %v4618_v23 = vadd.f32 %v2044_v25, %v2026_v12  ;;  %v2029_v15 = vadd.f32 %v3474_v42, %v2028_v20 }
 0x8d1   : > { %v4622_v14 = vadd.f32 %v2047_v17, %v2037_v16  ;;  %v2062_v18 = vmax.f32 %v4614_v22, 0.0 }
 0x8d2   : > { %v4624_v60 = vadd.f32 %v2045_v4, %v2029_v15  ;;  %v2060_v13 = vmax.f32 %v4618_v23, 0.0 }
 0x8d3   : > { %v2063_v28 = vmax.f32 %v4622_v14, 0.0 }
 0x8d4   : > { %v2061_v30 = vmax.f32 %v4624_v60, 0.0 }
 0x8d5   : > { %v2072_v21 = vpack.c.bf16 %v2063_v28, %v2062_v18 }
 0x8d6   : > { %v2071_v61 = vpack.c.bf16 %v2061_v30, %v2060_v13  ;;  %v2662_v22 = vmul.f32 0.484375, %v2061_v30  ;;  %v3512_v30 = vld [vmem:[%s4998_s4 + $0x3] ss:$0 sm:$0xff] }
 0x8d8   : > { %3688 = vmatprep.mubr.msk.bf16.mxu0 %vm332_vm0, %v2071_v61 }
 0x8d9   : > { %3689 = vmatmul.mubr.msk.bf16.gmra.mrb[28].mxu0 %vm332_vm0, %v2072_v21 }
 0x98d   : > { %v3686_v24 = vpop.f32.mrb[24].mxu0 }
 0x98e   : > { %v2140_v26 = vadd.f32 %v3686_v24, %v3482_v31  ;;  %v2131_v27 = vpop.f32.mrb[25].mxu0 }
 0x98f   : > { %v2132_v29 = vadd.f32 %v3482_v31, %v2131_v27  ;;  %v3687_v32 = vpop.f32.mrb[26].mxu0 }
 0x990   : > { %v2164_v34 = vmax.f32 %v2140_v26, 0.0  ;;  %v2143_v35 = vadd.f32 %v3687_v32, %v3482_v31  ;;  %v2134_v36 = vpop.f32.mrb[27].mxu0 }
 0x991   : > { %v2162_v39 = vmax.f32 %v2132_v29, 0.0  ;;  %v2135_v33 = vadd.f32 %v3482_v31, %v2134_v36 }
 0x992   : > { %2184 = vst.msk [vmem:[#allocation2 + $0x31] sm:$0xff] %vm939_vm9, %v2164_v34  ;;  %v2165_v40 = vmax.f32 %v2143_v35, 0.0 }
 0x993   : > { %2182 = vst.msk [vmem:[#allocation2 + $0x11] sm:$0xff] %vm939_vm9, %v2162_v39  ;;  %v2163_v41 = vmax.f32 %v2135_v33, 0.0 }
 0x994   : > { %v2179_v42 = vpack.c.bf16 %v2165_v40, %v2164_v34  ;;  %2185 = vst.msk [vmem:[#allocation2 + $0x41] sm:$0xff] %vm939_vm9, %v2165_v40  ;;  %v3831_v34 = vld [vmem:[%s4999_s5 + $0x28] sm:$0xff]  }
 0x995   : > { %v2178_v43 = vpack.c.bf16 %v2163_v41, %v2162_v39  ;;  %2183 = vst.msk [vmem:[#allocation2 + $0x21] sm:$0xff] %vm939_vm9, %v2163_v41  ;;  %3692 = vmatprep.subr.bf16.mxu1 %v3831_v34 }
 0x996   : > { %2308 = vrot.lane.b32.xlu1 %v2179_v42, %s3904_s24  ;;  %3693 = vmatpush3.bf16.msra.mxu1 %v3831_v34  ;;  %v3832_v42 = vld [vmem:[%s4999_s5 + $0x30] sm:$0xff]  }
 0x997   : > { %2306 = vrot.lane.b32.xlu0 %v2178_v43, %s3904_s24  ;;  %v3833_v43 = vld [vmem:[%s4999_s5 + $0x38] ss:$0 sps:$4 sm:$0x33]   ;;  %3694 = vmatprep.subr.bf16.mxu1 %v3832_v42 }
 0x999   : > { %v2272_v48 = vld [vmem:[#allocation2 + $0x30] sm:$0xff] }
 0x99a   : > { %v2207_v44 = vld [vmem:[#allocation2 + $0x11] sm:$0xff]  ;;  %3695 = vmatpush3.bf16.msra.mxu1 %v3832_v42 }
 0x99b   : > { %v2270_v46 = vld [vmem:[#allocation2 + $0x10] sm:$0xff]  ;;  %v2214_v47 = vpack.c.bf16 %v2207_v44, %v4455_v37  ;;  %v2273_v50 = vld [vmem:[#allocation2 + $0x40] sm:$0xff]  ;;  %3754 = vmatprep.subr.msk.bf16.mxu1 %vm1254_vm10, %v3833_v43 }
 0x99c   : > { %v2198_v51 = vpack.c.bf16 %v2270_v46, %v4457_v38  ;;  %v2279_v3 = vpack.c.bf16 %v2273_v50, %v2272_v48  ;;  %v2239_v59 = vld [vmem:[#allocation2 + $0x12] sm:$0xff]  ;;  %v2271_v55 = vld [vmem:[#allocation2 + $0x20] sm:$0xff] }
 0x99d   : > { %2222 = vrot.lane.b32.xlu0 %v2214_v47, %s3911_s23  ;;  %v2325_v58 = vld [vmem:[#allocation2 + $0x42] sm:$0xff]  ;;  %v2362_v49 = vpack.c.bf16 %v2272_v48, %v2271_v55  ;;  %v2246_v63 = vpack.c.bf16 %v2239_v59, %v4461_v45  ;;  %v2324_v54 = vld [vmem:[#allocation2 + $0x32] sm:$0xff]  ;;  %v2278_v38 = vpack.c.bf16 %v2271_v55, %v2270_v46  ;;  %v2488_v46 = vsel %vm1254_vm10, %v3833_v43, 0 }
 0x99e   : > { %2202 = vst.msk [vmem:[#allocation3] sm:$0xff] %vm939_vm9, %v2198_v51  ;;  %2288 = vrot.lane.b32.xlu1 %v2279_v3, %s3912_s25  ;;  %v2331_v37 = vpack.c.bf16 %v2325_v58, %v2324_v54  ;;  %v2323_v9 = vld [vmem:[#allocation2 + $0x22] sm:$0xff]  ;;  %v2387_v16 = vld [vmem:[#allocation2 + $0x31] sm:$0xff]  ;;  %3697 = vmatpush3.bf16.msra.mxu1 %v2488_v46 }
 0x99f   : > { %2203 = vst.msk [vmem:[#allocation3 + $0x10] sm:$0xff] %vm939_vm9, %v2362_v49  ;;  %v2330_v11 = vpack.c.bf16 %v2323_v9, %v2239_v59  ;;  %v2386_v7 = vld [vmem:[#allocation2 + $0x21] sm:$0xff]  ;;  %v2426_v29 = vpack.c.bf16 %v2324_v54, %v2323_v9 }
 0x9a0   : > { %v2394_v4 = vpack.c.bf16 %v2387_v16, %v2386_v7  ;;  %v2388_v47 = vld [vmem:[#allocation2 + $0x41] sm:$0xff] }
 0x9a1   : > { %2254 = vrot.lane.b32.xlu0 %v2246_v63, %s3913_s26 }
 0x9a2   : > { %2340 = vrot.lane.b32.xlu1 %v2331_v37, %s3914_s29 }
 0x9a5   : > { %2286 = vrot.lane.b32.xlu0 %v2278_v38, %s3912_s25 }
 0x9a9   : > { %2338 = vrot.lane.b32.xlu0 %v2330_v11, %s3914_s29 }
 0x9ac   : > { %v3690_v5 = vpop.f32.mrb[28].mxu0 }
 0x9ad   : > { %v2156_v12 = vadd.f32 %v3690_v5, %v3482_v31  ;;  %2370 = vrot.lane.b32.xlu0 %v2362_v49, %s3915_s28  ;;  %v2147_v45 = vpop.f32.mrb[29].mxu0 }
 0x9ae   : > { %v2148_v25 = vadd.f32 %v3482_v31, %v2147_v45  ;;  %v3691_v19 = vpop.f32.mrb[30].mxu0 }
 0x9af   : > { %v2168_v17 = vmax.f32 %v2156_v12, 0.0  ;;  %v2159_v20 = vadd.f32 %v3691_v19, %v3482_v31  ;;  %v2150_v15 = vpop.f32.mrb[31].mxu0 }
 0x9b0   : > { %v2166_v21 = vmax.f32 %v2148_v25, 0.0  ;;  %v2151_v61 = vadd.f32 %v3482_v31, %v2150_v15 }
 0x9b1   : > { %2188 = vst.msk [vmem:[#allocation2 + $0x71] sm:$0xff] %vm939_vm9, %v2168_v17  ;;  %v2169_v24 = vmax.f32 %v2159_v20, 0.0  ;;  %2402 = vrot.lane.b32.xlu0 %v2394_v4, %s3916_s14 }
 0x9b2   : > { %2186 = vst.msk [vmem:[#allocation2 + $0x51] sm:$0xff] %vm939_vm9, %v2166_v21  ;;  %v2167_v26 = vmax.f32 %v2151_v61, 0.0 }
 0x9b3   : > { %v2181_v27 = vpack.c.bf16 %v2169_v24, %v2168_v17  ;;  %2189 = vst.msk [vmem:[#allocation2 + $0x81] sm:$0xff] %vm939_vm9, %v2169_v24 }
 0x9b4   : > { %v2180_v32 = vpack.c.bf16 %v2167_v26, %v2166_v21  ;;  %2187 = vst.msk [vmem:[#allocation2 + $0x61] sm:$0xff] %vm939_vm9, %v2167_v26 }
 0x9b5   : > { %2434 = vrot.lane.b32.xlu0 %v2426_v29, %s3905_s27  ;;  %2312 = vrot.lane.b32.xlu1 %v2181_v27, %s3904_s24 }
 0x9b8   : > { %v2276_v40 = vld [vmem:[#allocation2 + $0x70] sm:$0xff] }
 0x9b9   : > { %2224 = vrot.lane.b32.xlu1 %v2394_v4, %s3911_s23  ;;  %2310 = vrot.lane.b32.xlu0 %v2180_v32, %s3904_s24  ;;  %v2421_v31 = vld [vmem:[#allocation2 + $0x52] sm:$0xff] }
 0x9ba   : > { %v2357_v35 = vld [vmem:[#allocation2 + $0x50] sm:$0xff]  ;;  %v2427_v36 = vpack.c.bf16 %v2421_v31, %v2325_v58  ;;  %v2277_v59 = vld [vmem:[#allocation2 + $0x80] sm:$0xff] }
 0x9bb   : > { %v2363_v39 = vpack.c.bf16 %v2357_v35, %v2273_v50  ;;  %v2275_v33 = vld [vmem:[#allocation2 + $0x60] sm:$0xff]  ;;  %v2389_v44 = vld [vmem:[#allocation2 + $0x51] sm:$0xff]  ;;  %v2281_v55 = vpack.c.bf16 %v2277_v59, %v2276_v40  ;;  %v2365_v9 = vpack.c.bf16 %v4509_v0, %v2277_v59 }
 0x9bc   : > { %v2364_v41 = vpack.c.bf16 %v2276_v40, %v2275_v33  ;;  %v2395_v48 = vpack.c.bf16 %v2389_v44, %v2388_v47  ;;  %v2280_v50 = vpack.c.bf16 %v2275_v33, %v2357_v35  ;;  %v2327_v51 = vld [vmem:[#allocation2 + $0x62] sm:$0xff]  ;;  %v2328_v63 = vld [vmem:[#allocation2 + $0x72] sm:$0xff] }
 0x9bd   : > { %2204 = vst.msk [vmem:[#allocation3 + $0x20] sm:$0xff] %vm939_vm9, %v2363_v39  ;;  %2256 = vrot.lane.b32.xlu1 %v2426_v29, %s3913_s26  ;;  %2436 = vrot.lane.b32.xlu0 %v2427_v36, %s3905_s27  ;;  %v2332_v3 = vpack.c.bf16 %v2327_v51, %v2421_v31  ;;  %v2329_v58 = vld [vmem:[#allocation2 + $0x82] sm:$0xff]  ;;  %v2391_v54 = vld [vmem:[#allocation2 + $0x71] sm:$0xff]  ;;  %v2428_v11 = vpack.c.bf16 %v2328_v63, %v2327_v51 }
 0x9be   : > { %2205 = vst.msk [vmem:[#allocation3 + $0x30] sm:$0xff] %vm939_vm9, %v2364_v41  ;;  %v2390_v49 = vld [vmem:[#allocation2 + $0x61] sm:$0xff]  ;;  %v2333_v37 = vpack.c.bf16 %v2329_v58, %v2328_v63  ;;  %v2429_v12 = vpack.c.bf16 %v4521_v1, %v2329_v58 }
 0x9bf   : > { %v2396_v38 = vpack.c.bf16 %v2391_v54, %v2390_v49  ;;  %v2392_v5 = vld [vmem:[#allocation2 + $0x81] sm:$0xff] }
 0x9c0   : > { %v2397_v7 = vpack.c.bf16 %v4517_v62, %v2392_v5  ;;  %v3494_v49 = vld [vmem:[%s5000_s6 + $0x2] ss:$0 sm:$0xff] }
 0x9c1   : > { %2372 = vrot.lane.b32.xlu1 %v2363_v39, %s3915_s28  ;;  %2258 = vrot.lane.b32.xlu0 %v2427_v36, %s3913_s26 }
 0x9c5   : > { %2404 = vrot.lane.b32.xlu1 %v2395_v48, %s3916_s14  ;;  %2290 = vrot.lane.b32.xlu0 %v2280_v50, %s3912_s25 }
 0x9c9   : > { %2226 = vrot.lane.b32.xlu1 %v2395_v48, %s3911_s23  ;;  %2342 = vrot.lane.b32.xlu0 %v2332_v3, %s3914_s29 }
 0x9cd   : > { %2292 = vrot.lane.b32.xlu1 %v2281_v55, %s3912_s25  ;;  %2374 = vrot.lane.b32.xlu0 %v2364_v41, %s3915_s28  ;;  %v3502_v55 = vld [vmem:[%s5001_s7 + $0x4] sm:$0x3] }
 0x9ce   : > { %3755 = vmatprep.subr.msk.bf16.mxu0 %vm1254_vm10, %v3502_v55  ;;  %v2590_v58 = vsel %vm1254_vm10, %v3502_v55, 0 }
 0x9cf   : > { %3707 = vmatpush3.bf16.msra.mxu0 %v2590_v58  ;;  %v2663_v58 = vmul.f32 0.484375, %v2062_v18 }
 0x9d1   : > { %2344 = vrot.lane.b32.xlu1 %v2333_v37, %s3914_s29  ;;  %2406 = vrot.lane.b32.xlu0 %v2396_v38, %s3916_s14 }
 0x9d5   : > { %2376 = vrot.lane.b32.xlu1 %v2365_v9, %s3915_s28  ;;  %2438 = vrot.lane.b32.xlu0 %v2428_v11, %s3905_s27 }
 0x9d9   : > { %2228 = vrot.lane.b32.xlu1 %v2396_v38, %s3911_s23 }
 0x9dd   : > { %2260 = vrot.lane.b32.xlu1 %v2428_v11, %s3913_s26 }
 0x9e1   : > { %2408 = vrot.lane.b32.xlu1 %v2397_v7, %s3916_s14 }
 0x9e5   : > { %2440 = vrot.lane.b32.xlu1 %v2429_v12, %s3905_s27 }
 0xa08   : > { %v2309_v16 = vpop.permute.xlu1 %2308 }
 0xa09   : > { %v2307_v45 = vpop.permute.xlu0 %2306 }
 0xa0f   : > { %v2223_v0 = vpop.permute.xlu0 %2222 }
 0xa10   : > { %2234 = vst.msk [vmem:[#allocation3] sm:$0xff] %vm992_vm11, %v2223_v0  ;;  %v2289_v17 = vpop.permute.xlu1 %2288 }
 0xa13   : > { %v2255_v25 = vpop.permute.xlu0 %2254 }
 0xa14   : > { %2266 = vst.msk [vmem:[#allocation3] sm:$0xff] %vm1025_vm12, %v2255_v25  ;;  %v2341_v20 = vpop.permute.xlu1 %2340 }
 0xa17   : > { %v2287_v19 = vpop.permute.xlu0 %2286 }
 0xa18   : > { %2298 = vst.msk [vmem:[#allocation3] sm:$0xff] %vm1058_vm13, %v2287_v19 }
 0xa19   : > { %2318 = vst.msk [vmem:[#allocation3] sm:$0xff] %vm1079_vm14, %v2307_v45 }
 0xa1b   : > { %v2339_v62 = vpop.permute.xlu0 %2338 }
 0xa1c   : > { %2350 = vst.msk [vmem:[#allocation3] sm:$0xff] %vm1112_vm15, %v2339_v62 }
 0xa1f   : > { %v2371_v1 = vpop.permute.xlu0 %2370 }
 0xa20   : > { %2382 = vst.msk [vmem:[#allocation3] sm:$0xff] %vm1145_vm1, %v2371_v1 }
 0xa23   : > { %v2403_v15 = vpop.permute.xlu0 %2402 }
 0xa24   : > { %2414 = vst.msk [vmem:[#allocation3] sm:$0xff] %vm1178_vm2, %v2403_v15 }
 0xa27   : > { %v2435_v4 = vpop.permute.xlu0 %2434  ;;  %v2313_v21 = vpop.permute.xlu1 %2312 }
 0xa28   : > { %2446 = vst.msk [vmem:[#allocation3] sm:$0xff] %vm1211_vm3, %v2435_v4 }
 0xa2b   : > { %v2225_v61 = vpop.permute.xlu1 %2224  ;;  %v2311_v24 = vpop.permute.xlu0 %2310 }
 0xa2c   : > { %2235 = vst.msk [vmem:[#allocation3 + $0x10] sm:$0xff] %vm992_vm11, %v2225_v61 }
 0xa2f   : > { %v2257_v26 = vpop.permute.xlu1 %2256  ;;  %v2437_v27 = vpop.permute.xlu0 %2436  ;;  %v2450_v29 = vld [vmem:[#allocation3] sm:$0xff] }
 0xa30   : > { %2267 = vst.msk [vmem:[#allocation3 + $0x10] sm:$0xff] %vm1025_vm12, %v2257_v26  ;;  %3698 = vmatprep.mubr.msk.bf16.mxu1 %vm1241_vm4, %v2450_v29 }
 0xa31   : > { %2299 = vst.msk [vmem:[#allocation3 + $0x10] sm:$0xff] %vm1058_vm13, %v2289_v17 }
 0xa32   : > { %2319 = vst.msk [vmem:[#allocation3 + $0x10] sm:$0xff] %vm1079_vm14, %v2309_v16 }
 0xa33   : > { %2351 = vst.msk [vmem:[#allocation3 + $0x10] sm:$0xff] %vm1112_vm15, %v2341_v20  ;;  %v2373_v32 = vpop.permute.xlu1 %2372  ;;  %v2259_v34 = vpop.permute.xlu0 %2258 }
 0xa34   : > { %2383 = vst.msk [vmem:[#allocation3 + $0x10] sm:$0xff] %vm1145_vm1, %v2373_v32 }
 0xa37   : > { %v2405_v31 = vpop.permute.xlu1 %2404  ;;  %v2291_v35 = vpop.permute.xlu0 %2290 }
 0xa38   : > { %2415 = vst.msk [vmem:[#allocation3 + $0x10] sm:$0xff] %vm1178_vm2, %v2405_v31  ;;  %v3834_v31 = vld [vmem:[%s4997_s3 + $0x18] sm:$0xff]  }
 0xa39   : > { %2447 = vst.msk [vmem:[#allocation3 + $0x10] sm:$0xff] %vm1211_vm3, %v2437_v27  ;;  %3716 = vmatprep.subr.bf16.mxu1 %v3834_v31 }
 0xa3b   : > { %v2227_v36 = vpop.permute.xlu1 %2226  ;;  %v2343_v39 = vpop.permute.xlu0 %2342 }
 0xa3c   : > { %2236 = vst.msk [vmem:[#allocation3 + $0x20] sm:$0xff] %vm992_vm11, %v2227_v36 }
 0xa3d   : > { %2268 = vst.msk [vmem:[#allocation3 + $0x20] sm:$0xff] %vm1025_vm12, %v2259_v34 }
 0xa3e   : > { %2300 = vst.msk [vmem:[#allocation3 + $0x20] sm:$0xff] %vm1058_vm13, %v2291_v35  ;;  %v3504_v35 = vld [vmem:[%s5002_s8 + $0x2] ss:$0 sm:$0xff] }
 0xa3f   : > { %2320 = vst.msk [vmem:[#allocation3 + $0x20] sm:$0xff] %vm1079_vm14, %v2311_v24  ;;  %v2293_v33 = vpop.permute.xlu1 %2292  ;;  %v2375_v40 = vpop.permute.xlu0 %2374 }
 0xa40   : > { %2352 = vst.msk [vmem:[#allocation3 + $0x20] sm:$0xff] %vm1112_vm15, %v2343_v39  ;;  %v2451_v41 = vld [vmem:[#allocation3 + $0x10] sm:$0xff] }
 0xa41   : > { %2384 = vst.msk [vmem:[#allocation3 + $0x20] sm:$0xff] %vm1145_vm1, %v2375_v40  ;;  %3699 = vmatmul.mubr.msk.bf16.vlgmr.msra.gmra.mrb[40].mxu1 %vm1241_vm4, %v2451_v41 }
 0xa42   : > { %3717 = vmatpush3.bf16.msra.mxu1 %v3834_v31 }
 0xa43   : > { %v2345_v42 = vpop.permute.xlu1 %2344  ;;  %v2407_v43 = vpop.permute.xlu0 %2406 }
 0xa44   : > { %2416 = vst.msk [vmem:[#allocation3 + $0x20] sm:$0xff] %vm1178_vm2, %v2407_v43 }
 0xa47   : > { %v2377_v44 = vpop.permute.xlu1 %2376  ;;  %v2439_v46 = vpop.permute.xlu0 %2438 }
 0xa48   : > { %2448 = vst.msk [vmem:[#allocation3 + $0x20] sm:$0xff] %vm1211_vm3, %v2439_v46 }
 0xa4b   : > { %v2229_v47 = vpop.permute.xlu1 %2228 }
 0xa4c   : > { %2237 = vst.msk [vmem:[#allocation3 + $0x30] sm:$0xff] %vm992_vm11, %v2229_v47  ;;  %v2660_v47 = vmul.f32 0.484375, %v2059_v6 }
 0xa4f   : > { %v2261_v48 = vpop.permute.xlu1 %2260  ;;  %v2452_v50 = vld [vmem:[#allocation3 + $0x20] sm:$0xff] }
 0xa50   : > { %2269 = vst.msk [vmem:[#allocation3 + $0x30] sm:$0xff] %vm1025_vm12, %v2261_v48  ;;  %3702 = vmatprep.mubr.msk.bf16.mxu1 %vm1241_vm4, %v2452_v50 }
 0xa51   : > { %2301 = vst.msk [vmem:[#allocation3 + $0x30] sm:$0xff] %vm1058_vm13, %v2293_v33  ;;  %v2659_v33 = vmul.f32 0.484375, %v2058_v53 }
 0xa52   : > { %2321 = vst.msk [vmem:[#allocation3 + $0x30] sm:$0xff] %vm1079_vm14, %v2313_v21 }
 0xa53   : > { %2353 = vst.msk [vmem:[#allocation3 + $0x30] sm:$0xff] %vm1112_vm15, %v2345_v42  ;;  %v2409_v51 = vpop.permute.xlu1 %2408  ;;  %v2657_v42 = vmul.f32 0.484375, %v2056_v2 }
 0xa54   : > { %2385 = vst.msk [vmem:[#allocation3 + $0x30] sm:$0xff] %vm1145_vm1, %v2377_v44 }
 0xa55   : > { %2417 = vst.msk [vmem:[#allocation3 + $0x30] sm:$0xff] %vm1178_vm2, %v2409_v51 }
 0xa57   : > { %v2441_v3 = vpop.permute.xlu1 %2440 }
 0xa58   : > { %2449 = vst.msk [vmem:[#allocation3 + $0x30] sm:$0xff] %vm1211_vm3, %v2441_v3 }
 0xa5f   : > { %v2453_v59 = vld [vmem:[#allocation3 + $0x30] sm:$0xff] }
 0xa60   : > { %3703 = vmatmul.mubr.msk.bf16.gmra.mrb[44].mxu1 %vm1241_vm4, %v2453_v59 }
 0xb14   : > { %v3700_v63 = vpop.f32.mrb[40].mxu1 }
 0xb15   : > { %v2533_v54 = vadd.f32 %v3700_v63, %v3494_v49  ;;  %v2524_v37 = vpop.f32.mrb[41].mxu1 }
 0xb16   : > { %v2525_v38 = vadd.f32 %v3494_v49, %v2524_v37  ;;  %v3701_v9 = vpop.f32.mrb[42].mxu1 }
 0xb17   : > { %v2536_v11 = vadd.f32 %v3701_v9, %v3494_v49  ;;  %v2527_v5 = vpop.f32.mrb[43].mxu1  ;;  %v2557_v12 = vmax.f32 %v2533_v54, 0.0  ;;  %v2661_v54 = vmul.f32 0.484375, %v2060_v13 }
 0xb18   : > { %v2528_v7 = vadd.f32 %v3494_v49, %v2527_v5  ;;  %v2555_v0 = vmax.f32 %v2525_v38, 0.0 }
 0xb19   : > { %v2558_v45 = vmax.f32 %v2536_v11, 0.0  ;;  %v2664_v11 = vmul.f32 0.484375, %v2063_v28 }
 0xb1a   : > { %v2556_v25 = vmax.f32 %v2528_v7, 0.0 }
 0xb1b   : > { %v2568_v19 = vpack.c.bf16 %v2558_v45, %v2557_v12 }
 0xb1c   : > { %v2567_v16 = vpack.c.bf16 %v2556_v25, %v2555_v0 }
 0xb1e   : > { %3708 = vmatprep.mubr.msk.bf16.mxu0 %vm939_vm9, %v2567_v16 }
 0xb1f   : > { %3709 = vmatmul.mubr.msk.bf16.vlgmr.msra.gmra.mrb[32].mxu0 %vm939_vm9, %v2568_v19 }
 0xb33   : > { %v3704_v62 = vpop.f32.mrb[44].mxu1 }
 0xb34   : > { %v2549_v17 = vadd.f32 %v3704_v62, %v3494_v49  ;;  %v2540_v1 = vpop.f32.mrb[45].mxu1 }
 0xb35   : > { %v2541_v20 = vadd.f32 %v3494_v49, %v2540_v1  ;;  %v3705_v15 = vpop.f32.mrb[46].mxu1 }
 0xb36   : > { %v2552_v4 = vadd.f32 %v3705_v15, %v3494_v49  ;;  %v2543_v21 = vpop.f32.mrb[47].mxu1  ;;  %v2561_v24 = vmax.f32 %v2549_v17, 0.0 }
 0xb37   : > { %v2544_v61 = vadd.f32 %v3494_v49, %v2543_v21  ;;  %v2559_v27 = vmax.f32 %v2541_v20, 0.0 }
 0xb38   : > { %v2562_v26 = vmax.f32 %v2552_v4, 0.0 }
 0xb39   : > { %v2560_v29 = vmax.f32 %v2544_v61, 0.0 }
 0xb3a   : > { %v2570_v32 = vpack.c.bf16 %v2562_v26, %v2561_v24 }
 0xb3b   : > { %v2569_v34 = vpack.c.bf16 %v2560_v29, %v2559_v27  ;;  %v2823_v29 = vld [vmem:[#allocation2 + $0x1] sm:$0xff] }
 0xb3d   : > { %3712 = vmatprep.mubr.msk.bf16.mxu0 %vm939_vm9, %v2569_v34 }
 0xb3e   : > { %3713 = vmatmul.mubr.msk.bf16.gmra.mrb[36].mxu0 %vm939_vm9, %v2570_v32  ;;  %v2807_v32 = vld [vmem:[#allocation2] sm:$0xff] }
 0xbf2   : > { %v3710_v36 = vpop.f32.mrb[32].mxu0 }
 0xbf3   : > { %v2635_v39 = vadd.f32 %v3710_v36, %v3504_v35  ;;  %v2626_v40 = vpop.f32.mrb[33].mxu0 }
 0xbf4   : > { %v2627_v41 = vadd.f32 %v3504_v35, %v2626_v40  ;;  %v3711_v43 = vpop.f32.mrb[34].mxu0 }
 0xbf5   : > { %v4762_v44 = vadd.f32 %v2659_v33, %v2635_v39  ;;  %v2638_v46 = vadd.f32 %v3711_v43, %v3504_v35  ;;  %v2629_v48 = vpop.f32.mrb[35].mxu0 }
 0xbf6   : > { %v4766_v50 = vadd.f32 %v2657_v42, %v2627_v41  ;;  %v2630_v51 = vadd.f32 %v3504_v35, %v2629_v48  ;;  %v2855_v41 = vld [vmem:[#allocation2 + $0x2] sm:$0xff] }
 0xbf7   : > { %v4770_v53 = vadd.f32 %v2660_v47, %v2638_v46  ;;  %v2675_v57 = vmax.f32 %v4762_v44, 0.0 }
 0xbf8   : > { %v4772_v3 = vadd.f32 %v2658_v52, %v2630_v51  ;;  %v2673_v59 = vmax.f32 %v4766_v50, 0.0 }
 0xbf9   : > { %v2676_v2 = vmax.f32 %v4770_v53, 0.0 }
 0xbfa   : > { %v2674_v56 = vmax.f32 %v4772_v3, 0.0 }
 0xbfb   : > { %v2687_v6 = vpack.c.bf16 %v2676_v2, %v2675_v57 }
 0xbfc   : > { %v2686_v10 = vpack.c.bf16 %v2674_v56, %v2673_v59 }
 0xbfe   : > { %3718 = vmatprep.mubr.msk.bf16.mxu1 %vm332_vm0, %v2686_v10 }
 0xbff   : > { %3719 = vmatmul.mubr.msk.bf16.vlgmr.msra.gmra.mrb[48].mxu1 %vm332_vm0, %v2687_v6 }
 0xc11   : > { %v3714_v8 = vpop.f32.mrb[36].mxu0 }
 0xc12   : > { %v2651_v55 = vadd.f32 %v3714_v8, %v3504_v35  ;;  %v2642_v49 = vpop.f32.mrb[37].mxu0 }
 0xc13   : > { %v2643_v63 = vadd.f32 %v3504_v35, %v2642_v49  ;;  %v3715_v37 = vpop.f32.mrb[38].mxu0 }
 0xc14   : > { %v4792_v38 = vadd.f32 %v2663_v58, %v2651_v55  ;;  %v2654_v9 = vadd.f32 %v3715_v37, %v3504_v35  ;;  %v2645_v5 = vpop.f32.mrb[39].mxu0 }
 0xc15   : > { %v4796_v7 = vadd.f32 %v2661_v54, %v2643_v63  ;;  %v2646_v12 = vadd.f32 %v3504_v35, %v2645_v5 }
 0xc16   : > { %v4800_v18 = vadd.f32 %v2664_v11, %v2654_v9  ;;  %v2679_v23 = vmax.f32 %v4792_v38, 0.0 }
 0xc17   : > { %v4802_v45 = vadd.f32 %v2662_v22, %v2646_v12  ;;  %v2677_v0 = vmax.f32 %v4796_v7, 0.0 }
 0xc18   : > { %v2680_v13 = vmax.f32 %v4800_v18, 0.0  ;;  %v3280_v53 = vmul.f32 0.484375, %v2679_v23 }
 0xc19   : > { %v2678_v14 = vmax.f32 %v4802_v45, 0.0  ;;  %v3278_v3 = vmul.f32 0.484375, %v2677_v0 }
 0xc1a   : > { %v2689_v28 = vpack.c.bf16 %v2680_v13, %v2679_v23 }
 0xc1b   : > { %v2688_v60 = vpack.c.bf16 %v2678_v14, %v2677_v0 }
 0xc1d   : > { %3722 = vmatprep.mubr.msk.bf16.mxu1 %vm332_vm0, %v2688_v60 }
 0xc1e   : > { %3723 = vmatmul.mubr.msk.bf16.gmra.mrb[52].mxu1 %vm332_vm0, %v2689_v28  ;;  %vm3330_vm0 = vcmask 523264  }
 0xcd2   : > { %v3720_v25 = vpop.f32.mrb[48].mxu1 }
 0xcd3   : > { %v2757_v19 = vadd.f32 %v3720_v25, %v3512_v30  ;;  %v2748_v16 = vpop.f32.mrb[49].mxu1 }
 0xcd4   : > { %v2749_v62 = vadd.f32 %v3512_v30, %v2748_v16  ;;  %v3721_v17 = vpop.f32.mrb[50].mxu1 }
 0xcd5   : > { %v2781_v1 = vmax.f32 %v2757_v19, 0.0  ;;  %v2760_v20 = vadd.f32 %v3721_v17, %v3512_v30  ;;  %v2751_v15 = vpop.f32.mrb[51].mxu1 }
 0xcd6   : > { %v2779_v4 = vmax.f32 %v2749_v62, 0.0  ;;  %v2752_v21 = vadd.f32 %v3512_v30, %v2751_v15 }
 0xcd7   : > { %2801 = vst.msk [vmem:[#allocation2 + $0x31] sm:$0xff] %vm939_vm9, %v2781_v1  ;;  %v2782_v61 = vmax.f32 %v2760_v20, 0.0 }
 0xcd8   : > { %2799 = vst.msk [vmem:[#allocation2 + $0x11] sm:$0xff] %vm939_vm9, %v2779_v4  ;;  %v2780_v24 = vmax.f32 %v2752_v21, 0.0 }
 0xcd9   : > { %v2796_v26 = vpack.c.bf16 %v2782_v61, %v2781_v1  ;;  %2802 = vst.msk [vmem:[#allocation2 + $0x41] sm:$0xff] %vm939_vm9, %v2782_v61  ;;  %v3835_v1 = vld [vmem:[%s4999_s5 + $0x3c] sm:$0xff]  }
 0xcda   : > { %v2795_v27 = vpack.c.bf16 %v2780_v24, %v2779_v4  ;;  %2800 = vst.msk [vmem:[#allocation2 + $0x21] sm:$0xff] %vm939_vm9, %v2780_v24  ;;  %3726 = vmatprep.subr.bf16.mxu0 %v3835_v1 }
 0xcdb   : > { %2925 = vrot.lane.b32.xlu1 %v2796_v26, %s3904_s24  ;;  %3727 = vmatpush3.bf16.msra.mxu0 %v3835_v1  ;;  %v3836_v26 = vld [vmem:[%s4999_s5 + $0x44] sm:$0xff]  }
 0xcdc   : > { %2923 = vrot.lane.b32.xlu0 %v2795_v27, %s3904_s24  ;;  %v3837_v27 = vld [vmem:[%s4999_s5 + $0x4c] ss:$0 sps:$4 sm:$0x33]   ;;  %3728 = vmatprep.subr.bf16.mxu0 %v3836_v26 }
 0xcde   : > { %v2889_v36 = vld [vmem:[#allocation2 + $0x30] sm:$0xff] }
 0xcdf   : > { %v2824_v34 = vld [vmem:[#allocation2 + $0x11] sm:$0xff]  ;;  %3729 = vmatpush3.bf16.msra.mxu0 %v3836_v26 }
 0xce0   : > { %v2887_v31 = vld [vmem:[#allocation2 + $0x10] sm:$0xff]  ;;  %v2831_v35 = vpack.c.bf16 %v2824_v34, %v2823_v29  ;;  %v2890_v39 = vld [vmem:[#allocation2 + $0x40] sm:$0xff]  ;;  %3756 = vmatprep.subr.msk.bf16.mxu0 %vm1254_vm10, %v3837_v27 }
 0xce1   : > { %v2815_v33 = vpack.c.bf16 %v2887_v31, %v2807_v32  ;;  %v2896_v40 = vpack.c.bf16 %v2890_v39, %v2889_v36  ;;  %v2856_v42 = vld [vmem:[#allocation2 + $0x12] sm:$0xff]  ;;  %v2888_v43 = vld [vmem:[#allocation2 + $0x20] sm:$0xff]  ;;  %v3105_v32 = vsel %vm1254_vm10, %v3837_v27, 0 }
 0xce2   : > { %2839 = vrot.lane.b32.xlu0 %v2831_v35, %s3911_s23  ;;  %v2942_v46 = vld [vmem:[#allocation2 + $0x42] sm:$0xff]  ;;  %v2979_v47 = vpack.c.bf16 %v2889_v36, %v2888_v43  ;;  %v2863_v48 = vpack.c.bf16 %v2856_v42, %v2855_v41  ;;  %v2941_v51 = vld [vmem:[#allocation2 + $0x32] sm:$0xff]  ;;  %v2895_v6 = vpack.c.bf16 %v2888_v43, %v2887_v31 }
 0xce3   : > { %2819 = vst.msk [vmem:[#allocation3] sm:$0xff] %vm939_vm9, %v2815_v33  ;;  %2905 = vrot.lane.b32.xlu1 %v2896_v40, %s3912_s25  ;;  %v2948_v52 = vpack.c.bf16 %v2942_v46, %v2941_v51  ;;  %v2940_v10 = vld [vmem:[#allocation2 + $0x22] sm:$0xff]  ;;  %v3004_v9 = vld [vmem:[#allocation2 + $0x31] sm:$0xff]  ;;  %3731 = vmatpush3.bf16.msra.mxu0 %v3105_v32 }
 0xce4   : > { %2820 = vst.msk [vmem:[#allocation3 + $0x10] sm:$0xff] %vm939_vm9, %v2979_v47  ;;  %v2947_v8 = vpack.c.bf16 %v2940_v10, %v2856_v42  ;;  %v3003_v58 = vld [vmem:[#allocation2 + $0x21] sm:$0xff]  ;;  %v3043_v62 = vpack.c.bf16 %v2941_v51, %v2940_v10  ;;  %v2978_v51 = vld [vmem:[#allocation2 + $0x90] sm:$0xff] }
 0xce5   : > { %v3011_v22 = vpack.c.bf16 %v3004_v9, %v3003_v58  ;;  %v3005_v34 = vld [vmem:[#allocation2 + $0x41] sm:$0xff]  ;;  %v3042_v58 = vld [vmem:[#allocation2 + $0x92] sm:$0xff] }
 0xce6   : > { %2871 = vrot.lane.b32.xlu0 %v2863_v48, %s3913_s26 }
 0xce7   : > { %2957 = vrot.lane.b32.xlu1 %v2948_v52, %s3914_s29 }
 0xcea   : > { %2903 = vrot.lane.b32.xlu0 %v2895_v6, %s3912_s25 }
 0xcee   : > { %2955 = vrot.lane.b32.xlu0 %v2947_v8, %s3914_s29  ;;  %v3010_v8 = vld [vmem:[#allocation2 + $0x91] sm:$0xff] }
 0xcf1   : > { %v3724_v55 = vpop.f32.mrb[52].mxu1 }
 0xcf2   : > { %v2773_v49 = vadd.f32 %v3724_v55, %v3512_v30  ;;  %2987 = vrot.lane.b32.xlu0 %v2979_v47, %s3915_s28  ;;  %v2764_v63 = vpop.f32.mrb[53].mxu1 }
 0xcf3   : > { %v2765_v54 = vadd.f32 %v3512_v30, %v2764_v63  ;;  %v3725_v37 = vpop.f32.mrb[54].mxu1 }
 0xcf4   : > { %v2785_v11 = vmax.f32 %v2773_v49, 0.0  ;;  %v2776_v5 = vadd.f32 %v3725_v37, %v3512_v30  ;;  %v2767_v12 = vpop.f32.mrb[55].mxu1 }
 0xcf5   : > { %v2783_v28 = vmax.f32 %v2765_v54, 0.0  ;;  %v2768_v60 = vadd.f32 %v3512_v30, %v2767_v12 }
 0xcf6   : > { %2805 = vst.msk [vmem:[#allocation2 + $0x71] sm:$0xff] %vm939_vm9, %v2785_v11  ;;  %v2786_v25 = vmax.f32 %v2776_v5, 0.0  ;;  %3019 = vrot.lane.b32.xlu0 %v3011_v22, %s3916_s14 }
 0xcf7   : > { %2803 = vst.msk [vmem:[#allocation2 + $0x51] sm:$0xff] %vm939_vm9, %v2783_v28  ;;  %v2784_v19 = vmax.f32 %v2768_v60, 0.0 }
 0xcf8   : > { %v2798_v16 = vpack.c.bf16 %v2786_v25, %v2785_v11  ;;  %2806 = vst.msk [vmem:[#allocation2 + $0x81] sm:$0xff] %vm939_vm9, %v2786_v25 }
 0xcf9   : > { %v2797_v17 = vpack.c.bf16 %v2784_v19, %v2783_v28  ;;  %2804 = vst.msk [vmem:[#allocation2 + $0x61] sm:$0xff] %vm939_vm9, %v2784_v19 }
 0xcfa   : > { %3051 = vrot.lane.b32.xlu0 %v3043_v62, %s3905_s27  ;;  %2929 = vrot.lane.b32.xlu1 %v2798_v16, %s3904_s24 }
 0xcfd   : > { %v2893_v61 = vld [vmem:[#allocation2 + $0x70] sm:$0xff] }
 0xcfe   : > { %2841 = vrot.lane.b32.xlu1 %v3011_v22, %s3911_s23  ;;  %2927 = vrot.lane.b32.xlu0 %v2797_v17, %s3904_s24  ;;  %v3038_v30 = vld [vmem:[#allocation2 + $0x52] sm:$0xff] }
 0xcff   : > { %v2974_v20 = vld [vmem:[#allocation2 + $0x50] sm:$0xff]  ;;  %v3044_v15 = vpack.c.bf16 %v3038_v30, %v2942_v46  ;;  %v2894_v33 = vld [vmem:[#allocation2 + $0x80] sm:$0xff] }
 0xd00   : > { %v2980_v4 = vpack.c.bf16 %v2974_v20, %v2890_v39  ;;  %v2892_v21 = vld [vmem:[#allocation2 + $0x60] sm:$0xff]  ;;  %v3006_v29 = vld [vmem:[#allocation2 + $0x51] sm:$0xff]  ;;  %v2898_v40 = vpack.c.bf16 %v2894_v33, %v2893_v61  ;;  %v2982_v52 = vpack.c.bf16 %v2978_v51, %v2894_v33 }
 0xd01   : > { %v2981_v24 = vpack.c.bf16 %v2893_v61, %v2892_v21  ;;  %v3012_v31 = vpack.c.bf16 %v3006_v29, %v3005_v34  ;;  %v2897_v35 = vpack.c.bf16 %v2892_v21, %v2974_v20  ;;  %v2944_v36 = vld [vmem:[#allocation2 + $0x62] sm:$0xff]  ;;  %v2945_v43 = vld [vmem:[#allocation2 + $0x72] sm:$0xff] }
 0xd02   : > { %2821 = vst.msk [vmem:[#allocation3 + $0x20] sm:$0xff] %vm939_vm9, %v2980_v4  ;;  %2873 = vrot.lane.b32.xlu1 %v3043_v62, %s3913_s26  ;;  %3053 = vrot.lane.b32.xlu0 %v3044_v15, %s3905_s27  ;;  %v2949_v39 = vpack.c.bf16 %v2944_v36, %v3038_v30  ;;  %v2946_v41 = vld [vmem:[#allocation2 + $0x82] sm:$0xff]  ;;  %v3008_v46 = vld [vmem:[#allocation2 + $0x71] sm:$0xff]  ;;  %v3045_v6 = vpack.c.bf16 %v2945_v43, %v2944_v36 }
 0xd03   : > { %2822 = vst.msk [vmem:[#allocation3 + $0x30] sm:$0xff] %vm939_vm9, %v2981_v24  ;;  %v3007_v42 = vld [vmem:[#allocation2 + $0x61] sm:$0xff]  ;;  %v2950_v47 = vpack.c.bf16 %v2946_v41, %v2945_v43  ;;  %v3046_v49 = vpack.c.bf16 %v3042_v58, %v2946_v41 }
 0xd04   : > { %v3013_v48 = vpack.c.bf16 %v3008_v46, %v3007_v42  ;;  %v3009_v10 = vld [vmem:[#allocation2 + $0x81] sm:$0xff] }
 0xd05   : > { %v3014_v55 = vpack.c.bf16 %v3010_v8, %v3009_v10  ;;  %v3532_v43 = vld [vmem:[%s5001_s7 + $0x6] sm:$0x3] }
 0xd06   : > { %2989 = vrot.lane.b32.xlu1 %v2980_v4, %s3915_s28  ;;  %2875 = vrot.lane.b32.xlu0 %v3044_v15, %s3913_s26  ;;  %v3207_v46 = vsel %vm1254_vm10, %v3532_v43, 0 }
 0xd07   : > { %3757 = vmatprep.subr.msk.bf16.mxu1 %vm1254_vm10, %v3532_v43 }
 0xd08   : > { %3741 = vmatpush3.bf16.msra.mxu1 %v3207_v46 }
 0xd0a   : > { %3021 = vrot.lane.b32.xlu1 %v3012_v31, %s3916_s14  ;;  %2907 = vrot.lane.b32.xlu0 %v2897_v35, %s3912_s25 }
 0xd0e   : > { %2843 = vrot.lane.b32.xlu1 %v3012_v31, %s3911_s23  ;;  %2959 = vrot.lane.b32.xlu0 %v2949_v39, %s3914_s29 }
 0xd12   : > { %2909 = vrot.lane.b32.xlu1 %v2898_v40, %s3912_s25  ;;  %2991 = vrot.lane.b32.xlu0 %v2981_v24, %s3915_s28 }
 0xd16   : > { %2961 = vrot.lane.b32.xlu1 %v2950_v47, %s3914_s29  ;;  %3023 = vrot.lane.b32.xlu0 %v3013_v48, %s3916_s14  ;;  %v3524_v47 = vld [vmem:[%s5000_s6 + $0x3] ss:$0 sm:$0xff] }
 0xd1a   : > { %2993 = vrot.lane.b32.xlu1 %v2982_v52, %s3915_s28  ;;  %3055 = vrot.lane.b32.xlu0 %v3045_v6, %s3905_s27  ;;  %s3842_s28 = sshll.u32 %s3917_s13, 4  ;;  %s3843_s28 = int_to_ptr.vmem [resolvable:$false] %s3842_s28 }
 0xd1e   : > { %2845 = vrot.lane.b32.xlu1 %v3013_v48, %s3911_s23  ;;  %s4950_s23 = scalar_lea.hbm %s5003_s9, %s3545_s17 }
 0xd22   : > { %2877 = vrot.lane.b32.xlu1 %v3045_v6, %s3913_s26 }
 0xd26   : > { %3025 = vrot.lane.b32.xlu1 %v3014_v55, %s3916_s14  ;;  %s323_s14 = sand.u32 1, %s3892_s10  }
 0xd27   : > { %s3413_s21 = sshll.u32 %s323_s14, 4  ;;  %s4952_s25 = scalar_lea.sflag [#allocation5], %s323_s14 }
 0xd28   : > { %s325_s22 = scalar_lea.vmem [#allocation4], %s3413_s21  ;;  %s3844_s21 = scalar_lea.vmem %s3843_s28, 512 }
 0xd29   : > { %s3347_s16 = sshll.u32 %s325_s22, 4  ;;  %s4945_s16 = int_to_ptr.vmem [resolvable:$true] %s3347_s16 }
 0xd2a   : > { %3057 = vrot.lane.b32.xlu1 %v3046_v49, %s3905_s27  ;;  %s3838_s29 = scalar_lea.vmem %s4945_s16, 256  ;;  %p3845_p0 = scmp.lt.s32.totalorder %s4945_s16, %s3843_s28 }
 0xd2b   : > { %p3839_p11 = scmp.ne.s32.totalorder %s4945_s16, %s3838_s29  ;;  %p3846_p1 = scmp.lt.s32.totalorder %s3844_s21, %s3838_s29 }
 0xd2d   : > { %p3840_p12 = pnand %p3839_p11, %p4007_p5  ;;  %p3847_p2 = por %p3846_p1, %p3845_p0 }
 0xd2f   : > { %p3841_p13 = pneg %p3840_p12 }
 0xd31   : > { %p3848_p3 = pnand %p3847_p2, %p3841_p13 }
 0xd4d   : > { %v2926_v11 = vpop.permute.xlu1 %2925 }
 0xd4e   : > { %v2924_v63 = vpop.permute.xlu0 %2923 }
 0xd54   : > { %v2840_v54 = vpop.permute.xlu0 %2839 }
 0xd55   : > { %2851 = vst.msk [vmem:[#allocation3] sm:$0xff] %vm992_vm11, %v2840_v54  ;;  %v2906_v12 = vpop.permute.xlu1 %2905 }
 0xd58   : > { %v2872_v37 = vpop.permute.xlu0 %2871 }
 0xd59   : > { %2883 = vst.msk [vmem:[#allocation3] sm:$0xff] %vm1025_vm12, %v2872_v37  ;;  %v2958_v28 = vpop.permute.xlu1 %2957 }
 0xd5c   : > { %v2904_v9 = vpop.permute.xlu0 %2903 }
 0xd5d   : > { %2915 = vst.msk [vmem:[#allocation3] sm:$0xff] %vm1058_vm13, %v2904_v9 }
 0xd5e   : > { %2935 = vst.msk [vmem:[#allocation3] sm:$0xff] %vm1079_vm14, %v2924_v63 }
 0xd60   : > { %v2956_v5 = vpop.permute.xlu0 %2955 }
 0xd61   : > { %2967 = vst.msk [vmem:[#allocation3] sm:$0xff] %vm1112_vm15, %v2956_v5 }
 0xd64   : > { %v2988_v22 = vpop.permute.xlu0 %2987 }
 0xd65   : > { %2999 = vst.msk [vmem:[#allocation3] sm:$0xff] %vm1145_vm1, %v2988_v22 }
 0xd68   : > { %v3020_v60 = vpop.permute.xlu0 %3019 }
 0xd69   : > { %3031 = vst.msk [vmem:[#allocation3] sm:$0xff] %vm1178_vm2, %v3020_v60 }
 0xd6c   : > { %v3052_v25 = vpop.permute.xlu0 %3051  ;;  %v2930_v19 = vpop.permute.xlu1 %2929 }
 0xd6d   : > { %3063 = vst.msk [vmem:[#allocation3] sm:$0xff] %vm1211_vm3, %v3052_v25 }
 0xd70   : > { %v2842_v16 = vpop.permute.xlu1 %2841  ;;  %v2928_v62 = vpop.permute.xlu0 %2927 }
 0xd71   : > { %2852 = vst.msk [vmem:[#allocation3 + $0x10] sm:$0xff] %vm992_vm11, %v2842_v16 }
 0xd74   : > { %v2874_v17 = vpop.permute.xlu1 %2873  ;;  %v3054_v1 = vpop.permute.xlu0 %3053  ;;  %v3067_v30 = vld [vmem:[#allocation3] sm:$0xff] }
 0xd75   : > { %2884 = vst.msk [vmem:[#allocation3 + $0x10] sm:$0xff] %vm1025_vm12, %v2874_v17  ;;  %3732 = vmatprep.mubr.msk.bf16.mxu0 %vm1241_vm4, %v3067_v30 }
 0xd76   : > { %2916 = vst.msk [vmem:[#allocation3 + $0x10] sm:$0xff] %vm1058_vm13, %v2906_v12 }
 0xd77   : > { %2936 = vst.msk [vmem:[#allocation3 + $0x10] sm:$0xff] %vm1079_vm14, %v2926_v11 }
 0xd78   : > { %2968 = vst.msk [vmem:[#allocation3 + $0x10] sm:$0xff] %vm1112_vm15, %v2958_v28  ;;  %v2990_v20 = vpop.permute.xlu1 %2989  ;;  %v2876_v15 = vpop.permute.xlu0 %2875 }
 0xd79   : > { %3000 = vst.msk [vmem:[#allocation3 + $0x10] sm:$0xff] %vm1145_vm1, %v2990_v20 }
 0xd7c   : > { %v3022_v4 = vpop.permute.xlu1 %3021  ;;  %v2908_v21 = vpop.permute.xlu0 %2907 }
 0xd7d   : > { %3032 = vst.msk [vmem:[#allocation3 + $0x10] sm:$0xff] %vm1178_vm2, %v3022_v4  ;;  %v3534_v4 = vld [vmem:[%s5002_s8 + $0x3] ss:$0 sm:$0xff] }
 0xd7e   : > { %3064 = vst.msk [vmem:[#allocation3 + $0x10] sm:$0xff] %vm1211_vm3, %v3054_v1 }
 0xd80   : > { %v2844_v61 = vpop.permute.xlu1 %2843  ;;  %v2960_v24 = vpop.permute.xlu0 %2959 }
 0xd81   : > { %2853 = vst.msk [vmem:[#allocation3 + $0x20] sm:$0xff] %vm992_vm11, %v2844_v61 }
 0xd82   : > { %2885 = vst.msk [vmem:[#allocation3 + $0x20] sm:$0xff] %vm1025_vm12, %v2876_v15 }
 0xd83   : > { %2917 = vst.msk [vmem:[#allocation3 + $0x20] sm:$0xff] %vm1058_vm13, %v2908_v21 }
 0xd84   : > { %2937 = vst.msk [vmem:[#allocation3 + $0x20] sm:$0xff] %vm1079_vm14, %v2928_v62  ;;  %v2910_v26 = vpop.permute.xlu1 %2909  ;;  %v2992_v27 = vpop.permute.xlu0 %2991 }
 0xd85   : > { %2969 = vst.msk [vmem:[#allocation3 + $0x20] sm:$0xff] %vm1112_vm15, %v2960_v24  ;;  %v3068_v29 = vld [vmem:[#allocation3 + $0x10] sm:$0xff]  ;;  %v3276_v24 = vmul.f32 0.484375, %v2675_v57 }
 0xd86   : > { %3001 = vst.msk [vmem:[#allocation3 + $0x20] sm:$0xff] %vm1145_vm1, %v2992_v27  ;;  %3733 = vmatmul.mubr.msk.bf16.vlgmr.msra.gmra.mrb[40].mxu0 %vm1241_vm4, %v3068_v29  ;;  %v3274_v29 = vmul.f32 0.484375, %v2673_v59 }
 0xd88   : > { %v2962_v32 = vpop.permute.xlu1 %2961  ;;  %v3024_v34 = vpop.permute.xlu0 %3023 }
 0xd89   : > { %3033 = vst.msk [vmem:[#allocation3 + $0x20] sm:$0xff] %vm1178_vm2, %v3024_v34 }
 0xd8c   : > { %v2994_v31 = vpop.permute.xlu1 %2993  ;;  %v3056_v35 = vpop.permute.xlu0 %3055 }
 0xd8d   : > { %3065 = vst.msk [vmem:[#allocation3 + $0x20] sm:$0xff] %vm1211_vm3, %v3056_v35  ;;  %v3277_v35 = vmul.f32 0.484375, %v2676_v2 }
 0xd90   : > { %v2846_v36 = vpop.permute.xlu1 %2845 }
 0xd91   : > { %2854 = vst.msk [vmem:[#allocation3 + $0x30] sm:$0xff] %vm992_vm11, %v2846_v36 }
 0xd94   : > { %v2878_v39 = vpop.permute.xlu1 %2877  ;;  %v3069_v33 = vld [vmem:[#allocation3 + $0x20] sm:$0xff] }
 0xd95   : > { %2886 = vst.msk [vmem:[#allocation3 + $0x30] sm:$0xff] %vm1025_vm12, %v2878_v39  ;;  %3736 = vmatprep.mubr.msk.bf16.mxu0 %vm1241_vm4, %v3069_v33 }
 0xd96   : > { %2918 = vst.msk [vmem:[#allocation3 + $0x30] sm:$0xff] %vm1058_vm13, %v2910_v26 }
 0xd97   : > { %2938 = vst.msk [vmem:[#allocation3 + $0x30] sm:$0xff] %vm1079_vm14, %v2930_v19 }
 0xd98   : > { %2970 = vst.msk [vmem:[#allocation3 + $0x30] sm:$0xff] %vm1112_vm15, %v2962_v32  ;;  %v3026_v40 = vpop.permute.xlu1 %3025 }
 0xd99   : > { %3002 = vst.msk [vmem:[#allocation3 + $0x30] sm:$0xff] %vm1145_vm1, %v2994_v31 }
 0xd9a   : > { %3034 = vst.msk [vmem:[#allocation3 + $0x30] sm:$0xff] %vm1178_vm2, %v3026_v40  ;;  %v3275_v40 = vmul.f32 0.484375, %v2674_v56 }
 0xd9c   : > { %v3058_v41 = vpop.permute.xlu1 %3057 }
 0xd9d   : > { %3066 = vst.msk [vmem:[#allocation3 + $0x30] sm:$0xff] %vm1211_vm3, %v3058_v41 }
 0xda4   : > { %v3070_v42 = vld [vmem:[#allocation3 + $0x30] sm:$0xff] }
 0xda5   : > { %3737 = vmatmul.mubr.msk.bf16.gmra.mrb[44].mxu0 %vm1241_vm4, %v3070_v42 }
 0xe59   : > { %v3734_v48 = vpop.f32.mrb[40].mxu0 }
 0xe5a   : > { %v3150_v51 = vadd.f32 %v3734_v48, %v3524_v47  ;;  %v3141_v52 = vpop.f32.mrb[41].mxu0 }
 0xe5b   : > { %v3142_v6 = vadd.f32 %v3524_v47, %v3141_v52  ;;  %v3735_v10 = vpop.f32.mrb[42].mxu0  ;;  %v3281_v52 = vmul.f32 0.484375, %v2680_v13 }
 0xe5c   : > { %v3153_v8 = vadd.f32 %v3735_v10, %v3524_v47  ;;  %v3144_v55 = vpop.f32.mrb[43].mxu0  ;;  %v3174_v49 = vmax.f32 %v3150_v51, 0.0 }
 0xe5d   : > { %v3145_v58 = vadd.f32 %v3524_v47, %v3144_v55  ;;  %v3172_v54 = vmax.f32 %v3142_v6, 0.0  ;;  %v3279_v55 = vmul.f32 0.484375, %v2678_v14 }
 0xe5e   : > { %v3175_v63 = vmax.f32 %v3153_v8, 0.0 }
 0xe5f   : > { %v3173_v37 = vmax.f32 %v3145_v58, 0.0 }
 0xe60   : > { %v3185_v9 = vpack.c.bf16 %v3175_v63, %v3174_v49 }
 0xe61   : > { %v3184_v11 = vpack.c.bf16 %v3173_v37, %v3172_v54 }
 0xe63   : > { %3742 = vmatprep.mubr.msk.bf16.mxu1 %vm939_vm9, %v3184_v11 }
 0xe64   : > { %3743 = vmatmul.mubr.msk.bf16.vlgmr.msra.gmra.mrb[56].mxu1 %vm939_vm9, %v3185_v9 }
 0xe78   : > { %v3738_v5 = vpop.f32.mrb[44].mxu0 }
 0xe79   : > { %v3166_v12 = vadd.f32 %v3738_v5, %v3524_v47  ;;  %v3157_v22 = vpop.f32.mrb[45].mxu0 }
 0xe7a   : > { %v3158_v28 = vadd.f32 %v3524_v47, %v3157_v22  ;;  %v3739_v60 = vpop.f32.mrb[46].mxu0 }
 0xe7b   : > { %v3169_v25 = vadd.f32 %v3739_v60, %v3524_v47  ;;  %v3160_v19 = vpop.f32.mrb[47].mxu0  ;;  %v3178_v62 = vmax.f32 %v3166_v12, 0.0 }
 0xe7c   : > { %v3161_v16 = vadd.f32 %v3524_v47, %v3160_v19  ;;  %v3176_v1 = vmax.f32 %v3158_v28, 0.0 }
 0xe7d   : > { %v3179_v17 = vmax.f32 %v3169_v25, 0.0 }
 0xe7e   : > { %v3177_v30 = vmax.f32 %v3161_v16, 0.0 }
 0xe7f   : > { %v3187_v20 = vpack.c.bf16 %v3179_v17, %v3178_v62 }
 0xe80   : > { %v3186_v15 = vpack.c.bf16 %v3177_v30, %v3176_v1 }
 0xe82   : > { %3746 = vmatprep.mubr.msk.bf16.mxu1 %vm939_vm9, %v3186_v15 }
 0xe83   : > { %3747 = vmatmul.mubr.msk.bf16.gmra.mrb[60].mxu1 %vm939_vm9, %v3187_v20 }
 0xf37   : > { %v3744_v21 = vpop.f32.mrb[56].mxu1 }
 0xf38   : > { %v3252_v61 = vadd.f32 %v3744_v21, %v3534_v4  ;;  %v3243_v26 = vpop.f32.mrb[57].mxu1 }
 0xf39   : > { %v3244_v27 = vadd.f32 %v3534_v4, %v3243_v26  ;;  %v3745_v32 = vpop.f32.mrb[58].mxu1 }
 0xf3a   : > { %v3284_v34 = vadd.f32 %v3276_v24, %v3252_v61  ;;  %v3255_v31 = vadd.f32 %v3745_v32, %v3534_v4  ;;  %v3246_v36 = vpop.f32.mrb[59].mxu1 }
 0xf3b   : > { %v3282_v39 = vadd.f32 %v3274_v29, %v3244_v27  ;;  %v3247_v33 = vadd.f32 %v3534_v4, %v3246_v36 }
 0xf3c   : > { %v3285_v41 = vadd.f32 %v3277_v35, %v3255_v31  ;;  %v3292_v50 = vmax.f32 %v3284_v34, 0.0 }
 0xf3d   : > { %v3290_v44 = vmax.f32 %v3282_v39, 0.0  ;;  %v3283_v57 = vadd.f32 %v3275_v40, %v3247_v33 }
 0xf3e   : > { %v3293_v59 = vmax.f32 %v3285_v41, 0.0 }
 0xf3f   : > { %3298 = vxpose.xlu0.b32.start [1/8] (short) (narrow) %v3290_v44, 16  ;;  %v3291_v42 = vmax.f32 %v3283_v57, 0.0 }
 0xf43   : > { %3299 = vxpose.xlu0.b32.cont [2/8] (short) (narrow) %v3291_v42, 16 }
 0xf47   : > { %3300 = vxpose.xlu0.b32.cont [3/8] (short) (narrow) %v3292_v50, 16 }
 0xf4b   : > { %3301 = vxpose.xlu0.b32.cont [4/8] (short) (narrow) %v3293_v59, 16 }
 0xf56   : > { %v3748_v43 = vpop.f32.mrb[60].mxu1 }
 0xf57   : > { %v3268_v46 = vadd.f32 %v3748_v43, %v3534_v4  ;;  %v3259_v2 = vpop.f32.mrb[61].mxu1 }
 0xf58   : > { %v3260_v47 = vadd.f32 %v3534_v4, %v3259_v2  ;;  %v3749_v56 = vpop.f32.mrb[62].mxu1 }
 0xf59   : > { %v3288_v48 = vadd.f32 %v3280_v53, %v3268_v46  ;;  %v3271_v51 = vadd.f32 %v3749_v56, %v3534_v4  ;;  %v3262_v6 = vpop.f32.mrb[63].mxu1 }
 0xf5a   : > { %v3286_v10 = vadd.f32 %v3278_v3, %v3260_v47  ;;  %v3263_v8 = vadd.f32 %v3534_v4, %v3262_v6 }
 0xf5b   : > { %v3289_v38 = vadd.f32 %v3281_v52, %v3271_v51  ;;  %v3296_v0 = vmax.f32 %v3288_v48, 0.0 }
 0xf5c   : > { %v3294_v23 = vmax.f32 %v3286_v10, 0.0  ;;  %v3287_v58 = vadd.f32 %v3279_v55, %v3263_v8 }
 0xf5d   : > { %v3297_v49 = vmax.f32 %v3289_v38, 0.0 }
 0xf5e   : > { %3302 = vxpose.xlu0.b32.cont [5/8] (short) (narrow) %v3294_v23, 16  ;;  %v3295_v7 = vmax.f32 %v3287_v58, 0.0 }
 0xf62   : > { %3303 = vxpose.xlu0.b32.cont [6/8] (short) (narrow) %v3295_v7, 16 }
 0xf66   : > { %3304 = vxpose.xlu0.b32.cont [7/8] (short) (narrow) %v3296_v0, 16 }
 0xf6a   : > { %3305 = vxpose.xlu0.b32.end [8/8] (short) (narrow) %v3297_v49, 16 }
 0xfce   : > { %v3314_v18 = vpop.trf.xlu0 }
 0xfcf   : > { %3331 = vst.msk [vmem:[%s325_s22] sm:$0xff] %vm3330_vm0, %v3314_v18 }
 0xfd2   : > { %v3315_v45 = vpop.trf.xlu0 }
 0xfd3   : > { %3332 = vst.msk [vmem:[%s325_s22 + $0x8] sm:$0xff] %vm3330_vm0, %v3315_v45 }
 0xfd4   : > { %3851 = shalt.err (!%p3848_p3)
}
 0xfd5   : > { %s3852_s14 = scalar_lea.hbm %s4950_s23, 256  ;;  %s3856_s24 = scalar_lea.hbm %s5003_s9, 512 }
 0xfd6   : > { %p3853_p4 = scmp.ne.s32.totalorder %s4950_s23, %s3852_s14  ;;  %p3857_p9 = scmp.lt.u32.totalorder %s4950_s23, %s5003_s9 }
 0xfd7   : > { %p3858_p10 = scmp.lt.u32.totalorder %s3856_s24, %s3852_s14  ;;  %p3860_p12 = scmp.lt.u32.totalorder %s3852_s14, %s4950_s23 }
 0xfd8   : > { %p3854_p7 = pnand %p3853_p4, %p4007_p5 }
 0xfd9   : > { %p3859_p11 = por %p3858_p10, %p3857_p9 }
 0xfda   : > { %p3855_p8 = pneg %p3854_p7 }
 0xfdb   : > { %p3861_p13 = por %p3860_p12, %p3859_p11 }
 0xfdd   : > { %p3862_p0 = pnand %p3861_p13, %p3855_p8 }
 0xfdf   : > { %3865 = shalt.err (!%p3862_p0)
}
 0xfe0   : > { %s3918_s29 = smov 128  }
 0xfe1   : > { %3758 = dma.vmem_to_hbm [thread:$0]  (%p4007_p5), %s4945_s16, 256, %s4950_s23, %s4952_s25, %s3918_s29, %s3918_s29, %s3913_s26  }
 0xfe2 PF: > { %p3764_p1 = scmp.ge.s32.totalorder %s3900_s12, 2  ;;  %s3362_s28 = sand.u32 1, %s3888_s30  }
 0xfe3   : > { %s3363_s21 = scalar_lea.sflag [#allocation5], %s3362_s28 }
 0xfe4   : > { %p3761_p2 = pnand %p3764_p1, %p4011_p6 }
 0xfe6   : > { %3883 = dma.done.wait (!%p3761_p2), %s3363_s21, 256  }
 0xfe7   : > { %3885 = vsyncadd (!%p3761_p2), %s3363_s21, 4294967040  ;;  %p19_p3 = scmp.ge.s32.totalorder %s3994_s15, 4   ;;  %s5006_s30 = smov %s3892_s10 }
 0xfe8   : > { %s5007_s10 = smov %s3896_s11  ;;  %s5008_s11 = smov %s4005_s18 }
 0xfe9   : > { %s5009_s12 = smov %s3994_s15  ;;  %21 = sbr.rel (!%p19_p3) target bundleno = 3 (0x3), region = 111 }
 0xff0   :  { %3368 = vsyncpa [#allocation5], 1 }
 0xff1   :  { %3370 = vsyncpa [#allocation5 + $0x1], 1 }

</bundles_post_ra>
